<compile_context>
chip_gen: v5e
topology: v5e:2x2
jax: 0.10.0
libtpu: 0.0.40
codegen_flags: <defaults>
</compile_context>

<pallas_src>
import functools
import jax
import jax.numpy as jnp
from jax.experimental import pallas as pl

_LANE = 128                 # lane-tile width
_PACK_COLS = 3 * _LANE      # fused projection blocks: [recv | send | node], one lane tile each


def _leaky(x, slope):
    return jnp.where(x > 0, x, slope * x)


def _dot(a, b):
    return jnp.dot(a, b, preferred_element_type=jnp.float32)


def _ceil8(n):
    return ((n + 7) // 8) * 8


# ------------------------------ packed-weight layout ------------------------------
def build_layout(A, H, De, out_size):
    """Row layout (offset, rows, cols) of every parameter block in the packed blob.

    Every block starts at a sublane-aligned (multiple-of-8) row offset and at lane 0,
    so every in-kernel sub-view is tile-aligned.
    """
    entries = [("enc_w", (A, H)), ("enc_b", (1, H))]
    for tag in ("g1", "g2"):
        entries += [
            (tag + "_wee", (De, H)),
            (tag + "_wx", (H, _PACK_COLS)),   # [wrx | wsx | wnxx], each in its own 128-lane tile
            (tag + "_wa", (A, _PACK_COLS)),   # [wra | wsa | wnxa]
            (tag + "_be", (1, H)),
            (tag + "_bn", (1, H)),
            (tag + "_wna", (H, H)),
        ]
    entries += [
        ("w1", (6 * H, 128)), ("b1", (1, 128)),
        ("w2", (128, 64)), ("b2", (1, 64)),
        ("w3", (64, out_size)), ("b3", (1, out_size)),
    ]
    layout, off = {}, 0
    for name, (r, c) in entries:
        layout[name] = (off, r, c)
        off += _ceil8(r)
    return layout, off


def _fuse_cols(w_r, w_s, w_n, H):
    """Place the three same-LHS projection weights into lane-tile-aligned column blocks."""
    rows = w_r.shape[0]
    out = jnp.zeros((rows, _PACK_COLS), jnp.float32)
    out = out.at[:, 0:H].set(w_r)
    out = out.at[:, _LANE:_LANE + H].set(w_s)
    out = out.at[:, 2 * _LANE:2 * _LANE + H].set(w_n)
    return out


def pack_params(params, len_node_attr, nhid, len_edge_attr, output_size):
    """Build the single packed weight blob (done once at init, HBM-side)."""
    A, H, De = len_node_attr, nhid, len_edge_attr
    layout, rows = build_layout(A, H, De, output_size)
    blob = jnp.zeros((rows, _PACK_COLS), jnp.float32)

    def put(b, name, arr):
        off, r, c = layout[name]
        return b.at[off:off + r, :c].set(arr.astype(jnp.float32))

    blob = put(blob, "enc_w", params["enc_w"])
    blob = put(blob, "enc_b", params["enc_b"])
    for tag, key in (("g1", "gin1"), ("g2", "gin2")):
        g = params[key]
        blob = put(blob, tag + "_wee", g["wee"])
        blob = put(blob, tag + "_wx", _fuse_cols(g["wrx"], g["wsx"], g["wnxx"], H))
        blob = put(blob, tag + "_wa", _fuse_cols(g["wra"], g["wsa"], g["wnxa"], H))
        blob = put(blob, tag + "_be", g["be"])
        blob = put(blob, tag + "_bn", g["bn"])
        blob = put(blob, tag + "_wna", g["wna"])
    blob = put(blob, "w1", params["w1"])
    blob = put(blob, "b1", params["b1"])
    blob = put(blob, "w2", params["w2"])
    blob = put(blob, "b2", params["b2"])
    blob = put(blob, "w3", params["w3"])
    blob = put(blob, "b3", params["b3"])
    return blob


# ------------------------------ fused forward kernel ------------------------------
def _fused_kernel(layout, gnn_layers, B, N, H,
                  node2d_ref, edge1_ref, edge2_ref, adj4_ref, w_ref, o_ref):
    def blk(name):
        off, r, c = layout[name]
        return w_ref[off:off + r, :c]

    node2d = node2d_ref[...]                 # (B*N, A)
    adj4 = adj4_ref[...]                     # (B, N, N, 1)

    # ---- node encoder: LeakyReLU(0.1)(node_attr @ W + b) ----
    x = _leaky(_dot(node2d, blk("enc_w")) + blk("enc_b"), 0.1)            # (B*N, H)

    def gin_stack(x, edge_ref, tag):
        wee = blk(tag + "_wee")
        wx = blk(tag + "_wx")                # (H, 384)  fused [recv|send|node] x-projections
        wa = blk(tag + "_wa")                # (A, 384)  fused node_attr projections
        wna = blk(tag + "_wna")              # (H, H)    edge_agg rows of node_processor
        # ---- loop-invariant precompute (same GraphInteractionLayer reused every iteration) ----
        e_code = (_dot(edge_ref[...], wee) + blk(tag + "_be")).reshape(B, N, N, H)
        pre = _dot(node2d, wa)               # (B*N, 384): [r_pre | s_pre | x_pre]
        pre_r = pre[:, 0:H]
        pre_s = pre[:, _LANE:_LANE + H]
        pre_x = pre[:, 2 * _LANE:2 * _LANE + H] + blk(tag + "_bn")   # node bias folded here
        # TODO(synk): for large gnn_layers switch this static unroll to lax.fori_loop to
        # bound live ranges / vreg pressure; at 2 layers the unroll is under budget.
        for _ in range(gnn_layers):
            xp = _dot(x, wx)                                          # (B*N, 384), one matmul
            r = (pre_r + xp[:, 0:H]).reshape(B, N, H)                 # receiver projection
            s = (pre_s + xp[:, _LANE:_LANE + H]).reshape(B, N, H)     # sender projection
            # edge_code[b,i,j] = leaky(We_e*edge + We_r*node_info[i] + We_s*node_info[j] + be)
            edge_code = _leaky(e_code + r[:, :, None, :] + s[:, None, :, :], 0.01)
            # masked aggregation over senders j
            edge_agg = jnp.sum(edge_code * adj4, axis=2).reshape(B * N, H)
            y = pre_x + xp[:, 2 * _LANE:2 * _LANE + H] + _dot(edge_agg, wna)
            x = _leaky(y, 0.01)              # F.leaky_relu applied by GIN.forward
        return x

    x1 = gin_stack(x, edge1_ref, "g1")
    x2 = gin_stack(x1, edge2_ref, "g2")

    # ---- head: gnn_code = [x1[:,0]|x2[:,0]|x1[:,1]|x2[:,1]|x1[:,2]|x2[:,2]] ----
    # realized as 6 row-block matmuls against w1 (no in-kernel concatenate/relayout).
    x1_3 = x1.reshape(B, N, H)
    x2_3 = x2.reshape(B, N, H)
    chunks = (x1_3[:, 0, :], x2_3[:, 0, :],
              x1_3[:, 1, :], x2_3[:, 1, :],
              x1_3[:, 2, :], x2_3[:, 2, :])
    w1_off, _, _ = layout["w1"]
    h = blk("b1")
    for k, c in enumerate(chunks):
        h = h + _dot(c, w_ref[w1_off + k * H:w1_off + (k + 1) * H, :128])
    h = jnp.tanh(h)
    h = jnp.tanh(_dot(h, blk("w2")) + blk("b2"))
    o_ref[...] = jax.nn.sigmoid(_dot(h, blk("w3")) + blk("b3"))


# ------------------------------ wrapper ------------------------------
def serial_gnn_forward(blob, node_attr, edge_attr1, edge_attr2, adj, *,
                       gnn_layers, len_node_attr, nhid, len_edge_attr, output_size):
    B, N, A = node_attr.shape
    De = edge_attr1.shape[-1]
    H = nhid
    layout, _ = build_layout(A, H, De, output_size)

    # HBM-side layout plumbing (free): lane-dense 2-D matmul operands.
    node2d = node_attr.reshape(B * N, A)
    edge1_2d = edge_attr1.reshape(B * N * N, De)
    edge2_2d = edge_attr2.reshape(B * N * N, De)
    adj4 = adj[:, :, :, None]

    # Advisory cost estimate so XLA schedules/overlaps this microsecond-scale call sensibly.
    stack_flops = (2 * B * N * N * De * H                  # edge_attr @ We_e
                   + 2 * B * N * A * _PACK_COLS            # fused node_attr projections
                   + gnn_layers * (2 * B * N * H * _PACK_COLS   # fused x projections
                                   + 2 * B * N * H * H          # edge_agg @ wna
                                   + 6 * B * N * N * H))        # edge_code elementwise + agg
    flops = (2 * B * N * A * H + 2 * stack_flops
             + 6 * 2 * B * H * 128 + 2 * B * 128 * 64 + 2 * B * 64 * output_size)
    bytes_accessed = 4 * (node2d.size + edge1_2d.size + edge2_2d.size + adj4.size
                          + blob.size + B * output_size)
    cost = pl.CostEstimate(flops=int(flops),
                           transcendentals=int(B * (128 + 64 + output_size)),
                           bytes_accessed=int(bytes_accessed))

    # TODO(synk): if B / N grow, add a grid over batch blocks (parallel dimension_semantics)
    # so v7x's second TensorCore is used; at B=2 a single grid-less invocation is optimal.
    kernel = functools.partial(_fused_kernel, layout, gnn_layers, B, N, H)
    return pl.pallas_call(
        kernel,
        out_shape=jax.ShapeDtypeStruct((B, output_size), jnp.float32),
        cost_estimate=cost,
    )(node2d, edge1_2d, edge2_2d, adj4, blob)


# ------------------------------ parameter init ------------------------------
def _linear_init(key, fan_in, fan_out):
    kw, kb = jax.random.split(key)
    bound = 1.0 / jnp.sqrt(fan_in)
    w = jax.random.uniform(kw, (fan_in, fan_out), jnp.float32, -bound, bound)
    b = jax.random.uniform(kb, (1, fan_out), jnp.float32, -bound, bound)
    return w, b


def make_gin_params(key, n_node_info, n_edge_attr, n_edge_code, nhid):
    k1, k2 = jax.random.split(key)
    we, be = _linear_init(k1, n_edge_attr + 2 * n_node_info, n_edge_code)
    wn, bn = _linear_init(k2, n_node_info + n_edge_code, n_node_info - 4)
    De, Di, H = n_edge_attr, n_node_info, nhid
    we_r = we[De:De + Di]          # receiver block of edge_processor weight
    we_s = we[De + Di:]            # sender block
    return {
        "wee": we[:De],                         # edge_attr rows
        "wrx": we_r[:H], "wra": we_r[H:],       # receiver: x rows | node_attr rows
        "wsx": we_s[:H], "wsa": we_s[H:],       # sender:   x rows | node_attr rows
        "be": be,
        "wnxx": wn[:H], "wnxa": wn[H:Di],       # node_processor: x rows | node_attr rows
        "wna": wn[Di:],                         # edge_agg rows
        "bn": bn,
    }


def make_params(key, len_node_attr, nhid, len_edge_attr, output_size):
    keys = jax.random.split(key, 6)
    enc_w, enc_b = _linear_init(keys[0], len_node_attr, nhid)
    w1, b1 = _linear_init(keys[1], 6 * nhid, 128)
    w2, b2 = _linear_init(keys[2], 128, 64)
    w3, b3 = _linear_init(keys[3], 64, output_size)
    n_node_info = len_node_attr + nhid
    return {
        "enc_w": enc_w, "enc_b": enc_b,
        "gin1": make_gin_params(keys[4], n_node_info, len_edge_attr, nhid, nhid),
        "gin2": make_gin_params(keys[5], n_node_info, len_edge_attr, nhid, nhid),
        "w1": w1, "b1": b1, "w2": w2, "b2": b2, "w3": w3, "b3": b3,
    }


if __name__ == "__main__":
    B, N = 2, 8
    LEN_NODE_ATTR = 4   # required by the module for shape consistency (n_node_info - 4 == nhid)
    NHID = 32
    LEN_EDGE_ATTR = 8
    OUTPUT_SIZE = 5
    GNN_LAYERS = 2
    # TODO(synk): nn.Dropout inside GIN is a no-op at inference / dropout=0; not implemented.

    root = jax.random.PRNGKey(0)
    kp, ka, ke1, ke2, kadj = jax.random.split(root, 5)

    params = make_params(kp, LEN_NODE_ATTR, NHID, LEN_EDGE_ATTR, OUTPUT_SIZE)
    blob = pack_params(params, LEN_NODE_ATTR, NHID, LEN_EDGE_ATTR, OUTPUT_SIZE)

    node_attr = jax.random.normal(ka, (B, N, LEN_NODE_ATTR), jnp.float32)
    edge_attr1 = jax.random.normal(ke1, (B, N, N, LEN_EDGE_ATTR), jnp.float32)
    edge_attr2 = jax.random.normal(ke2, (B, N, N, LEN_EDGE_ATTR), jnp.float32)
    adj = (jax.random.uniform(kadj, (B, N, N)) > 0.5).astype(jnp.float32)

    fwd = jax.jit(functools.partial(
        serial_gnn_forward, gnn_layers=GNN_LAYERS, len_node_attr=LEN_NODE_ATTR,
        nhid=NHID, len_edge_attr=LEN_EDGE_ATTR, output_size=OUTPUT_SIZE))
    out = fwd(blob, node_attr, edge_attr1, edge_attr2, adj)
    out = jax.block_until_ready(out)
    assert out.shape == (B, OUTPUT_SIZE)
    assert bool(jnp.all(jnp.isfinite(out)))
    print("KERNEL_OK")
</pallas_src>

<mosaic_0001>
module attributes {stable_mosaic.version = 11 : i64} {
  func.func @_fused_kernel(%arg0: memref<16x4xf32, #tpu.memory_space<vmem>>, %arg1: memref<128x8xf32, #tpu.memory_space<vmem>>, %arg2: memref<128x8xf32, #tpu.memory_space<vmem>>, %arg3: memref<2x8x8x1xf32, #tpu.memory_space<vmem>>, %arg4: memref<616x384xf32, #tpu.memory_space<vmem>>, %arg5: memref<2x5xf32, #tpu.memory_space<vmem>>) attributes {dimension_semantics = [], scalar_prefetch = 0 : i64, scratch_operands = 0 : i64, tpu.core_type = #tpu.core_type<tc>} {
    %c0 = arith.constant 0 : index
    %c0_0 = arith.constant 0 : index
    %0 = vector.load %arg0[%c0, %c0_0] : memref<16x4xf32, #tpu.memory_space<vmem>>, vector<16x4xf32>
    %c0_1 = arith.constant 0 : index
    %c0_2 = arith.constant 0 : index
    %c0_3 = arith.constant 0 : index
    %c0_4 = arith.constant 0 : index
    %1 = vector.load %arg3[%c0_1, %c0_2, %c0_3, %c0_4] : memref<2x8x8x1xf32, #tpu.memory_space<vmem>>, vector<2x8x8x1xf32>
    %c0_5 = arith.constant 0 : index
    %c0_6 = arith.constant 0 : index
    %2 = vector.load %arg4[%c0_5, %c0_6] : memref<616x384xf32, #tpu.memory_space<vmem>>, vector<4x32xf32>
    %cst = arith.constant dense<0.000000e+00> : vector<16x32xf32>
    %3 = tpu.matmul %0, %2, %cst {dimension_numbers = #tpu.dot_dimension_numbers<[1], [0], [0], [1], [0, 0, 1, 1], [], []>} : vector<16x4xf32>, vector<4x32xf32>, vector<16x32xf32> -> vector<16x32xf32>
    %c8 = arith.constant 8 : index
    %c0_7 = arith.constant 0 : index
    %4 = vector.load %arg4[%c8, %c0_7] : memref<616x384xf32, #tpu.memory_space<vmem>>, vector<1x32xf32>
    %5 = vector.broadcast %4 : vector<1x32xf32> to vector<16x32xf32>
    %6 = arith.addf %3, %5 : vector<16x32xf32>
    %cst_8 = arith.constant 0.000000e+00 : f32
    %7 = vector.broadcast %cst_8 : f32 to vector<16x32xf32>
    %8 = arith.cmpf ogt, %6, %7 : vector<16x32xf32>
    %cst_9 = arith.constant 1.000000e-01 : f32
    %9 = vector.broadcast %cst_9 : f32 to vector<16x32xf32>
    %10 = arith.mulf %9, %6 : vector<16x32xf32>
    %11 = arith.select %8, %6, %10 : vector<16x32xi1>, vector<16x32xf32>
    %c16 = arith.constant 16 : index
    %c0_10 = arith.constant 0 : index
    %12 = vector.load %arg4[%c16, %c0_10] : memref<616x384xf32, #tpu.memory_space<vmem>>, vector<8x32xf32>
    %c24 = arith.constant 24 : index
    %c0_11 = arith.constant 0 : index
    %13 = vector.load %arg4[%c24, %c0_11] : memref<616x384xf32, #tpu.memory_space<vmem>>, vector<32x384xf32>
    %c56 = arith.constant 56 : index
    %c0_12 = arith.constant 0 : index
    %14 = vector.load %arg4[%c56, %c0_12] : memref<616x384xf32, #tpu.memory_space<vmem>>, vector<4x384xf32>
    %c80 = arith.constant 80 : index
    %c0_13 = arith.constant 0 : index
    %15 = vector.load %arg4[%c80, %c0_13] : memref<616x384xf32, #tpu.memory_space<vmem>>, vector<32x32xf32>
    %c0_14 = arith.constant 0 : index
    %c0_15 = arith.constant 0 : index
    %16 = vector.load %arg1[%c0_14, %c0_15] : memref<128x8xf32, #tpu.memory_space<vmem>>, vector<128x8xf32>
    %cst_16 = arith.constant dense<0.000000e+00> : vector<128x32xf32>
    %17 = tpu.matmul %16, %12, %cst_16 {dimension_numbers = #tpu.dot_dimension_numbers<[1], [0], [0], [1], [0, 0, 1, 1], [], []>} : vector<128x8xf32>, vector<8x32xf32>, vector<128x32xf32> -> vector<128x32xf32>
    %c64 = arith.constant 64 : index
    %c0_17 = arith.constant 0 : index
    %18 = vector.load %arg4[%c64, %c0_17] : memref<616x384xf32, #tpu.memory_space<vmem>>, vector<1x32xf32>
    %19 = vector.broadcast %18 : vector<1x32xf32> to vector<128x32xf32>
    %20 = arith.addf %17, %19 : vector<128x32xf32>
    %21 = vector.shape_cast %20 : vector<128x32xf32> to vector<2x8x8x32xf32>
    %cst_18 = arith.constant dense<0.000000e+00> : vector<16x384xf32>
    %22 = tpu.matmul %0, %14, %cst_18 {dimension_numbers = #tpu.dot_dimension_numbers<[1], [0], [0], [1], [0, 0, 1, 1], [], []>} : vector<16x4xf32>, vector<4x384xf32>, vector<16x384xf32> -> vector<16x384xf32>
    %23 = vector.extract_strided_slice %22 {offsets = [0, 0], sizes = [16, 32], strides = [1, 1]} : vector<16x384xf32> to vector<16x32xf32>
    %24 = vector.extract_strided_slice %22 {offsets = [0, 128], sizes = [16, 32], strides = [1, 1]} : vector<16x384xf32> to vector<16x32xf32>
    %25 = vector.extract_strided_slice %22 {offsets = [0, 256], sizes = [16, 32], strides = [1, 1]} : vector<16x384xf32> to vector<16x32xf32>
    %c72 = arith.constant 72 : index
    %c0_19 = arith.constant 0 : index
    %26 = vector.load %arg4[%c72, %c0_19] : memref<616x384xf32, #tpu.memory_space<vmem>>, vector<1x32xf32>
    %27 = vector.broadcast %26 : vector<1x32xf32> to vector<16x32xf32>
    %28 = arith.addf %25, %27 : vector<16x32xf32>
    %cst_20 = arith.constant dense<0.000000e+00> : vector<16x384xf32>
    %29 = tpu.matmul %11, %13, %cst_20 {dimension_numbers = #tpu.dot_dimension_numbers<[1], [0], [0], [1], [0, 0, 1, 1], [], []>} : vector<16x32xf32>, vector<32x384xf32>, vector<16x384xf32> -> vector<16x384xf32>
    %30 = vector.extract_strided_slice %29 {offsets = [0, 0], sizes = [16, 32], strides = [1, 1]} : vector<16x384xf32> to vector<16x32xf32>
    %31 = arith.addf %23, %30 : vector<16x32xf32>
    %32 = vector.shape_cast %31 : vector<16x32xf32> to vector<2x8x32xf32>
    %33 = vector.extract_strided_slice %29 {offsets = [0, 128], sizes = [16, 32], strides = [1, 1]} : vector<16x384xf32> to vector<16x32xf32>
    %34 = arith.addf %24, %33 : vector<16x32xf32>
    %35 = vector.shape_cast %34 : vector<16x32xf32> to vector<2x8x32xf32>
    %36 = vector.shape_cast %32 : vector<2x8x32xf32> to vector<2x8x1x32xf32>
    %37 = vector.broadcast %36 : vector<2x8x1x32xf32> to vector<2x8x8x32xf32>
    %38 = arith.addf %21, %37 : vector<2x8x8x32xf32>
    %39 = vector.shape_cast %35 : vector<2x8x32xf32> to vector<2x1x8x32xf32>
    %40 = vector.broadcast %39 : vector<2x1x8x32xf32> to vector<2x8x8x32xf32>
    %41 = arith.addf %38, %40 : vector<2x8x8x32xf32>
    %cst_21 = arith.constant 0.000000e+00 : f32
    %42 = vector.broadcast %cst_21 : f32 to vector<2x8x8x32xf32>
    %43 = arith.cmpf ogt, %41, %42 : vector<2x8x8x32xf32>
    %cst_22 = arith.constant 0.00999999977 : f32
    %44 = vector.broadcast %cst_22 : f32 to vector<2x8x8x32xf32>
    %45 = arith.mulf %44, %41 : vector<2x8x8x32xf32>
    %46 = arith.select %43, %41, %45 : vector<2x8x8x32xi1>, vector<2x8x8x32xf32>
    %47 = vector.broadcast %1 : vector<2x8x8x1xf32> to vector<2x8x8x32xf32>
    %48 = arith.mulf %46, %47 : vector<2x8x8x32xf32>
    %cst_23 = arith.constant dense<0.000000e+00> : vector<2x8x32xf32>
    %49 = vector.multi_reduction <add>, %48, %cst_23 [2] : vector<2x8x8x32xf32> to vector<2x8x32xf32>
    %50 = vector.shape_cast %49 : vector<2x8x32xf32> to vector<16x32xf32>
    %51 = vector.extract_strided_slice %29 {offsets = [0, 256], sizes = [16, 32], strides = [1, 1]} : vector<16x384xf32> to vector<16x32xf32>
    %52 = arith.addf %28, %51 : vector<16x32xf32>
    %cst_24 = arith.constant dense<0.000000e+00> : vector<16x32xf32>
    %53 = tpu.matmul %50, %15, %cst_24 {dimension_numbers = #tpu.dot_dimension_numbers<[1], [0], [0], [1], [0, 0, 1, 1], [], []>} : vector<16x32xf32>, vector<32x32xf32>, vector<16x32xf32> -> vector<16x32xf32>
    %54 = arith.addf %52, %53 : vector<16x32xf32>
    %cst_25 = arith.constant 0.000000e+00 : f32
    %55 = vector.broadcast %cst_25 : f32 to vector<16x32xf32>
    %56 = arith.cmpf ogt, %54, %55 : vector<16x32xf32>
    %cst_26 = arith.constant 0.00999999977 : f32
    %57 = vector.broadcast %cst_26 : f32 to vector<16x32xf32>
    %58 = arith.mulf %57, %54 : vector<16x32xf32>
    %59 = arith.select %56, %54, %58 : vector<16x32xi1>, vector<16x32xf32>
    %cst_27 = arith.constant dense<0.000000e+00> : vector<16x384xf32>
    %60 = tpu.matmul %59, %13, %cst_27 {dimension_numbers = #tpu.dot_dimension_numbers<[1], [0], [0], [1], [0, 0, 1, 1], [], []>} : vector<16x32xf32>, vector<32x384xf32>, vector<16x384xf32> -> vector<16x384xf32>
    %61 = vector.extract_strided_slice %60 {offsets = [0, 0], sizes = [16, 32], strides = [1, 1]} : vector<16x384xf32> to vector<16x32xf32>
    %62 = arith.addf %23, %61 : vector<16x32xf32>
    %63 = vector.shape_cast %62 : vector<16x32xf32> to vector<2x8x32xf32>
    %64 = vector.extract_strided_slice %60 {offsets = [0, 128], sizes = [16, 32], strides = [1, 1]} : vector<16x384xf32> to vector<16x32xf32>
    %65 = arith.addf %24, %64 : vector<16x32xf32>
    %66 = vector.shape_cast %65 : vector<16x32xf32> to vector<2x8x32xf32>
    %67 = vector.shape_cast %63 : vector<2x8x32xf32> to vector<2x8x1x32xf32>
    %68 = vector.broadcast %67 : vector<2x8x1x32xf32> to vector<2x8x8x32xf32>
    %69 = arith.addf %21, %68 : vector<2x8x8x32xf32>
    %70 = vector.shape_cast %66 : vector<2x8x32xf32> to vector<2x1x8x32xf32>
    %71 = vector.broadcast %70 : vector<2x1x8x32xf32> to vector<2x8x8x32xf32>
    %72 = arith.addf %69, %71 : vector<2x8x8x32xf32>
    %cst_28 = arith.constant 0.000000e+00 : f32
    %73 = vector.broadcast %cst_28 : f32 to vector<2x8x8x32xf32>
    %74 = arith.cmpf ogt, %72, %73 : vector<2x8x8x32xf32>
    %cst_29 = arith.constant 0.00999999977 : f32
    %75 = vector.broadcast %cst_29 : f32 to vector<2x8x8x32xf32>
    %76 = arith.mulf %75, %72 : vector<2x8x8x32xf32>
    %77 = arith.select %74, %72, %76 : vector<2x8x8x32xi1>, vector<2x8x8x32xf32>
    %78 = vector.broadcast %1 : vector<2x8x8x1xf32> to vector<2x8x8x32xf32>
    %79 = arith.mulf %77, %78 : vector<2x8x8x32xf32>
    %cst_30 = arith.constant dense<0.000000e+00> : vector<2x8x32xf32>
    %80 = vector.multi_reduction <add>, %79, %cst_30 [2] : vector<2x8x8x32xf32> to vector<2x8x32xf32>
    %81 = vector.shape_cast %80 : vector<2x8x32xf32> to vector<16x32xf32>
    %82 = vector.extract_strided_slice %60 {offsets = [0, 256], sizes = [16, 32], strides = [1, 1]} : vector<16x384xf32> to vector<16x32xf32>
    %83 = arith.addf %28, %82 : vector<16x32xf32>
    %cst_31 = arith.constant dense<0.000000e+00> : vector<16x32xf32>
    %84 = tpu.matmul %81, %15, %cst_31 {dimension_numbers = #tpu.dot_dimension_numbers<[1], [0], [0], [1], [0, 0, 1, 1], [], []>} : vector<16x32xf32>, vector<32x32xf32>, vector<16x32xf32> -> vector<16x32xf32>
    %85 = arith.addf %83, %84 : vector<16x32xf32>
    %cst_32 = arith.constant 0.000000e+00 : f32
    %86 = vector.broadcast %cst_32 : f32 to vector<16x32xf32>
    %87 = arith.cmpf ogt, %85, %86 : vector<16x32xf32>
    %cst_33 = arith.constant 0.00999999977 : f32
    %88 = vector.broadcast %cst_33 : f32 to vector<16x32xf32>
    %89 = arith.mulf %88, %85 : vector<16x32xf32>
    %90 = arith.select %87, %85, %89 : vector<16x32xi1>, vector<16x32xf32>
    %c112 = arith.constant 112 : index
    %c0_34 = arith.constant 0 : index
    %91 = vector.load %arg4[%c112, %c0_34] : memref<616x384xf32, #tpu.memory_space<vmem>>, vector<8x32xf32>
    %c120 = arith.constant 120 : index
    %c0_35 = arith.constant 0 : index
    %92 = vector.load %arg4[%c120, %c0_35] : memref<616x384xf32, #tpu.memory_space<vmem>>, vector<32x384xf32>
    %c152 = arith.constant 152 : index
    %c0_36 = arith.constant 0 : index
    %93 = vector.load %arg4[%c152, %c0_36] : memref<616x384xf32, #tpu.memory_space<vmem>>, vector<4x384xf32>
    %c176 = arith.constant 176 : index
    %c0_37 = arith.constant 0 : index
    %94 = vector.load %arg4[%c176, %c0_37] : memref<616x384xf32, #tpu.memory_space<vmem>>, vector<32x32xf32>
    %c0_38 = arith.constant 0 : index
    %c0_39 = arith.constant 0 : index
    %95 = vector.load %arg2[%c0_38, %c0_39] : memref<128x8xf32, #tpu.memory_space<vmem>>, vector<128x8xf32>
    %cst_40 = arith.constant dense<0.000000e+00> : vector<128x32xf32>
    %96 = tpu.matmul %95, %91, %cst_40 {dimension_numbers = #tpu.dot_dimension_numbers<[1], [0], [0], [1], [0, 0, 1, 1], [], []>} : vector<128x8xf32>, vector<8x32xf32>, vector<128x32xf32> -> vector<128x32xf32>
    %c160 = arith.constant 160 : index
    %c0_41 = arith.constant 0 : index
    %97 = vector.load %arg4[%c160, %c0_41] : memref<616x384xf32, #tpu.memory_space<vmem>>, vector<1x32xf32>
    %98 = vector.broadcast %97 : vector<1x32xf32> to vector<128x32xf32>
    %99 = arith.addf %96, %98 : vector<128x32xf32>
    %100 = vector.shape_cast %99 : vector<128x32xf32> to vector<2x8x8x32xf32>
    %cst_42 = arith.constant dense<0.000000e+00> : vector<16x384xf32>
    %101 = tpu.matmul %0, %93, %cst_42 {dimension_numbers = #tpu.dot_dimension_numbers<[1], [0], [0], [1], [0, 0, 1, 1], [], []>} : vector<16x4xf32>, vector<4x384xf32>, vector<16x384xf32> -> vector<16x384xf32>
    %102 = vector.extract_strided_slice %101 {offsets = [0, 0], sizes = [16, 32], strides = [1, 1]} : vector<16x384xf32> to vector<16x32xf32>
    %103 = vector.extract_strided_slice %101 {offsets = [0, 128], sizes = [16, 32], strides = [1, 1]} : vector<16x384xf32> to vector<16x32xf32>
    %104 = vector.extract_strided_slice %101 {offsets = [0, 256], sizes = [16, 32], strides = [1, 1]} : vector<16x384xf32> to vector<16x32xf32>
    %c168 = arith.constant 168 : index
    %c0_43 = arith.constant 0 : index
    %105 = vector.load %arg4[%c168, %c0_43] : memref<616x384xf32, #tpu.memory_space<vmem>>, vector<1x32xf32>
    %106 = vector.broadcast %105 : vector<1x32xf32> to vector<16x32xf32>
    %107 = arith.addf %104, %106 : vector<16x32xf32>
    %cst_44 = arith.constant dense<0.000000e+00> : vector<16x384xf32>
    %108 = tpu.matmul %90, %92, %cst_44 {dimension_numbers = #tpu.dot_dimension_numbers<[1], [0], [0], [1], [0, 0, 1, 1], [], []>} : vector<16x32xf32>, vector<32x384xf32>, vector<16x384xf32> -> vector<16x384xf32>
    %109 = vector.extract_strided_slice %108 {offsets = [0, 0], sizes = [16, 32], strides = [1, 1]} : vector<16x384xf32> to vector<16x32xf32>
    %110 = arith.addf %102, %109 : vector<16x32xf32>
    %111 = vector.shape_cast %110 : vector<16x32xf32> to vector<2x8x32xf32>
    %112 = vector.extract_strided_slice %108 {offsets = [0, 128], sizes = [16, 32], strides = [1, 1]} : vector<16x384xf32> to vector<16x32xf32>
    %113 = arith.addf %103, %112 : vector<16x32xf32>
    %114 = vector.shape_cast %113 : vector<16x32xf32> to vector<2x8x32xf32>
    %115 = vector.shape_cast %111 : vector<2x8x32xf32> to vector<2x8x1x32xf32>
    %116 = vector.broadcast %115 : vector<2x8x1x32xf32> to vector<2x8x8x32xf32>
    %117 = arith.addf %100, %116 : vector<2x8x8x32xf32>
    %118 = vector.shape_cast %114 : vector<2x8x32xf32> to vector<2x1x8x32xf32>
    %119 = vector.broadcast %118 : vector<2x1x8x32xf32> to vector<2x8x8x32xf32>
    %120 = arith.addf %117, %119 : vector<2x8x8x32xf32>
    %cst_45 = arith.constant 0.000000e+00 : f32
    %121 = vector.broadcast %cst_45 : f32 to vector<2x8x8x32xf32>
    %122 = arith.cmpf ogt, %120, %121 : vector<2x8x8x32xf32>
    %cst_46 = arith.constant 0.00999999977 : f32
    %123 = vector.broadcast %cst_46 : f32 to vector<2x8x8x32xf32>
    %124 = arith.mulf %123, %120 : vector<2x8x8x32xf32>
    %125 = arith.select %122, %120, %124 : vector<2x8x8x32xi1>, vector<2x8x8x32xf32>
    %126 = vector.broadcast %1 : vector<2x8x8x1xf32> to vector<2x8x8x32xf32>
    %127 = arith.mulf %125, %126 : vector<2x8x8x32xf32>
    %cst_47 = arith.constant dense<0.000000e+00> : vector<2x8x32xf32>
    %128 = vector.multi_reduction <add>, %127, %cst_47 [2] : vector<2x8x8x32xf32> to vector<2x8x32xf32>
    %129 = vector.shape_cast %128 : vector<2x8x32xf32> to vector<16x32xf32>
    %130 = vector.extract_strided_slice %108 {offsets = [0, 256], sizes = [16, 32], strides = [1, 1]} : vector<16x384xf32> to vector<16x32xf32>
    %131 = arith.addf %107, %130 : vector<16x32xf32>
    %cst_48 = arith.constant dense<0.000000e+00> : vector<16x32xf32>
    %132 = tpu.matmul %129, %94, %cst_48 {dimension_numbers = #tpu.dot_dimension_numbers<[1], [0], [0], [1], [0, 0, 1, 1], [], []>} : vector<16x32xf32>, vector<32x32xf32>, vector<16x32xf32> -> vector<16x32xf32>
    %133 = arith.addf %131, %132 : vector<16x32xf32>
    %cst_49 = arith.constant 0.000000e+00 : f32
    %134 = vector.broadcast %cst_49 : f32 to vector<16x32xf32>
    %135 = arith.cmpf ogt, %133, %134 : vector<16x32xf32>
    %cst_50 = arith.constant 0.00999999977 : f32
    %136 = vector.broadcast %cst_50 : f32 to vector<16x32xf32>
    %137 = arith.mulf %136, %133 : vector<16x32xf32>
    %138 = arith.select %135, %133, %137 : vector<16x32xi1>, vector<16x32xf32>
    %cst_51 = arith.constant dense<0.000000e+00> : vector<16x384xf32>
    %139 = tpu.matmul %138, %92, %cst_51 {dimension_numbers = #tpu.dot_dimension_numbers<[1], [0], [0], [1], [0, 0, 1, 1], [], []>} : vector<16x32xf32>, vector<32x384xf32>, vector<16x384xf32> -> vector<16x384xf32>
    %140 = vector.extract_strided_slice %139 {offsets = [0, 0], sizes = [16, 32], strides = [1, 1]} : vector<16x384xf32> to vector<16x32xf32>
    %141 = arith.addf %102, %140 : vector<16x32xf32>
    %142 = vector.shape_cast %141 : vector<16x32xf32> to vector<2x8x32xf32>
    %143 = vector.extract_strided_slice %139 {offsets = [0, 128], sizes = [16, 32], strides = [1, 1]} : vector<16x384xf32> to vector<16x32xf32>
    %144 = arith.addf %103, %143 : vector<16x32xf32>
    %145 = vector.shape_cast %144 : vector<16x32xf32> to vector<2x8x32xf32>
    %146 = vector.shape_cast %142 : vector<2x8x32xf32> to vector<2x8x1x32xf32>
    %147 = vector.broadcast %146 : vector<2x8x1x32xf32> to vector<2x8x8x32xf32>
    %148 = arith.addf %100, %147 : vector<2x8x8x32xf32>
    %149 = vector.shape_cast %145 : vector<2x8x32xf32> to vector<2x1x8x32xf32>
    %150 = vector.broadcast %149 : vector<2x1x8x32xf32> to vector<2x8x8x32xf32>
    %151 = arith.addf %148, %150 : vector<2x8x8x32xf32>
    %cst_52 = arith.constant 0.000000e+00 : f32
    %152 = vector.broadcast %cst_52 : f32 to vector<2x8x8x32xf32>
    %153 = arith.cmpf ogt, %151, %152 : vector<2x8x8x32xf32>
    %cst_53 = arith.constant 0.00999999977 : f32
    %154 = vector.broadcast %cst_53 : f32 to vector<2x8x8x32xf32>
    %155 = arith.mulf %154, %151 : vector<2x8x8x32xf32>
    %156 = arith.select %153, %151, %155 : vector<2x8x8x32xi1>, vector<2x8x8x32xf32>
    %157 = vector.broadcast %1 : vector<2x8x8x1xf32> to vector<2x8x8x32xf32>
    %158 = arith.mulf %156, %157 : vector<2x8x8x32xf32>
    %cst_54 = arith.constant dense<0.000000e+00> : vector<2x8x32xf32>
    %159 = vector.multi_reduction <add>, %158, %cst_54 [2] : vector<2x8x8x32xf32> to vector<2x8x32xf32>
    %160 = vector.shape_cast %159 : vector<2x8x32xf32> to vector<16x32xf32>
    %161 = vector.extract_strided_slice %139 {offsets = [0, 256], sizes = [16, 32], strides = [1, 1]} : vector<16x384xf32> to vector<16x32xf32>
    %162 = arith.addf %107, %161 : vector<16x32xf32>
    %cst_55 = arith.constant dense<0.000000e+00> : vector<16x32xf32>
    %163 = tpu.matmul %160, %94, %cst_55 {dimension_numbers = #tpu.dot_dimension_numbers<[1], [0], [0], [1], [0, 0, 1, 1], [], []>} : vector<16x32xf32>, vector<32x32xf32>, vector<16x32xf32> -> vector<16x32xf32>
    %164 = arith.addf %162, %163 : vector<16x32xf32>
    %cst_56 = arith.constant 0.000000e+00 : f32
    %165 = vector.broadcast %cst_56 : f32 to vector<16x32xf32>
    %166 = arith.cmpf ogt, %164, %165 : vector<16x32xf32>
    %cst_57 = arith.constant 0.00999999977 : f32
    %167 = vector.broadcast %cst_57 : f32 to vector<16x32xf32>
    %168 = arith.mulf %167, %164 : vector<16x32xf32>
    %169 = arith.select %166, %164, %168 : vector<16x32xi1>, vector<16x32xf32>
    %170 = vector.shape_cast %90 : vector<16x32xf32> to vector<2x8x32xf32>
    %171 = vector.shape_cast %169 : vector<16x32xf32> to vector<2x8x32xf32>
    %172 = vector.extract_strided_slice %170 {offsets = [0, 0, 0], sizes = [2, 1, 32], strides = [1, 1, 1]} : vector<2x8x32xf32> to vector<2x1x32xf32>
    %173 = vector.shape_cast %172 : vector<2x1x32xf32> to vector<2x32xf32>
    %174 = vector.extract_strided_slice %171 {offsets = [0, 0, 0], sizes = [2, 1, 32], strides = [1, 1, 1]} : vector<2x8x32xf32> to vector<2x1x32xf32>
    %175 = vector.shape_cast %174 : vector<2x1x32xf32> to vector<2x32xf32>
    %176 = vector.extract_strided_slice %170 {offsets = [0, 1, 0], sizes = [2, 1, 32], strides = [1, 1, 1]} : vector<2x8x32xf32> to vector<2x1x32xf32>
    %177 = vector.shape_cast %176 : vector<2x1x32xf32> to vector<2x32xf32>
    %178 = vector.extract_strided_slice %171 {offsets = [0, 1, 0], sizes = [2, 1, 32], strides = [1, 1, 1]} : vector<2x8x32xf32> to vector<2x1x32xf32>
    %179 = vector.shape_cast %178 : vector<2x1x32xf32> to vector<2x32xf32>
    %180 = vector.extract_strided_slice %170 {offsets = [0, 2, 0], sizes = [2, 1, 32], strides = [1, 1, 1]} : vector<2x8x32xf32> to vector<2x1x32xf32>
    %181 = vector.shape_cast %180 : vector<2x1x32xf32> to vector<2x32xf32>
    %182 = vector.extract_strided_slice %171 {offsets = [0, 2, 0], sizes = [2, 1, 32], strides = [1, 1, 1]} : vector<2x8x32xf32> to vector<2x1x32xf32>
    %183 = vector.shape_cast %182 : vector<2x1x32xf32> to vector<2x32xf32>
    %c400 = arith.constant 400 : index
    %c0_58 = arith.constant 0 : index
    %184 = vector.load %arg4[%c400, %c0_58] : memref<616x384xf32, #tpu.memory_space<vmem>>, vector<1x128xf32>
    %c208 = arith.constant 208 : index
    %c0_59 = arith.constant 0 : index
    %185 = vector.load %arg4[%c208, %c0_59] : memref<616x384xf32, #tpu.memory_space<vmem>>, vector<32x128xf32>
    %cst_60 = arith.constant dense<0.000000e+00> : vector<2x128xf32>
    %186 = tpu.matmul %173, %185, %cst_60 {dimension_numbers = #tpu.dot_dimension_numbers<[1], [0], [0], [1], [0, 0, 1, 1], [], []>} : vector<2x32xf32>, vector<32x128xf32>, vector<2x128xf32> -> vector<2x128xf32>
    %187 = vector.broadcast %184 : vector<1x128xf32> to vector<2x128xf32>
    %188 = arith.addf %187, %186 : vector<2x128xf32>
    %c240 = arith.constant 240 : index
    %c0_61 = arith.constant 0 : index
    %189 = vector.load %arg4[%c240, %c0_61] : memref<616x384xf32, #tpu.memory_space<vmem>>, vector<32x128xf32>
    %cst_62 = arith.constant dense<0.000000e+00> : vector<2x128xf32>
    %190 = tpu.matmul %175, %189, %cst_62 {dimension_numbers = #tpu.dot_dimension_numbers<[1], [0], [0], [1], [0, 0, 1, 1], [], []>} : vector<2x32xf32>, vector<32x128xf32>, vector<2x128xf32> -> vector<2x128xf32>
    %191 = arith.addf %188, %190 : vector<2x128xf32>
    %c272 = arith.constant 272 : index
    %c0_63 = arith.constant 0 : index
    %192 = vector.load %arg4[%c272, %c0_63] : memref<616x384xf32, #tpu.memory_space<vmem>>, vector<32x128xf32>
    %cst_64 = arith.constant dense<0.000000e+00> : vector<2x128xf32>
    %193 = tpu.matmul %177, %192, %cst_64 {dimension_numbers = #tpu.dot_dimension_numbers<[1], [0], [0], [1], [0, 0, 1, 1], [], []>} : vector<2x32xf32>, vector<32x128xf32>, vector<2x128xf32> -> vector<2x128xf32>
    %194 = arith.addf %191, %193 : vector<2x128xf32>
    %c304 = arith.constant 304 : index
    %c0_65 = arith.constant 0 : index
    %195 = vector.load %arg4[%c304, %c0_65] : memref<616x384xf32, #tpu.memory_space<vmem>>, vector<32x128xf32>
    %cst_66 = arith.constant dense<0.000000e+00> : vector<2x128xf32>
    %196 = tpu.matmul %179, %195, %cst_66 {dimension_numbers = #tpu.dot_dimension_numbers<[1], [0], [0], [1], [0, 0, 1, 1], [], []>} : vector<2x32xf32>, vector<32x128xf32>, vector<2x128xf32> -> vector<2x128xf32>
    %197 = arith.addf %194, %196 : vector<2x128xf32>
    %c336 = arith.constant 336 : index
    %c0_67 = arith.constant 0 : index
    %198 = vector.load %arg4[%c336, %c0_67] : memref<616x384xf32, #tpu.memory_space<vmem>>, vector<32x128xf32>
    %cst_68 = arith.constant dense<0.000000e+00> : vector<2x128xf32>
    %199 = tpu.matmul %181, %198, %cst_68 {dimension_numbers = #tpu.dot_dimension_numbers<[1], [0], [0], [1], [0, 0, 1, 1], [], []>} : vector<2x32xf32>, vector<32x128xf32>, vector<2x128xf32> -> vector<2x128xf32>
    %200 = arith.addf %197, %199 : vector<2x128xf32>
    %c368 = arith.constant 368 : index
    %c0_69 = arith.constant 0 : index
    %201 = vector.load %arg4[%c368, %c0_69] : memref<616x384xf32, #tpu.memory_space<vmem>>, vector<32x128xf32>
    %cst_70 = arith.constant dense<0.000000e+00> : vector<2x128xf32>
    %202 = tpu.matmul %183, %201, %cst_70 {dimension_numbers = #tpu.dot_dimension_numbers<[1], [0], [0], [1], [0, 0, 1, 1], [], []>} : vector<2x32xf32>, vector<32x128xf32>, vector<2x128xf32> -> vector<2x128xf32>
    %203 = arith.addf %200, %202 : vector<2x128xf32>
    %204 = math.tanh %203 : vector<2x128xf32>
    %c408 = arith.constant 408 : index
    %c0_71 = arith.constant 0 : index
    %205 = vector.load %arg4[%c408, %c0_71] : memref<616x384xf32, #tpu.memory_space<vmem>>, vector<128x64xf32>
    %cst_72 = arith.constant dense<0.000000e+00> : vector<2x64xf32>
    %206 = tpu.matmul %204, %205, %cst_72 {dimension_numbers = #tpu.dot_dimension_numbers<[1], [0], [0], [1], [0, 0, 1, 1], [], []>} : vector<2x128xf32>, vector<128x64xf32>, vector<2x64xf32> -> vector<2x64xf32>
    %c536 = arith.constant 536 : index
    %c0_73 = arith.constant 0 : index
    %207 = vector.load %arg4[%c536, %c0_73] : memref<616x384xf32, #tpu.memory_space<vmem>>, vector<1x64xf32>
    %208 = vector.broadcast %207 : vector<1x64xf32> to vector<2x64xf32>
    %209 = arith.addf %206, %208 : vector<2x64xf32>
    %210 = math.tanh %209 : vector<2x64xf32>
    %c544 = arith.constant 544 : index
    %c0_74 = arith.constant 0 : index
    %211 = vector.load %arg4[%c544, %c0_74] : memref<616x384xf32, #tpu.memory_space<vmem>>, vector<64x5xf32>
    %cst_75 = arith.constant dense<0.000000e+00> : vector<2x5xf32>
    %212 = tpu.matmul %210, %211, %cst_75 {dimension_numbers = #tpu.dot_dimension_numbers<[1], [0], [0], [1], [0, 0, 1, 1], [], []>} : vector<2x64xf32>, vector<64x5xf32>, vector<2x5xf32> -> vector<2x5xf32>
    %c608 = arith.constant 608 : index
    %c0_76 = arith.constant 0 : index
    %213 = vector.load %arg4[%c608, %c0_76] : memref<616x384xf32, #tpu.memory_space<vmem>>, vector<1x5xf32>
    %214 = vector.broadcast %213 : vector<1x5xf32> to vector<2x5xf32>
    %215 = arith.addf %212, %214 : vector<2x5xf32>
    %216 = arith.negf %215 : vector<2x5xf32>
    %217 = math.exp %216 : vector<2x5xf32>
    %cst_77 = arith.constant 1.000000e+00 : f32
    %218 = vector.broadcast %cst_77 : f32 to vector<2x5xf32>
    %219 = arith.addf %218, %217 : vector<2x5xf32>
    %220 = arith.divf %218, %219 : vector<2x5xf32>
    %c0_78 = arith.constant 0 : index
    %c0_79 = arith.constant 0 : index
    %221 = vector.load %arg5[%c0_78, %c0_79] : memref<2x5xf32, #tpu.memory_space<vmem>>, vector<2x5xf32>
    tpu.vector_store %arg5[%c0_78, %c0_79], %220 {strides = array<i32>} : memref<2x5xf32, #tpu.memory_space<vmem>>, vector<2x5xf32>,
    return
  }
}

</mosaic_0001>

<bundles_post_ra>
// kernel: serial_gnn_forward.1
= control target key start
LH: loop header
LB: loop body
LE: loop exit
PB: predicated region body
PF: predicated region fallthrough
CT: control target
= control target key end

     0   :  { %10 = vsyncpa [#allocation3], 0  ;;  %s3548_s0 = inlined_call_operand.vmem [shape: f32[16,4], index: 0, kind: input, shape index: {}]   ;;  %s3549_s1 = inlined_call_operand.vmem [shape: f32[128,8], index: 1, kind: input, shape index: {}]   ;;  %s3550_s2 = inlined_call_operand.hbm [shape: f32[128,8], index: 2, kind: input, shape index: {}]   ;;  %s3551_s3 = inlined_call_operand.vmem [shape: f32[2,8,8,1], index: 3, kind: input, shape index: {}]   ;;  %s3552_s4 = inlined_call_operand.hbm [shape: f32[616,384], index: 4, kind: input, shape index: {}]   ;;  %s3553_s5 = inlined_call_operand.hbm [shape: f32[2,5], index: 5, kind: output, shape index: {}]  }
   0x1   :  { %11 = vsyncpa [#allocation6], 0 }
   0x2   :  { %12 = vsyncpa [#allocation4], 0  ;;  %s21_s20 = sshll.u32 %s3550_s2, 4  ;;  %s2755_s21 = smov [#allocation2]   ;;  %s22_s20 = int_to_ptr.hbm [resolvable:$true] %s21_s20 }
   0x3   :  { %s23_s22 = sshll.u32 %s2755_s21, 4  ;;  %s36_s25 = sshll.u32 %s3552_s4, 4  ;;  %s24_s22 = int_to_ptr.vmem [resolvable:$true] %s23_s22  ;;  %s37_s25 = int_to_ptr.hbm [resolvable:$true] %s36_s25 }
   0x4   :  { %s2756_s26 = smov 128   ;;  %s2757_s27 = smov 8  }
   0x5   :  { %29 = dma.hbm_to_vmem [thread:$0]  %s22_s20, 2048, %s24_s22, [#allocation3], %s2756_s26, %s2756_s26, %s2757_s27  }
   0x6   :  { %s2758_s28 = smov [#allocation5]   ;;  %s2759_s30 = smov 384  }
   0x7   :  { %s38_s29 = sshll.u32 %s2758_s28, 4  ;;  %s2760_s6 = smov 24   ;;  %s39_s29 = int_to_ptr.vmem [resolvable:$true] %s38_s29 }
   0x8   :  { %44 = dma.hbm_to_vmem [thread:$0]  %s37_s25, 29568, %s39_s29, [#allocation6], %s2759_s30, %s2759_s30, %s2760_s6  }
   0x9   :  { %2749 = dma.done.wait [#allocation3], 2048  }
   0xa   :  { %2750 = vsyncadd [#allocation3], 4294965248 }
   0xb   :  { %2751 = dma.done.wait [#allocation6], 29568  }
   0xc   :  { %2752 = vsyncadd [#allocation6], 4294937728  ;;  %vm3567_vm0 = vcmask 1043456   ;;  %vm3566_vm1 = vcmask 31744   ;;  %v71_v0 = vld [vmem:[#allocation5] sm:$0xf] }
   0xd   :  { %v53_v1 = vld [vmem:[%s3548_s0] sm:$0xff]  ;;  %vm3568_vm2 = vcmask 64512   ;;  %2562 = vmatpush.msk.msra.mxu3 %vm3567_vm0, %v71_v0  ;;  %v113_v2 = vld [vmem:[#allocation5 + $0x30] sm:$0xff]  ;;  %v134_v3 = vld [vmem:[%s3549_s1 + $0x8] sm:$0xff]  ;;  %v2761_v9 = vmov 0   ;;  %vm345_vm4 = vcmask 261120  }
   0xe   :  { %2563 = vmatmul.msk.f32.vlgmr.msra.gmra.mxu3 %vm3566_vm1, %v53_v1  ;;  %2655 = vmatpush.msra.mxu1 %v113_v2  ;;  %v54_v4 = vld [vmem:[%s3548_s0 + $0x8] sm:$0xff]  ;;  %v135_v5 = vld [vmem:[%s3549_s1 + $0x10] sm:$0xff]  ;;  %v136_v6 = vld [vmem:[%s3549_s1 + $0x18] sm:$0xff]  ;;  %vm779_vm15 = vcmask 1041409   ;;  %s2551_s24 = sshll.u32 %s3553_s5, 4  ;;  %s2552_s24 = int_to_ptr.hbm [resolvable:$true] %s2551_s24 }
   0xf   :  { %2566 = vmatmul.msk.f32.vlgmr.msra.gmra.mxu1 %vm3568_vm2, %v134_v3  ;;  %214 = vmatpush.msra.mxu0 %v113_v2  ;;  %v137_v7 = vld [vmem:[%s3549_s1 + $0x20] sm:$0xff]  ;;  %v138_v10 = vld [vmem:[%s3549_s1 + $0x28] sm:$0xff]  ;;  %v127_v12 = vld [vmem:[#allocation5 + $0xb0] sm:$0xf] }
  0x10   :  { %v55_v8 = vld [vmem:[%s3551_s3] sm:$0xff]  ;;  %2664 = vset.pattern.permute.xlu0 %v2761_v9  ;;  %2665 = vset.pattern.permute.xlu1 %v2761_v9  ;;  %v56_v11 = vld [vmem:[%s3551_s3 + $0x8] sm:$0xff]  ;;  %v139_v14 = vld [vmem:[%s3549_s1 + $0x30] sm:$0xff] }
  0x11   :  { %555 = vperm.xlu0 %2664, %v55_v8   ;;  %2666 = vset.pattern.permute.xlu2 %v2761_v9  ;;  %v133_v13 = vld [vmem:[%s3549_s1] sm:$0xff]  ;;  %v57_v15 = vld [vmem:[%s3551_s3 + $0x10] sm:$0xff]  ;;  %v126_v17 = vld [vmem:[#allocation5 + $0xa8] sm:$0xf] }
  0x12   :  { %2584 = vmatpush.msk.msrb.mxu3 %vm3567_vm0, %v127_v12  ;;  %2565 = vmatmul.msk.f32.vlgmr.msra.gmra.mxu0 %vm3568_vm2, %v133_v13  ;;  %v61_v16 = vld [vmem:[%s3551_s3 + $0x30] sm:$0xff]  ;;  %v128_v18 = vld [vmem:[#allocation5 + $0xb8] sm:$0xf]  ;;  %v64_v23 = vld [vmem:[%s3551_s3 + $0x48] sm:$0xff] }
  0x13   :  { %565 = vperm.xlu1 %2665, %v57_v15   ;;  %2581 = vmatpush.msk.msra.mxu2 %vm3567_vm0, %v126_v17  ;;  %v123_v19 = vld [vmem:[#allocation5 + $0x90] sm:$0xff]  ;;  %v140_v20 = vld [vmem:[%s3549_s1 + $0x38] sm:$0xff]  ;;  %v117_v25 = vld [vmem:[#allocation5 + $0x60] sm:$0xff] }
  0x14   :  { %2587 = vmatpush.msk.msrb.mxu0 %vm3567_vm0, %v128_v18  ;;  %2582 = vmatmul.msk.f32.vlgmr.msra.gmra.mxu2 %vm3566_vm1, %v53_v1  ;;  %v58_v21 = vld [vmem:[%s3551_s3 + $0x18] sm:$0xff]  ;;  %v2865_v26 = vld [vmem:[#allocation5 + $0xa0] sm:$0xff]  ;;  %v142_v29 = vld [vmem:[%s3549_s1 + $0x48] sm:$0xff] }
  0x15   :  { %364 = vmatpush.msrb.mxu2 %v123_v19  ;;  %v120_v22 = vld [vmem:[#allocation5 + $0x78] sm:$0xff]  ;;  %v141_v27 = vld [vmem:[%s3549_s1 + $0x40] sm:$0xff]  ;;  %v143_v30 = vld [vmem:[%s3549_s1 + $0x50] sm:$0xff] }
  0x16   :  { %2564 = vmatmul.msk.f32.gmra.mxu3 %vm3566_vm1, %v54_v4  ;;  %v124_v24 = vld [vmem:[#allocation5 + $0x98] sm:$0xff]  ;;  %410 = vmatpush.msra.mxu0 %v2865_v26  ;;  %v145_v32 = vld [vmem:[%s3549_s1 + $0x60] sm:$0xff]  ;;  %v2893_v34 = vld [vmem:[#allocation5 + $0x88] sm:$0xff] }
  0x17   :  { %2567 = vmatmul.msk.f32.gmra.mxu1 %vm3568_vm2, %v135_v5  ;;  %365 = vmatpush.msrb.mxu2 %v120_v22  ;;  %v62_v28 = vld [vmem:[%s3551_s3 + $0x38] sm:$0xff]  ;;  %v121_v33 = vld [vmem:[#allocation5 + $0x80] sm:$0xff]  ;;  %v118_v36 = vld [vmem:[#allocation5 + $0x68] sm:$0xff] }
  0x18   :  { %387 = vmatpush.msra.mxu3 %v124_v24  ;;  %v144_v31 = vld [vmem:[%s3549_s1 + $0x58] sm:$0xff]  ;;  %411 = vmatpush.msra.mxu0 %v2893_v34  ;;  %v67_v35 = vld [vmem:[%s3551_s3 + $0x60] sm:$0xff]  ;;  %v2899_v37 = vld [vmem:[#allocation5 + $0x70] sm:$0xff] }
  0x19   :  { %560 = vperm.xlu0 %2664, %v56_v11   ;;  %366 = vmatpush.msrb.mxu2 %v117_v25  ;;  %v114_v38 = vld [vmem:[#allocation5 + $0x48] sm:$0xff]  ;;  %v115_v39 = vld [vmem:[#allocation5 + $0x50] sm:$0xff]  ;;  %v2902_v40 = vld [vmem:[#allocation5 + $0x58] sm:$0xff] }
  0x1a   :  { %2588 = vmatmul.msk.f32.vlgmr.msrb.gmra.mxu0 %vm3566_vm1, %v53_v1  ;;  %388 = vmatpush.msra.mxu3 %v121_v33  ;;  %v146_v41 = vld [vmem:[%s3549_s1 + $0x68] sm:$0xff]  ;;  %v65_v42 = vld [vmem:[%s3551_s3 + $0x50] sm:$0xff]  ;;  %v59_v43 = vld [vmem:[%s3551_s3 + $0x20] sm:$0xff] }
  0x1b   :  { %570 = vperm.xlu1 %2665, %v58_v21   ;;  %412 = vmatpush.msra.mxu0 %v2899_v37  ;;  %v70_v44 = vld [vmem:[%s3551_s3 + $0x78] sm:$0xff]  ;;  %v147_v45 = vld [vmem:[%s3549_s1 + $0x70] sm:$0xff]  ;;  %v68_v46 = vld [vmem:[%s3551_s3 + $0x68] sm:$0xff] }
  0x1c   :  { %2583 = vmatmul.msk.f32.gmra.mxu2 %vm3566_vm1, %v54_v4  ;;  %389 = vmatpush.msra.mxu3 %v118_v36  ;;  %v60_v47 = vld [vmem:[%s3551_s3 + $0x28] sm:$0xff]  ;;  %v148_v48 = vld [vmem:[%s3549_s1 + $0x78] sm:$0xff]  ;;  %v63_v49 = vld [vmem:[%s3551_s3 + $0x40] sm:$0xff] }
  0x1d   :  { %367 = vmatpush.msrb.mxu2 %v114_v38  ;;  %413 = vmatpush.msra.mxu0 %v2902_v40  ;;  %v72_v51 = vld [vmem:[#allocation5 + $0x18] ss:$0 sm:$0xff]  ;;  %v69_v58 = vld [vmem:[%s3551_s3 + $0x70] sm:$0xff]  ;;  %v131_v18 = vld [vmem:[#allocation5 + $0x120] sm:$0xff] }
  0x1e   :  { %2585 = vmatmul.msk.f32.vlgmr.msrb.gmra.mxu3 %vm3566_vm1, %v53_v1  ;;  %575 = vperm.xlu2 %2666, %v59_v43   ;;  %v66_v52 = vld [vmem:[%s3551_s3 + $0x58] sm:$0xff]  ;;  %v129_v21 = vld [vmem:[#allocation5 + $0xf0] sm:$0xff] }
  0x1f   :  { %2568 = vmatmul.msk.f32.gmra.mxu1 %vm3568_vm2, %v136_v6  ;;  %390 = vmatpush.msra.mxu3 %v115_v39  ;;  %v132_v17 = vld [vmem:[#allocation5 + $0x138] sm:$0xff] }
  0x20   :  { %876 = vmatpush.msrb.mxu0 %v124_v24  ;;  %816 = vmatpush.msra.mxu2 %v132_v17 }
  0x21   :  { %585 = vperm.xlu0 %2664, %v61_v16   ;;  %853 = vmatpush.msrb.mxu3 %v123_v19 }
  0x22   :  { %2589 = vmatmul.msk.f32.gmra.mxu0 %vm3566_vm1, %v54_v4  ;;  %817 = vmatpush.msra.mxu2 %v131_v18 }
  0x23   :  { %590 = vperm.xlu1 %2665, %v62_v28   ;;  %854 = vmatpush.msrb.mxu3 %v120_v22  ;;  %v149_v22 = vld [vmem:[#allocation5 + $0xc0] ss:$0 sm:$0xff] }
  0x24   :  { %877 = vmatpush.msrb.mxu0 %v121_v33 }
  0x25   :  { %855 = vmatpush.msrb.mxu3 %v117_v25 }
  0x26   :  { %2586 = vmatmul.msk.f32.gmra.mxu3 %vm3566_vm1, %v54_v4  ;;  %878 = vmatpush.msrb.mxu0 %v118_v36 }
  0x27   :  { %2569 = vmatmul.msk.f32.gmra.mxu1 %vm3568_vm2, %v137_v7  ;;  %856 = vmatpush.msrb.mxu3 %v114_v38 }
  0x28   :  { %879 = vmatpush.msrb.mxu0 %v115_v39  ;;  %580 = vperm.xlu2 %2666, %v60_v47  }
  0x29   :  { %600 = vperm.xlu0 %2664, %v64_v23  }
  0x2b   :  { %605 = vperm.xlu1 %2665, %v65_v42  }
  0x2f   :  { %2570 = vmatmul.msk.f32.gmra.mxu1 %vm3568_vm2, %v138_v10 }
  0x30   :  { %595 = vperm.xlu2 %2666, %v63_v49  }
  0x31   :  { %615 = vperm.xlu0 %2664, %v67_v35  }
  0x33   :  { %620 = vperm.xlu1 %2665, %v68_v46  }
  0x37   :  { %2571 = vmatmul.msk.f32.gmra.mxu1 %vm3568_vm2, %v139_v14 }
  0x38   :  { %610 = vperm.xlu2 %2666, %v66_v52  }
  0x39   :  { %630 = vperm.xlu0 %2664, %v70_v44  }
  0x3f   :  { %2572 = vmatmul.msk.f32.gmra.mxu1 %vm3568_vm2, %v140_v20  ;;  %v130_v20 = vld [vmem:[#allocation5 + $0x108] sm:$0xff] }
  0x40   :  { %625 = vperm.xlu2 %2666, %v69_v58   ;;  %818 = vmatpush.msra.mxu2 %v130_v20 }
  0x42   :  { %819 = vmatpush.msra.mxu2 %v129_v21 }
  0x47   :  { %2573 = vmatmul.msk.f32.gmra.mxu1 %vm3568_vm2, %v141_v27 }
  0x4f   :  { %2574 = vmatmul.msk.f32.gmra.mxu1 %vm3568_vm2, %v142_v29 }
  0x57   :  { %2575 = vmatmul.msk.f32.gmra.mxu1 %vm3568_vm2, %v143_v30 }
  0x5f   :  { %2576 = vmatmul.msk.f32.gmra.mxu1 %vm3568_vm2, %v144_v31 }
  0x67   :  { %2577 = vmatmul.msk.f32.gmra.mxu1 %vm3568_vm2, %v145_v32 }
  0x6f   :  { %2578 = vmatmul.msk.f32.gmra.mxu1 %vm3568_vm2, %v146_v41 }
  0x77   :  { %2579 = vmatmul.msk.f32.gmra.mxu1 %vm3568_vm2, %v147_v45 }
  0x7f   :  { %2580 = vmatmul.msk.f32.gmra.mxu1 %vm3568_vm2, %v148_v48 }
  0x83   :  { %v2947_v9 = vpop.permute.xlu0 %555 }
  0x85   :  { %v2963_v24 = vpop.permute.xlu1 %565 }
  0x8b   :  { %v2953_v13 = vpop.permute.xlu0 %560 }
  0x8c   :  { %v219_v50 = vpop.f32.mrf.mxu1 }
  0x8d   :  { %v2961_v23 = vadd.f32 %v219_v50, %v149_v22 }
  0x8f   :  { %v216_v30 = vpop.f32.mrf.mxu0 }
  0x90   :  { %v2980_v36 = vadd.f32 %v216_v30, %v149_v22 }
  0x91   :  { %v101_v53 = vpop.f32.mrf.mxu3 }
  0x92   :  { %v102_v54 = vadd.f32 %v101_v53, %v72_v51 }
  0x93   :  { %v2959_v19 = vpop.permute.xlu0 %585 }
  0x94   :  { %vm107_vm3 = vcmp.gt.f32.partialorder %v102_v54, 0.0  ;;  %v109_v55 = vmul.f32 0.1, %v102_v54  ;;  %v222_v57 = vpop.f32.mrf.mxu1  ;;  %3581 = vst [vmem:[#allocation13_spill] sm:$0xff] %v2959_v19 }
  0x95   :  { %v2966_v25 = vadd.f32 %v222_v57, %v149_v22 }
  0x96   :  { %v111_v56 = vsel %vm107_vm3, %v102_v54, %v109_v55  ;;  %vm781_vm3 = vcmask 1042434  }
  0x97   :  { %2590 = vmatmul.msk.f32.vlgmr.msrb.gmra.mxu2 %vm345_vm4, %v111_v56  ;;  %2592 = vmatmul.msk.f32.vlgmr.msra.gmra.mxu3 %vm345_vm4, %v111_v56  ;;  %v2949_v11 = vpop.f32.mrf.mxu2 }
  0x98   :  { %2594 = vmatmul.msk.f32.vlgmr.msra.gmra.mxu0 %vm345_vm4, %v111_v56  ;;  %1218 = vmatpush.msra.mxu3 %v132_v17 }
  0x99   :  { %v104_v59 = vpop.f32.mrf.mxu3  ;;  %899 = vmatpush.msrb.mxu2 %v2865_v26 }
  0x9a   :  { %v105_v60 = vadd.f32 %v104_v59, %v72_v51  ;;  %1219 = vmatpush.msra.mxu3 %v131_v18  ;;  %v3016_v18 = vpop.permute.xlu1 %570 }
  0x9b   :  { %900 = vmatpush.msrb.mxu2 %v2893_v34  ;;  %v2985_v41 = vpop.permute.xlu0 %600 }
  0x9c   :  { %v110_v61 = vmul.f32 0.1, %v105_v60  ;;  %vm108_vm5 = vcmp.gt.f32.partialorder %v105_v60, 0.0  ;;  %v225_v63 = vpop.f32.mrf.mxu1  ;;  %1220 = vmatpush.msra.mxu3 %v130_v20 }
  0x9d   :  { %v2968_v27 = vadd.f32 %v225_v63, %v149_v22  ;;  %901 = vmatpush.msrb.mxu2 %v2899_v37 }
  0x9e   :  { %v112_v62 = vsel %vm108_vm5, %v105_v60, %v110_v61  ;;  %1221 = vmatpush.msra.mxu3 %v129_v21  ;;  %vm783_vm5 = vcmask 1043459  }
  0x9f   :  { %2591 = vmatmul.msk.f32.gmra.mxu2 %vm345_vm4, %v112_v62  ;;  %2593 = vmatmul.msk.f32.gmra.mxu3 %vm345_vm4, %v112_v62  ;;  %v2955_v15 = vpop.f32.mrf.mxu2 }
  0xa0   :  { %2595 = vmatmul.msk.f32.gmra.mxu0 %vm345_vm4, %v112_v62  ;;  %3579 = vst [vmem:[#allocation11_spill] sm:$0xff] %v2955_v15  ;;  %902 = vmatpush.msrb.mxu2 %v2902_v40 }
  0xa1   :  { %v2951_v12 = vpop.f32.mrf.mxu3 }
  0xa4   :  { %v228_v0 = vpop.f32.mrf.mxu1 }
  0xa5   :  { %v2970_v28 = vadd.f32 %v228_v0, %v149_v22 }
  0xa9   :  { %v2957_v16 = vpop.f32.mrf.mxu3 }
  0xaa   :  { %3580 = vst [vmem:[#allocation12_spill] sm:$0xff] %v2957_v16 }
  0xac   :  { %v231_v1 = vpop.f32.mrf.mxu1 }
  0xad   :  { %v2972_v29 = vadd.f32 %v231_v1, %v149_v22 }
  0xb4   :  { %v234_v2 = vpop.f32.mrf.mxu1 }
  0xb5   :  { %v2974_v32 = vadd.f32 %v234_v2, %v149_v22 }
  0xbc   :  { %v237_v3 = vpop.f32.mrf.mxu1 }
  0xbd   :  { %v2976_v33 = vadd.f32 %v237_v3, %v149_v22 }
  0xc4   :  { %v240_v4 = vpop.f32.mrf.mxu1 }
  0xc5   :  { %v2978_v35 = vadd.f32 %v240_v4, %v149_v22 }
  0xc7   :  { %3582 = vst [vmem:[#allocation14_spill] sm:$0xff] %v2978_v35 }
  0xcc   :  { %v243_v5 = vpop.f32.mrf.mxu1 }
  0xcd   :  { %v2983_v39 = vadd.f32 %v243_v5, %v149_v22 }
  0xd4   :  { %v246_v6 = vpop.f32.mrf.mxu1 }
  0xd5   :  { %v2987_v42 = vadd.f32 %v246_v6, %v149_v22 }
  0xdc   :  { %v249_v7 = vpop.f32.mrf.mxu1 }
  0xdd   :  { %v2989_v43 = vadd.f32 %v249_v7, %v149_v22 }
  0xe4   :  { %v252_v8 = vpop.f32.mrf.mxu1 }
  0xe5   :  { %v2992_v45 = vadd.f32 %v252_v8, %v149_v22 }
  0xec   :  { %v255_v10 = vpop.f32.mrf.mxu1 }
  0xed   :  { %v2994_v46 = vadd.f32 %v255_v10, %v149_v22 }
  0xf4   :  { %v258_v14 = vpop.f32.mrf.mxu1 }
  0xf5   :  { %v2996_v47 = vadd.f32 %v258_v14, %v149_v22 }
  0xfc   :  { %v261_v31 = vpop.f32.mrf.mxu1 }
  0xfd   :  { %v2998_v48 = vadd.f32 %v261_v31, %v149_v22  ;;  %v3019_v31 = vpop.permute.xlu2 %575 }
  0xfe   :  { %3584 = vst [vmem:[#allocation16_spill] sm:$0xff] %v3019_v31 }
  0xff   :  { %3583 = vst [vmem:[#allocation15_spill] sm:$0xff] %v2998_v48 }
 0x11a   :  { %v369_v38 = vpop.f32.mrf.mxu2  ;;  %v392_v26 = vpop.f32.mrf.mxu3 }
 0x11b   :  { %v421_v44 = vadd.f32 %v369_v38, %v2949_v11  ;;  %v423_v53 = vadd.f32 %v392_v26, %v2951_v12  ;;  %v3021_v38 = vpop.permute.xlu0 %615 }
 0x11d   :  { %v427_v34 = vrot.slane %v421_v44, 1  ;;  %v428_v49 = vrot.slane %v421_v44, 2  ;;  %v429_v50 = vrot.slane %v421_v44, 3  ;;  %v430_v51 = vrot.slane %v421_v44, 4 }
 0x11e   :  { %v441_v52 = vperm.slane %v421_v44, 0  ;;  %v431_v54 = vrot.slane %v421_v44, 5  ;;  %v432_v55 = vrot.slane %v421_v44, 6  ;;  %v433_v61 = vrot.slane %v421_v44, 7 }
 0x11f   :  { %v442_v56 = vperm.slane %v427_v34, 0  ;;  %v443_v57 = vperm.slane %v428_v49, 0  ;;  %v444_v58 = vperm.slane %v429_v50, 0  ;;  %v445_v59 = vperm.slane %v430_v51, 0 }
 0x120   :  { %v473_v60 = vadd.f32 %v441_v52, %v2980_v36  ;;  %v446_v62 = vperm.slane %v431_v54, 0  ;;  %v447_v37 = vperm.slane %v432_v55, 0  ;;  %v448_v5 = vperm.slane %v433_v61, 0 }
 0x121   :  { %v474_v63 = vadd.f32 %v442_v56, %v2961_v23  ;;  %v475_v0 = vadd.f32 %v443_v57, %v2966_v25  ;;  %v476_v1 = vadd.f32 %v444_v58, %v2968_v27  ;;  %v477_v2 = vadd.f32 %v445_v59, %v2970_v28 }
 0x122   :  { %v489_v3 = vadd.f32 %v473_v60, %v423_v53  ;;  %v372_v4 = vpop.f32.mrf.mxu2  ;;  %v395_v40 = vpop.f32.mrf.mxu3  ;;  %v478_v6 = vadd.f32 %v446_v62, %v2972_v29  ;;  %v479_v7 = vadd.f32 %v447_v37, %v2974_v32  ;;  %v480_v20 = vadd.f32 %v448_v5, %v2976_v33 }
 0x123   :  { %v490_v8 = vadd.f32 %v474_v63, %v423_v53  ;;  %v491_v10 = vadd.f32 %v475_v0, %v423_v53  ;;  %v3011_v14 = vadd.f32 %v372_v4, %v2955_v15  ;;  %v3014_v17 = vadd.f32 %v395_v40, %v2957_v16 }
 0x124   :  { %v492_v21 = vadd.f32 %v476_v1, %v423_v53  ;;  %v493_v22 = vadd.f32 %v477_v2, %v423_v53  ;;  %v494_v30 = vadd.f32 %v478_v6, %v423_v53  ;;  %v495_v50 = vadd.f32 %v479_v7, %v423_v53 }
 0x125   :  { %v434_v26 = vrot.slane %v3011_v14, 1  ;;  %v435_v44 = vrot.slane %v3011_v14, 2  ;;  %v449_v34 = vperm.slane %v3011_v14, 0  ;;  %v440_v49 = vrot.slane %v3011_v14, 7 }
 0x126   :  { %v496_v51 = vadd.f32 %v480_v20, %v423_v53  ;;  %vm505_vm6 = vcmp.gt.f32.partialorder %v489_v3, 0.0  ;;  %vm506_vm7 = vcmp.gt.f32.partialorder %v490_v8, 0.0  ;;  %vm507_vm8 = vcmp.gt.f32.partialorder %v491_v10, 0.0  ;;  %v3042_v20 = vpop.permute.xlu1 %590 }
 0x127   :  { %v3027_v52 = vperm.slane %v434_v26, 0  ;;  %v3029_v54 = vperm.slane %v435_v44, 0  ;;  %v456_v55 = vperm.slane %v440_v49, 0  ;;  %vm508_vm9 = vcmp.gt.f32.partialorder %v492_v21, 0.0  ;;  %3585 = vst [vmem:[#allocation17_spill] sm:$0xff] %v3042_v20 }
 0x128   :  { %vm509_vm10 = vcmp.gt.f32.partialorder %v493_v22, 0.0  ;;  %vm510_vm11 = vcmp.gt.f32.partialorder %v494_v30, 0.0  ;;  %vm511_vm12 = vcmp.gt.f32.partialorder %v495_v50, 0.0  ;;  %vm512_vm13 = vcmp.gt.f32.partialorder %v496_v51, 0.0 }
 0x129   :  { %v488_v56 = vadd.f32 %v456_v55, %v2998_v48  ;;  %v521_v57 = vmul.f32 0.01, %v489_v3  ;;  %v522_v58 = vmul.f32 0.01, %v490_v8  ;;  %v523_v59 = vmul.f32 0.01, %v491_v10 }
 0x12a   :  { %v524_v60 = vmul.f32 0.01, %v492_v21  ;;  %v525_v53 = vmul.f32 0.01, %v493_v22  ;;  %v3033_v61 = vadd.f32 %v449_v34, %v2978_v35  ;;  %v526_v37 = vmul.f32 0.01, %v494_v30  ;;  %v3048_v34 = vpop.permute.xlu2 %580 }
 0x12b   :  { %v504_v62 = vadd.f32 %v488_v56, %v3014_v17  ;;  %v527_v63 = vmul.f32 0.01, %v495_v50  ;;  %v528_v0 = vmul.f32 0.01, %v496_v51  ;;  %v537_v1 = vsel %vm505_vm6, %v489_v3, %v521_v57  ;;  %3586 = vst [vmem:[#allocation18_spill] sm:$0xff] %v3048_v34 }
 0x12c   :  { %v538_v2 = vsel %vm506_vm7, %v490_v8, %v522_v58  ;;  %v539_v4 = vsel %vm507_vm8, %v491_v10, %v523_v59  ;;  %v540_v40 = vsel %vm508_vm9, %v492_v21, %v524_v60  ;;  %v541_v6 = vsel %vm509_vm10, %v493_v22, %v525_v53  ;;  %v3050_v10 = vpop.permute.xlu0 %630 }
 0x12d   :  { %vm520_vm14 = vcmp.gt.f32.partialorder %v504_v62, 0.0  ;;  %v536_v5 = vmul.f32 0.01, %v504_v62  ;;  %v542_v7 = vsel %vm510_vm11, %v494_v30, %v526_v37  ;;  %v543_v26 = vsel %vm511_vm12, %v495_v50, %v527_v63  ;;  %3587 = vst [vmem:[#allocation19_spill] sm:$0xff] %v3050_v10 }
 0x12e   :  { %v544_v44 = vsel %vm512_vm13, %v496_v51, %v528_v0  ;;  %v633_v3 = vmul.f32 %v2947_v9, %v537_v1  ;;  %v634_v8 = vmul.f32 %v2953_v13, %v538_v2  ;;  %v635_v49 = vmul.f32 %v2963_v24, %v539_v4 }
 0x12f   :  { %v552_v21 = vsel %vm520_vm14, %v504_v62, %v536_v5  ;;  %v636_v22 = vmul.f32 %v3016_v18, %v540_v40  ;;  %v637_v30 = vmul.f32 %v3019_v31, %v541_v6  ;;  %v638_v50 = vmul.f32 %v3048_v34, %v542_v7 }
 0x130   :  { %v3056_v55 = vmul.f32 %v3050_v10, %v552_v21  ;;  %v639_v51 = vmul.f32 %v2959_v19, %v543_v26  ;;  %v640_v56 = vmul.f32 %v3042_v20, %v544_v44  ;;  %v649_v57 = vsel %vm345_vm4, %v633_v3, 0.0 }
 0x131   :  { %v656_v58 = vsel %vm345_vm4, %v634_v8, 0.0  ;;  %v663_v59 = vsel %vm345_vm4, %v635_v49, 0.0  ;;  %v670_v60 = vsel %vm345_vm4, %v636_v22, 0.0  ;;  %v650_v53 = vrot.slane %v649_v57, 4 }
 0x132   :  { %v657_v62 = vrot.slane %v656_v58, 4  ;;  %v664_v37 = vrot.slane %v663_v59, 4  ;;  %v671_v63 = vrot.slane %v670_v60, 4  ;;  %v677_v0 = vsel %vm345_vm4, %v637_v30, 0.0 }
 0x133   :  { %v684_v1 = vsel %vm345_vm4, %v638_v50, 0.0  ;;  %v691_v2 = vsel %vm345_vm4, %v639_v51, 0.0  ;;  %v698_v4 = vsel %vm345_vm4, %v640_v56, 0.0  ;;  %v651_v40 = vadd.f32 %v650_v53, %v649_v57  ;;  %v3069_v57 = vpop.permute.xlu2 %595 }
 0x134   :  { %v658_v5 = vadd.f32 %v657_v62, %v656_v58  ;;  %v665_v6 = vadd.f32 %v664_v37, %v663_v59  ;;  %v672_v7 = vadd.f32 %v671_v63, %v670_v60  ;;  %v678_v26 = vrot.slane %v677_v0, 4 }
 0x135   :  { %v685_v44 = vrot.slane %v684_v1, 4  ;;  %v692_v3 = vrot.slane %v691_v2, 4  ;;  %v699_v8 = vrot.slane %v698_v4, 4  ;;  %v652_v21 = vrot.slane %v651_v40, 2 }
 0x136   :  { %v659_v49 = vrot.slane %v658_v5, 2  ;;  %v666_v22 = vrot.slane %v665_v6, 2  ;;  %v673_v10 = vrot.slane %v672_v7, 2  ;;  %v679_v48 = vadd.f32 %v678_v26, %v677_v0 }
 0x137   :  { %v686_v30 = vadd.f32 %v685_v44, %v684_v1  ;;  %v693_v35 = vadd.f32 %v692_v3, %v691_v2  ;;  %v700_v50 = vadd.f32 %v699_v8, %v698_v4  ;;  %v653_v16 = vadd.f32 %v652_v21, %v651_v40 }
 0x138   :  { %v660_v51 = vadd.f32 %v659_v49, %v658_v5  ;;  %v667_v15 = vadd.f32 %v666_v22, %v665_v6  ;;  %v674_v56 = vadd.f32 %v673_v10, %v672_v7  ;;  %v680_v58 = vrot.slane %v679_v48, 2 }
 0x139   :  { %v687_v59 = vrot.slane %v686_v30, 2  ;;  %v694_v60 = vrot.slane %v693_v35, 2  ;;  %v701_v53 = vrot.slane %v700_v50, 2  ;;  %v654_v62 = vrot.slane %v653_v16, 1 }
 0x13a   :  { %v661_v37 = vrot.slane %v660_v51, 1  ;;  %v668_v63 = vrot.slane %v667_v15, 1  ;;  %v675_v20 = vrot.slane %v674_v56, 1  ;;  %v681_v19 = vadd.f32 %v680_v58, %v679_v48 }
 0x13b   :  { %v688_v34 = vadd.f32 %v687_v59, %v686_v30  ;;  %v695_v0 = vadd.f32 %v694_v60, %v693_v35  ;;  %v702_v1 = vadd.f32 %v701_v53, %v700_v50  ;;  %v655_v2 = vadd.f32 %v654_v62, %v653_v16  ;;  %v3082_v30 = vpop.permute.xlu1 %605  ;;  %v3084_v50 = vpop.permute.xlu2 %610 }
 0x13c   :  { %v662_v4 = vadd.f32 %v661_v37, %v660_v51  ;;  %v669_v40 = vadd.f32 %v668_v63, %v667_v15  ;;  %v676_v5 = vadd.f32 %v675_v20, %v674_v56  ;;  %v682_v6 = vrot.slane %v681_v19, 1 }
 0x13d   :  { %v689_v10 = vrot.slane %v688_v34, 1  ;;  %v696_v7 = vrot.slane %v695_v0, 1  ;;  %v703_v26 = vrot.slane %v702_v1, 1  ;;  %vm785_vm6 = vcmask 1044484  }
 0x13e   :  { %v683_v44 = vadd.f32 %v682_v6, %v681_v19  ;;  %v780_v48 = vsel %vm779_vm15, %v662_v4, %v655_v2  ;;  %vm787_vm7 = vcmask 1045509   ;;  %vm789_vm8 = vcmask 1046534  }
 0x13f   :  { %v690_v3 = vadd.f32 %v689_v10, %v688_v34  ;;  %v697_v8 = vadd.f32 %v696_v7, %v695_v0  ;;  %v704_v21 = vadd.f32 %v703_v26, %v702_v1  ;;  %vm3569_vm9 = vcmask 1047559  }
 0x140   :  { %v782_v15 = vsel %vm781_vm3, %v669_v40, %v780_v48  ;;  %v436_v16 = vrot.slane %v3011_v14, 3  ;;  %v437_v35 = vrot.slane %v3011_v14, 4  ;;  %v438_v20 = vrot.slane %v3011_v14, 5 }
 0x141   :  { %v784_v49 = vsel %vm783_vm5, %v676_v5, %v782_v15  ;;  %v439_v19 = vrot.slane %v3011_v14, 6  ;;  %v482_v34 = vadd.f32 %v3027_v52, %v2983_v39  ;;  %v483_v22 = vadd.f32 %v3029_v54, %v2987_v42 }
 0x142   :  { %v786_v51 = vsel %vm785_vm6, %v683_v44, %v784_v49  ;;  %v452_v56 = vperm.slane %v436_v16, 0  ;;  %v453_v58 = vperm.slane %v437_v35, 0  ;;  %v454_v59 = vperm.slane %v438_v20, 0 }
 0x143   :  { %v788_v60 = vsel %vm787_vm7, %v690_v3, %v786_v51  ;;  %v455_v53 = vperm.slane %v439_v19, 0  ;;  %v497_v14 = vadd.f32 %v3033_v61, %v3014_v17  ;;  %v498_v52 = vadd.f32 %v482_v34, %v3014_v17  ;;  %v3106_v49 = vpop.permute.xlu1 %620  ;;  %v3108_v19 = vpop.permute.xlu2 %625 }
 0x144   :  { %v790_v62 = vsel %vm789_vm8, %v697_v8, %v788_v60  ;;  %v484_v54 = vadd.f32 %v452_v56, %v2989_v43  ;;  %v485_v37 = vadd.f32 %v453_v58, %v2992_v45  ;;  %v486_v63 = vadd.f32 %v454_v59, %v2994_v46 }
 0x145   :  { %v792_v0 = vsel %vm3569_vm9, %v704_v21, %v790_v62  ;;  %v487_v1 = vadd.f32 %v455_v53, %v2996_v47  ;;  %v499_v2 = vadd.f32 %v483_v22, %v3014_v17  ;;  %vm513_vm10 = vcmp.gt.f32.partialorder %v497_v14, 0.0 }
 0x146   :  { %2596 = vmatmul.msk.f32.vlgmr.msra.gmra.mxu2 %vm345_vm4, %v792_v0  ;;  %v500_v61 = vadd.f32 %v484_v54, %v3014_v17  ;;  %v501_v4 = vadd.f32 %v485_v37, %v3014_v17  ;;  %v502_v40 = vadd.f32 %v486_v63, %v3014_v17  ;;  %vm514_vm11 = vcmp.gt.f32.partialorder %v498_v52, 0.0 }
 0x147   :  { %v503_v5 = vadd.f32 %v487_v1, %v3014_v17  ;;  %vm515_vm12 = vcmp.gt.f32.partialorder %v499_v2, 0.0  ;;  %v529_v6 = vmul.f32 0.01, %v497_v14  ;;  %v530_v10 = vmul.f32 0.01, %v498_v52 }
 0x148   :  { %vm516_vm13 = vcmp.gt.f32.partialorder %v500_v61, 0.0  ;;  %vm517_vm14 = vcmp.gt.f32.partialorder %v501_v4, 0.0  ;;  %vm518_vm1 = vcmp.gt.f32.partialorder %v502_v40, 0.0  ;;  %v531_v7 = vmul.f32 0.01, %v499_v2 }
 0x149   :  { %vm519_vm0 = vcmp.gt.f32.partialorder %v503_v5, 0.0  ;;  %v532_v26 = vmul.f32 0.01, %v500_v61  ;;  %v533_v44 = vmul.f32 0.01, %v501_v4  ;;  %v545_v3 = vsel %vm513_vm10, %v497_v14, %v529_v6 }
 0x14a   :  { %v534_v8 = vmul.f32 0.01, %v502_v40  ;;  %v535_v21 = vmul.f32 0.01, %v503_v5  ;;  %v546_v48 = vsel %vm514_vm11, %v498_v52, %v530_v10  ;;  %v547_v15 = vsel %vm515_vm12, %v499_v2, %v531_v7 }
 0x14b   :  { %v548_v16 = vsel %vm516_vm13, %v500_v61, %v532_v26  ;;  %v549_v35 = vsel %vm517_vm14, %v501_v4, %v533_v44  ;;  %v641_v17 = vmul.f32 %v3069_v57, %v545_v3  ;;  %v642_v20 = vmul.f32 %v2985_v41, %v546_v48 }
 0x14c   :  { %v550_v34 = vsel %vm518_vm1, %v502_v40, %v534_v8  ;;  %v551_v22 = vsel %vm519_vm0, %v503_v5, %v535_v21  ;;  %v643_v51 = vmul.f32 %v3082_v30, %v547_v15  ;;  %v644_v56 = vmul.f32 %v3084_v50, %v548_v16 }
 0x14d   :  { %v645_v58 = vmul.f32 %v3021_v38, %v549_v35  ;;  %v646_v59 = vmul.f32 %v3106_v49, %v550_v34  ;;  %v647_v60 = vmul.f32 %v3108_v19, %v551_v22  ;;  %v705_v53 = vsel %vm345_vm4, %v641_v17, 0.0 }
 0x14e   :  { %v706_v14 = vrot.slane %v705_v53, 4  ;;  %v712_v52 = vsel %vm345_vm4, %v642_v20, 0.0  ;;  %v719_v62 = vsel %vm345_vm4, %v643_v51, 0.0  ;;  %v726_v54 = vsel %vm345_vm4, %v644_v56, 0.0 }
 0x14f   :  { %v713_v37 = vrot.slane %v712_v52, 4  ;;  %v720_v63 = vrot.slane %v719_v62, 4  ;;  %v727_v0 = vrot.slane %v726_v54, 4  ;;  %v733_v1 = vsel %vm345_vm4, %v645_v58, 0.0 }
 0x150   :  { %v707_v2 = vadd.f32 %v706_v14, %v705_v53  ;;  %v734_v61 = vrot.slane %v733_v1, 4  ;;  %v740_v4 = vsel %vm345_vm4, %v646_v59, 0.0  ;;  %v747_v40 = vsel %vm345_vm4, %v647_v60, 0.0 }
 0x151   :  { %v714_v5 = vadd.f32 %v713_v37, %v712_v52  ;;  %v721_v6 = vadd.f32 %v720_v63, %v719_v62  ;;  %v728_v10 = vadd.f32 %v727_v0, %v726_v54  ;;  %v741_v7 = vrot.slane %v740_v4, 4 }
 0x152   :  { %v708_v26 = vrot.slane %v707_v2, 2  ;;  %v735_v44 = vadd.f32 %v734_v61, %v733_v1  ;;  %v748_v3 = vrot.slane %v747_v40, 4  ;;  %v754_v8 = vsel %vm345_vm4, %v3056_v55, 0.0 }
 0x153   :  { %v715_v21 = vrot.slane %v714_v5, 2  ;;  %v722_v48 = vrot.slane %v721_v6, 2  ;;  %v729_v15 = vrot.slane %v728_v10, 2  ;;  %v742_v16 = vadd.f32 %v741_v7, %v740_v4 }
 0x154   :  { %v709_v35 = vadd.f32 %v708_v26, %v707_v2  ;;  %v736_v17 = vrot.slane %v735_v44, 2  ;;  %v749_v20 = vadd.f32 %v748_v3, %v747_v40  ;;  %v755_v34 = vrot.slane %v754_v8, 4 }
 0x155   :  { %v716_v22 = vadd.f32 %v715_v21, %v714_v5  ;;  %v723_v51 = vadd.f32 %v722_v48, %v721_v6  ;;  %v730_v56 = vadd.f32 %v729_v15, %v728_v10  ;;  %v743_v58 = vrot.slane %v742_v16, 2 }
 0x156   :  { %v710_v59 = vrot.slane %v709_v35, 1  ;;  %v737_v60 = vadd.f32 %v736_v17, %v735_v44  ;;  %v750_v53 = vrot.slane %v749_v20, 2  ;;  %v756_v14 = vadd.f32 %v755_v34, %v754_v8 }
 0x157   :  { %v717_v52 = vrot.slane %v716_v22, 1  ;;  %v724_v62 = vrot.slane %v723_v51, 1  ;;  %v731_v54 = vrot.slane %v730_v56, 1  ;;  %v744_v55 = vadd.f32 %v743_v58, %v742_v16 }
 0x158   :  { %v738_v37 = vrot.slane %v737_v60, 1  ;;  %v751_v63 = vadd.f32 %v750_v53, %v749_v20  ;;  %v757_v0 = vrot.slane %v756_v14, 2  ;;  %v711_v1 = vadd.f32 %v710_v59, %v709_v35  ;;  %v336_v20 = vpop.f32.mrf.mxu0 }
 0x159   :  { %v718_v2 = vadd.f32 %v717_v52, %v716_v22  ;;  %v725_v61 = vadd.f32 %v724_v62, %v723_v51  ;;  %v745_v4 = vrot.slane %v744_v55, 1  ;;  %v732_v6 = vadd.f32 %v731_v54, %v730_v56  ;;  %v342_v22 = vld [vmem:[#allocation5 + $0xd8] ss:$0 sm:$0xff] }
 0x15a   :  { %v752_v40 = vrot.slane %v751_v63, 1  ;;  %v758_v5 = vadd.f32 %v757_v0, %v756_v14  ;;  %v739_v7 = vadd.f32 %v738_v37, %v737_v60  ;;  %v3133_v51 = vadd.f32 %v342_v22, %v336_v20 }
 0x15b   :  { %v793_v10 = vsel %vm779_vm15, %v718_v2, %v711_v1  ;;  %v746_v3 = vadd.f32 %v745_v4, %v744_v55 }
 0x15c   :  { %v759_v26 = vrot.slane %v758_v5, 1  ;;  %v794_v44 = vsel %vm781_vm3, %v725_v61, %v793_v10  ;;  %v753_v21 = vadd.f32 %v752_v40, %v751_v63 }
 0x15d   :  { %v795_v8 = vsel %vm783_vm5, %v732_v6, %v794_v44 }
 0x15e   :  { %v796_v48 = vsel %vm785_vm6, %v739_v7, %v795_v8  ;;  %v760_v15 = vadd.f32 %v759_v26, %v758_v5 }
 0x15f   :  { %v797_v16 = vsel %vm787_vm7, %v746_v3, %v796_v48 }
 0x160   :  { %v798_v35 = vsel %vm789_vm8, %v753_v21, %v797_v16  ;;  %v339_v34 = vpop.f32.mrf.mxu0 }
 0x161   :  { %v799_v17 = vsel %vm3569_vm9, %v760_v15, %v798_v35  ;;  %v3139_v52 = vadd.f32 %v342_v22, %v339_v34 }
 0x162   :  { %2597 = vmatmul.msk.f32.gmra.mxu2 %vm345_vm4, %v799_v17 }
 0x168   :  { %v415_v56 = vpop.f32.mrf.mxu0 }
 0x169   :  { %v761_v58 = vadd.f32 %v415_v56, %v3133_v51 }
 0x170   :  { %v418_v62 = vpop.f32.mrf.mxu0 }
 0x171   :  { %v762_v54 = vadd.f32 %v418_v62, %v3139_v52 }
 0x1c9   :  { %v821_v59 = vpop.f32.mrf.mxu2 }
 0x1ca   :  { %v827_v60 = vadd.f32 %v821_v59, %v761_v58 }
 0x1cc   :  { %vm829_vm0 = vcmp.gt.f32.partialorder %v827_v60, 0.0  ;;  %v831_v53 = vmul.f32 0.01, %v827_v60 }
 0x1ce   :  { %v833_v14 = vsel %vm829_vm0, %v827_v60, %v831_v53 }
 0x1cf   :  { %2598 = vmatmul.msk.f32.vlgmr.msrb.gmra.mxu3 %vm345_vm4, %v833_v14  ;;  %2600 = vmatmul.msk.f32.vlgmr.msrb.gmra.mxu0 %vm345_vm4, %v833_v14 }
 0x1d0   :  { %2602 = vmatmul.msk.f32.vlgmr.msrb.gmra.mxu2 %vm345_vm4, %v833_v14 }
 0x1e5   :  { %v824_v55 = vpop.f32.mrf.mxu2 }
 0x1e6   :  { %v828_v37 = vadd.f32 %v824_v55, %v762_v54 }
 0x1e8   :  { %v832_v63 = vmul.f32 0.01, %v828_v37  ;;  %vm830_vm1 = vcmp.gt.f32.partialorder %v828_v37, 0.0 }
 0x1ea   :  { %v834_v0 = vsel %vm830_vm1, %v828_v37, %v832_v63 }
 0x1eb   :  { %2599 = vmatmul.msk.f32.gmra.mxu3 %vm345_vm4, %v834_v0  ;;  %2601 = vmatmul.msk.f32.gmra.mxu0 %vm345_vm4, %v834_v0 }
 0x1ec   :  { %2603 = vmatmul.msk.f32.gmra.mxu2 %vm345_vm4, %v834_v0 }
 0x24c   :  { %v881_v1 = vpop.f32.mrf.mxu0 }
 0x24d   :  { %v912_v4 = vadd.f32 %v881_v1, %v2951_v12 }
 0x252   :  { %v858_v2 = vpop.f32.mrf.mxu3 }
 0x253   :  { %v910_v61 = vadd.f32 %v858_v2, %v2949_v11 }
 0x255   :  { %v916_v40 = vrot.slane %v910_v61, 1  ;;  %v917_v5 = vrot.slane %v910_v61, 2  ;;  %v918_v6 = vrot.slane %v910_v61, 3  ;;  %v919_v10 = vrot.slane %v910_v61, 4 }
 0x256   :  { %v930_v7 = vperm.slane %v910_v61, 0  ;;  %v920_v26 = vrot.slane %v910_v61, 5  ;;  %v921_v44 = vrot.slane %v910_v61, 6  ;;  %v922_v3 = vrot.slane %v910_v61, 7 }
 0x257   :  { %v931_v8 = vperm.slane %v916_v40, 0  ;;  %v932_v21 = vperm.slane %v917_v5, 0  ;;  %v933_v48 = vperm.slane %v918_v6, 0  ;;  %v934_v15 = vperm.slane %v919_v10, 0 }
 0x258   :  { %v962_v16 = vadd.f32 %v930_v7, %v2980_v36  ;;  %v935_v35 = vperm.slane %v920_v26, 0  ;;  %v936_v17 = vperm.slane %v921_v44, 0  ;;  %v937_v20 = vperm.slane %v922_v3, 0 }
 0x259   :  { %v963_v11 = vadd.f32 %v931_v8, %v2961_v23  ;;  %v964_v12 = vadd.f32 %v932_v21, %v2966_v25  ;;  %v965_v34 = vadd.f32 %v933_v48, %v2968_v27  ;;  %v966_v22 = vadd.f32 %v934_v15, %v2970_v28  ;;  %v3588_v8 = vld [vmem:[#allocation18_spill] sm:$0xff]  ;;  %v3589_v48 = vld [vmem:[#allocation13_spill] sm:$0xff] }
 0x25a   :  { %v967_v56 = vadd.f32 %v935_v35, %v2972_v29  ;;  %v968_v58 = vadd.f32 %v936_v17, %v2974_v32  ;;  %v969_v59 = vadd.f32 %v937_v20, %v2976_v33  ;;  %v978_v60 = vadd.f32 %v962_v16, %v912_v4  ;;  %v3590_v16 = vld [vmem:[#allocation17_spill] sm:$0xff] }
 0x25b   :  { %v979_v53 = vadd.f32 %v963_v11, %v912_v4  ;;  %v980_v36 = vadd.f32 %v964_v12, %v912_v4  ;;  %v981_v14 = vadd.f32 %v965_v34, %v912_v4  ;;  %v982_v62 = vadd.f32 %v966_v22, %v912_v4 }
 0x25c   :  { %v983_v54 = vadd.f32 %v967_v56, %v912_v4  ;;  %v984_v55 = vadd.f32 %v968_v58, %v912_v4  ;;  %v985_v23 = vadd.f32 %v969_v59, %v912_v4  ;;  %vm994_vm10 = vcmp.gt.f32.partialorder %v978_v60, 0.0 }
 0x25d   :  { %vm995_vm11 = vcmp.gt.f32.partialorder %v979_v53, 0.0  ;;  %vm996_vm12 = vcmp.gt.f32.partialorder %v980_v36, 0.0  ;;  %vm997_vm13 = vcmp.gt.f32.partialorder %v981_v14, 0.0  ;;  %vm998_vm14 = vcmp.gt.f32.partialorder %v982_v62, 0.0 }
 0x25e   :  { %vm999_vm0 = vcmp.gt.f32.partialorder %v983_v54, 0.0  ;;  %vm1000_vm1 = vcmp.gt.f32.partialorder %v984_v55, 0.0  ;;  %vm1001_vm2 = vcmp.gt.f32.partialorder %v985_v23, 0.0  ;;  %v1010_v25 = vmul.f32 0.01, %v978_v60 }
 0x25f   :  { %v1011_v27 = vmul.f32 0.01, %v979_v53  ;;  %v1012_v28 = vmul.f32 0.01, %v980_v36  ;;  %v1013_v29 = vmul.f32 0.01, %v981_v14 }
 0x260   :  { %v1014_v32 = vmul.f32 0.01, %v982_v62  ;;  %v1015_v33 = vmul.f32 0.01, %v983_v54  ;;  %v1016_v37 = vmul.f32 0.01, %v984_v55  ;;  %v1026_v63 = vsel %vm994_vm10, %v978_v60, %v1010_v25 }
 0x261   :  { %v1017_v0 = vmul.f32 0.01, %v985_v23  ;;  %v1027_v1 = vsel %vm995_vm11, %v979_v53, %v1011_v27  ;;  %v1028_v2 = vsel %vm996_vm12, %v980_v36, %v1012_v28  ;;  %v1029_v61 = vsel %vm997_vm13, %v981_v14, %v1013_v29 }
 0x262   :  { %v1030_v4 = vsel %vm998_vm14, %v982_v62, %v1014_v32  ;;  %v1031_v40 = vsel %vm999_vm0, %v983_v54, %v1015_v33  ;;  %v1032_v5 = vsel %vm1000_vm1, %v984_v55, %v1016_v37  ;;  %v1042_v6 = vmul.f32 %v1026_v63, %v2947_v9 }
 0x263   :  { %v1033_v10 = vsel %vm1001_vm2, %v985_v23, %v1017_v0  ;;  %v1043_v7 = vmul.f32 %v1027_v1, %v2953_v13  ;;  %v1044_v26 = vmul.f32 %v1028_v2, %v2963_v24  ;;  %v1045_v44 = vmul.f32 %v1029_v61, %v3016_v18 }
 0x264   :  { %v1046_v3 = vmul.f32 %v1030_v4, %v3019_v31  ;;  %v1047_v21 = vmul.f32 %v1031_v40, %v3588_v8  ;;  %v1048_v15 = vmul.f32 %v1032_v5, %v3589_v48  ;;  %v1049_v35 = vmul.f32 %v1033_v10, %v3590_v16 }
 0x265   :  { %v1058_v17 = vsel %vm345_vm4, %v1042_v6, 0.0  ;;  %v1065_v20 = vsel %vm345_vm4, %v1043_v7, 0.0  ;;  %v1072_v11 = vsel %vm345_vm4, %v1044_v26, 0.0  ;;  %v1079_v12 = vsel %vm345_vm4, %v1045_v44, 0.0 }
 0x266   :  { %v1059_v34 = vrot.slane %v1058_v17, 4  ;;  %v1066_v22 = vrot.slane %v1065_v20, 4  ;;  %v1073_v56 = vrot.slane %v1072_v11, 4  ;;  %v1080_v58 = vrot.slane %v1079_v12, 4 }
 0x267   :  { %v1086_v59 = vsel %vm345_vm4, %v1046_v3, 0.0  ;;  %v1093_v60 = vsel %vm345_vm4, %v1047_v21, 0.0  ;;  %v1100_v53 = vsel %vm345_vm4, %v1048_v15, 0.0  ;;  %v1107_v36 = vsel %vm345_vm4, %v1049_v35, 0.0 }
 0x268   :  { %v1060_v14 = vadd.f32 %v1059_v34, %v1058_v17  ;;  %v1067_v62 = vadd.f32 %v1066_v22, %v1065_v20  ;;  %v1074_v54 = vadd.f32 %v1073_v56, %v1072_v11  ;;  %v1081_v55 = vadd.f32 %v1080_v58, %v1079_v12  ;;  %v884_v5 = vpop.f32.mrf.mxu0  ;;  %v3591_v17 = vld [vmem:[#allocation11_spill] sm:$0xff]  ;;  %v3592_v22 = vld [vmem:[#allocation12_spill] sm:$0xff] }
 0x269   :  { %v1087_v23 = vrot.slane %v1086_v59, 4  ;;  %v1094_v25 = vrot.slane %v1093_v60, 4  ;;  %v1101_v27 = vrot.slane %v1100_v53, 4  ;;  %v1108_v1 = vrot.slane %v1107_v36, 4 }
 0x26a   :  { %v1061_v28 = vrot.slane %v1060_v14, 2  ;;  %v1068_v29 = vrot.slane %v1067_v62, 2  ;;  %v1075_v32 = vrot.slane %v1074_v54, 2  ;;  %v1082_v33 = vrot.slane %v1081_v55, 2 }
 0x26b   :  { %v1088_v37 = vadd.f32 %v1087_v23, %v1086_v59  ;;  %v1095_v63 = vadd.f32 %v1094_v25, %v1093_v60  ;;  %v1102_v0 = vadd.f32 %v1101_v27, %v1100_v53  ;;  %v1109_v26 = vadd.f32 %v1108_v1, %v1107_v36 }
 0x26c   :  { %v1062_v2 = vadd.f32 %v1061_v28, %v1060_v14  ;;  %v1069_v61 = vadd.f32 %v1068_v29, %v1067_v62  ;;  %v1076_v4 = vadd.f32 %v1075_v32, %v1074_v54  ;;  %v1083_v40 = vadd.f32 %v1082_v33, %v1081_v55 }
 0x26d   :  { %v1089_v6 = vrot.slane %v1088_v37, 2  ;;  %v1096_v10 = vrot.slane %v1095_v63, 2  ;;  %v1103_v7 = vrot.slane %v1102_v0, 2  ;;  %v913_v56 = vadd.f32 %v884_v5, %v3592_v22 }
 0x26e   :  { %v861_v44 = vpop.f32.mrf.mxu3  ;;  %v1063_v3 = vrot.slane %v1062_v2, 1  ;;  %v1070_v21 = vrot.slane %v1069_v61, 1  ;;  %v1077_v15 = vrot.slane %v1076_v4, 1  ;;  %v1084_v35 = vrot.slane %v1083_v40, 1 }
 0x26f   :  { %v911_v20 = vadd.f32 %v861_v44, %v3591_v17  ;;  %v1090_v11 = vadd.f32 %v1089_v6, %v1088_v37  ;;  %v1097_v12 = vadd.f32 %v1096_v10, %v1095_v63  ;;  %v1104_v34 = vadd.f32 %v1103_v7, %v1102_v0 }
 0x270   :  { %v1064_v58 = vadd.f32 %v1063_v3, %v1062_v2  ;;  %v1071_v59 = vadd.f32 %v1070_v21, %v1069_v61  ;;  %v1078_v60 = vadd.f32 %v1077_v15, %v1076_v4  ;;  %v1085_v54 = vadd.f32 %v1084_v35, %v1083_v40 }
 0x271   :  { %v923_v53 = vrot.slane %v911_v20, 1  ;;  %v924_v14 = vrot.slane %v911_v20, 2  ;;  %v938_v62 = vperm.slane %v911_v20, 0  ;;  %v1091_v36 = vrot.slane %v1090_v11, 1 }
 0x272   :  { %v1098_v55 = vrot.slane %v1097_v12, 1  ;;  %v1105_v23 = vrot.slane %v1104_v34, 1  ;;  %v1110_v25 = vrot.slane %v1109_v26, 2  ;;  %v1188_v29 = vsel %vm779_vm15, %v1071_v59, %v1064_v58 }
 0x273   :  { %v939_v27 = vperm.slane %v923_v53, 0  ;;  %v940_v28 = vperm.slane %v924_v14, 0  ;;  %v925_v32 = vrot.slane %v911_v20, 3  ;;  %v1092_v33 = vadd.f32 %v1091_v36, %v1090_v11  ;;  %v1237_v14 = vld [vmem:[#allocation5 + $0x150] sm:$0xff] }
 0x274   :  { %v1099_v37 = vadd.f32 %v1098_v55, %v1097_v12  ;;  %v1106_v63 = vadd.f32 %v1105_v23, %v1104_v34  ;;  %v1111_v0 = vadd.f32 %v1110_v25, %v1109_v26  ;;  %v1189_v1 = vsel %vm781_vm3, %v1078_v60, %v1188_v29  ;;  %v3593_v26 = vld [vmem:[#allocation14_spill] sm:$0xff]  ;;  %1337 = vmatpush.msra.mxu0 %v1237_v14 }
 0x275   :  { %v926_v2 = vrot.slane %v911_v20, 4  ;;  %v927_v61 = vrot.slane %v911_v20, 5  ;;  %v928_v4 = vrot.slane %v911_v20, 6  ;;  %v1190_v40 = vsel %vm783_vm5, %v1085_v54, %v1189_v1  ;;  %v1257_v54 = vld [vmem:[#allocation2] sm:$0xff] }
 0x276   :  { %v1112_v5 = vrot.slane %v1111_v0, 1  ;;  %v929_v6 = vrot.slane %v911_v20, 7  ;;  %v941_v10 = vperm.slane %v925_v32, 0  ;;  %v1191_v7 = vsel %vm785_vm6, %v1092_v33, %v1190_v40 }
 0x277   :  { %v942_v44 = vperm.slane %v926_v2, 0  ;;  %v943_v3 = vperm.slane %v927_v61, 0  ;;  %v944_v21 = vperm.slane %v928_v4, 0  ;;  %v1192_v35 = vsel %vm787_vm7, %v1099_v37, %v1191_v7  ;;  %v1258_v4 = vld [vmem:[#allocation2 + $0x8] sm:$0xff] }
 0x278   :  { %v1113_v15 = vadd.f32 %v1112_v5, %v1111_v0  ;;  %v945_v17 = vperm.slane %v929_v6, 0  ;;  %v970_v11 = vadd.f32 %v938_v62, %v3593_v26  ;;  %v1193_v12 = vsel %vm789_vm8, %v1106_v63, %v1192_v35  ;;  %v3594_v62 = vld [vmem:[#allocation15_spill] sm:$0xff] }
 0x279   :  { %v971_v34 = vadd.f32 %v939_v27, %v2983_v39  ;;  %v972_v22 = vadd.f32 %v940_v28, %v2987_v42  ;;  %v973_v20 = vadd.f32 %v941_v10, %v2989_v43  ;;  %v974_v59 = vadd.f32 %v942_v44, %v2992_v45 }
 0x27a   :  { %v1194_v58 = vsel %vm3569_vm9, %v1113_v15, %v1193_v12  ;;  %v975_v60 = vadd.f32 %v943_v3, %v2994_v46  ;;  %v976_v53 = vadd.f32 %v944_v21, %v2996_v47  ;;  %v977_v36 = vadd.f32 %v945_v17, %v3594_v62  ;;  %v3596_v17 = vld [vmem:[#allocation19_spill] sm:$0xff] }
 0x27b   :  { %2604 = vmatmul.msk.f32.vlgmr.msra.gmra.mxu3 %vm345_vm4, %v1194_v58  ;;  %v986_v55 = vadd.f32 %v970_v11, %v913_v56  ;;  %v987_v39 = vadd.f32 %v971_v34, %v913_v56  ;;  %v988_v23 = vadd.f32 %v972_v22, %v913_v56  ;;  %v989_v42 = vadd.f32 %v973_v20, %v913_v56 }
 0x27c   :  { %v990_v25 = vadd.f32 %v974_v59, %v913_v56  ;;  %v991_v43 = vadd.f32 %v975_v60, %v913_v56  ;;  %v992_v27 = vadd.f32 %v976_v53, %v913_v56  ;;  %v993_v28 = vadd.f32 %v977_v36, %v913_v56 }
 0x27d   :  { %vm1002_vm2 = vcmp.gt.f32.partialorder %v986_v55, 0.0  ;;  %vm1003_vm10 = vcmp.gt.f32.partialorder %v987_v39, 0.0  ;;  %vm3595_vm11 = vcmask 64512   ;;  %vm1004_vm12 = vcmp.gt.f32.partialorder %v988_v23, 0.0 }
 0x27e   :  { %2606 = vmatmul.msk.f32.vlgmr.msra.gmra.mxu0 %vm3595_vm11, %v1257_v54  ;;  %vm1005_vm13 = vcmp.gt.f32.partialorder %v989_v42, 0.0  ;;  %vm1006_vm14 = vcmp.gt.f32.partialorder %v990_v25, 0.0  ;;  %vm1007_vm0 = vcmp.gt.f32.partialorder %v991_v43, 0.0  ;;  %vm1008_vm1 = vcmp.gt.f32.partialorder %v992_v27, 0.0 }
 0x27f   :  { %vm1009_vm9 = vcmp.gt.f32.partialorder %v993_v28, 0.0  ;;  %v1018_v45 = vmul.f32 0.01, %v986_v55  ;;  %v1019_v46 = vmul.f32 0.01, %v987_v39 }
 0x280   :  { %v1020_v47 = vmul.f32 0.01, %v988_v23  ;;  %v1021_v29 = vmul.f32 0.01, %v989_v42  ;;  %v1022_v32 = vmul.f32 0.01, %v990_v25 }
 0x281   :  { %v1023_v33 = vmul.f32 0.01, %v991_v43  ;;  %v1024_v37 = vmul.f32 0.01, %v992_v27  ;;  %v1025_v63 = vmul.f32 0.01, %v993_v28  ;;  %v1034_v56 = vsel %vm1002_vm2, %v986_v55, %v1018_v45  ;;  %vm3597_vm2 = vmmov %vm3595_vm11 }
 0x282   :  { %v1035_v0 = vsel %vm1003_vm10, %v987_v39, %v1019_v46  ;;  %v1036_v1 = vsel %vm1004_vm12, %v988_v23, %v1020_v47  ;;  %v1037_v2 = vsel %vm1005_vm13, %v989_v42, %v1021_v29  ;;  %v1038_v61 = vsel %vm1006_vm14, %v990_v25, %v1022_v32  ;;  %v1259_v45 = vld [vmem:[#allocation2 + $0x10] sm:$0xff]  ;;  %vm3599_vm10 = vmmov %vm3597_vm2 }
 0x283   :  { %v1039_v5 = vsel %vm1007_vm0, %v991_v43, %v1023_v33  ;;  %v1040_v40 = vsel %vm1008_vm1, %v992_v27, %v1024_v37  ;;  %v1041_v6 = vsel %vm1009_vm9, %v993_v28, %v1025_v63  ;;  %v1050_v10 = vmul.f32 %v1034_v56, %v3069_v57  ;;  %vm3598_vm9 = vmmov %vm3597_vm2 }
 0x284   :  { %v1051_v7 = vmul.f32 %v1035_v0, %v2985_v41  ;;  %v1052_v44 = vmul.f32 %v1036_v1, %v3082_v30  ;;  %v1053_v3 = vmul.f32 %v1037_v2, %v3084_v50  ;;  %v1054_v21 = vmul.f32 %v1038_v61, %v3021_v38  ;;  %vm3603_vm14 = vmmov %vm3597_vm2 }
 0x285   :  { %v1055_v15 = vmul.f32 %v1039_v5, %v3106_v49  ;;  %v1056_v35 = vmul.f32 %v1040_v40, %v3108_v19  ;;  %v1057_v26 = vmul.f32 %v1041_v6, %v3596_v17  ;;  %v1114_v11 = vsel %vm345_vm4, %v1050_v10, 0.0 }
 0x286   :  { %2607 = vmatmul.msk.f32.gmra.mxu0 %vm3597_vm2, %v1258_v4  ;;  %v1115_v12 = vrot.slane %v1114_v11, 4  ;;  %v1121_v34 = vsel %vm345_vm4, %v1051_v7, 0.0  ;;  %v1128_v22 = vsel %vm345_vm4, %v1052_v44, 0.0  ;;  %v1135_v20 = vsel %vm345_vm4, %v1053_v3, 0.0 }
 0x287   :  { %v1122_v58 = vrot.slane %v1121_v34, 4  ;;  %v1129_v59 = vrot.slane %v1128_v22, 4  ;;  %v1136_v60 = vrot.slane %v1135_v20, 4  ;;  %v1142_v53 = vsel %vm345_vm4, %v1054_v21, 0.0 }
 0x288   :  { %v1116_v14 = vadd.f32 %v1115_v12, %v1114_v11  ;;  %v1143_v54 = vrot.slane %v1142_v53, 4  ;;  %v1149_v62 = vsel %vm345_vm4, %v1055_v15, 0.0  ;;  %v1156_v36 = vsel %vm345_vm4, %v1056_v35, 0.0 }
 0x289   :  { %v1123_v55 = vadd.f32 %v1122_v58, %v1121_v34  ;;  %v1130_v39 = vadd.f32 %v1129_v59, %v1128_v22  ;;  %v1137_v23 = vadd.f32 %v1136_v60, %v1135_v20  ;;  %v1150_v42 = vrot.slane %v1149_v62, 4  ;;  %v1260_v58 = vld [vmem:[#allocation2 + $0x18] sm:$0xff] }
 0x28a   :  { %v1117_v25 = vrot.slane %v1116_v14, 2  ;;  %v1144_v43 = vadd.f32 %v1143_v54, %v1142_v53  ;;  %v1157_v27 = vrot.slane %v1156_v36, 4  ;;  %v1163_v28 = vsel %vm345_vm4, %v1057_v26, 0.0 }
 0x28b   :  { %v1124_v46 = vrot.slane %v1123_v55, 2  ;;  %v1131_v47 = vrot.slane %v1130_v39, 2  ;;  %v1138_v29 = vrot.slane %v1137_v23, 2  ;;  %v1151_v32 = vadd.f32 %v1150_v42, %v1149_v62 }
 0x28c   :  { %v1118_v33 = vadd.f32 %v1117_v25, %v1116_v14  ;;  %v1145_v37 = vrot.slane %v1144_v43, 2  ;;  %v1158_v63 = vadd.f32 %v1157_v27, %v1156_v36  ;;  %v1164_v56 = vrot.slane %v1163_v28, 4 }
 0x28d   :  { %v1125_v0 = vadd.f32 %v1124_v46, %v1123_v55  ;;  %v1132_v1 = vadd.f32 %v1131_v47, %v1130_v39  ;;  %v1139_v2 = vadd.f32 %v1138_v29, %v1137_v23  ;;  %v1152_v61 = vrot.slane %v1151_v32, 2  ;;  %v1250_v55 = vld [vmem:[#allocation5 + $0x1c8] sm:$0xf]  ;;  %v1251_v46 = vld [vmem:[#allocation5 + $0x1d0] sm:$0xf] }
 0x28e   :  { %2608 = vmatmul.msk.f32.gmra.mxu0 %vm3598_vm9, %v1259_v45  ;;  %v1119_v4 = vrot.slane %v1118_v33, 1  ;;  %v1146_v5 = vadd.f32 %v1145_v37, %v1144_v43  ;;  %v1159_v40 = vrot.slane %v1158_v63, 2  ;;  %v1165_v6 = vadd.f32 %v1164_v56, %v1163_v28  ;;  %v2675_v43 = vld [vmem:[%s3548_s0] sm:$0xff]  ;;  %v2676_v47 = vld [vmem:[%s3548_s0 + $0x8] sm:$0xff]  ;;  %v1247_v37 = vld [vmem:[#allocation5 + $0x1b0] sm:$0xff]  ;;  %s2762_s0 = smov [#allocation7]  }
 0x28f   :  { %v1126_v10 = vrot.slane %v1125_v0, 1  ;;  %v1133_v7 = vrot.slane %v1132_v1, 1  ;;  %v1140_v44 = vrot.slane %v1139_v2, 1  ;;  %v1153_v3 = vadd.f32 %v1152_v61, %v1151_v32  ;;  %v1261_v45 = vld [vmem:[#allocation2 + $0x20] sm:$0xff]  ;;  %v1262_v29 = vld [vmem:[#allocation2 + $0x28] sm:$0xff]  ;;  %v1244_v56 = vld [vmem:[#allocation5 + $0x198] sm:$0xff] }
 0x290   :  { %v1147_v21 = vrot.slane %v1146_v5, 1  ;;  %v1160_v15 = vadd.f32 %v1159_v40, %v1158_v63  ;;  %v1166_v35 = vrot.slane %v1165_v6, 2  ;;  %v1120_v26 = vadd.f32 %v1119_v4, %v1118_v33  ;;  %v1252_v32 = vld [vmem:[#allocation5 + $0x1d8] sm:$0xf]  ;;  %v1263_v33 = vld [vmem:[#allocation2 + $0x30] sm:$0xff]  ;;  %v1266_v61 = vld [vmem:[#allocation2 + $0x48] sm:$0xff] }
 0x291   :  { %v1127_v11 = vadd.f32 %v1126_v10, %v1125_v0  ;;  %v1134_v12 = vadd.f32 %v1133_v7, %v1132_v1  ;;  %v1154_v34 = vrot.slane %v1153_v3, 1  ;;  %v1141_v59 = vadd.f32 %v1140_v44, %v1139_v2  ;;  %v1264_v63 = vld [vmem:[#allocation2 + $0x38] sm:$0xff]  ;;  %v1241_v1 = vld [vmem:[#allocation5 + $0x180] sm:$0xff]  ;;  %v1267_v4 = vld [vmem:[#allocation2 + $0x50] sm:$0xff]  ;;  %s2549_s21 = sshll.u32 %s2762_s0, 4  ;;  %s2550_s21 = int_to_ptr.vmem [resolvable:$true] %s2549_s21 }
 0x292   :  { %v1161_v22 = vrot.slane %v1160_v15, 1  ;;  %v1167_v20 = vadd.f32 %v1166_v35, %v1165_v6  ;;  %v1148_v53 = vadd.f32 %v1147_v21, %v1146_v5  ;;  %vm3600_vm11 = vcmask 1043456   ;;  %v1248_v0 = vld [vmem:[#allocation5 + $0x1b8] sm:$0xff]  ;;  %v1265_v2 = vld [vmem:[#allocation2 + $0x40] sm:$0xff]  ;;  %v1238_v10 = vld [vmem:[#allocation5 + $0x168] sm:$0xff] }
 0x293   :  { %v1195_v60 = vsel %vm779_vm15, %v1127_v11, %v1120_v26  ;;  %v1155_v62 = vadd.f32 %v1154_v34, %v1153_v3  ;;  %2622 = vmatpush.msk.msra.mxu2 %vm3600_vm11, %v1250_v55  ;;  %vm3601_vm12 = vcmask 31744   ;;  %vm3602_vm13 = vcmask 1047559   ;;  %vm3604_vm0 = vmmov %vm3600_vm11  ;;  %1911 = vmatpush.msrb.mxu1 %v1248_v0  ;;  %v1268_v5 = vld [vmem:[#allocation2 + $0x58] sm:$0xff]  ;;  %v1269_v40 = vld [vmem:[#allocation2 + $0x60] sm:$0xff]  ;;  %v904_v3 = vpop.f32.mrf.mxu2 }
 0x294   :  { %v1168_v14 = vrot.slane %v1167_v20, 1  ;;  %v1196_v54 = vsel %vm781_vm3, %v1134_v12, %v1195_v60  ;;  %v1162_v39 = vadd.f32 %v1161_v22, %v1160_v15  ;;  %2623 = vmatmul.msk.f32.vlgmr.msra.gmra.mxu2 %vm3601_vm12, %v2675_v43  ;;  %2625 = vmatpush.msk.msrb.mxu3 %vm3604_vm0, %v1251_v46  ;;  %vm3605_vm1 = vmmov %vm3601_vm12  ;;  %v1245_v6 = vld [vmem:[#allocation5 + $0x1a0] sm:$0xff]  ;;  %v1242_v7 = vld [vmem:[#allocation5 + $0x188] sm:$0xff]  ;;  %v1170_v21 = vadd.f32 %v904_v3, %v3133_v51 }
 0x295   :  { %v1197_v36 = vsel %vm783_vm5, %v1141_v59, %v1196_v54  ;;  %vm3606_vm2 = vmmov %vm3605_vm1  ;;  %v1239_v44 = vld [vmem:[#allocation5 + $0x170] sm:$0xff]  ;;  %1912 = vmatpush.msrb.mxu1 %v1245_v6  ;;  %v1270_v11 = vld [vmem:[#allocation2 + $0x68] sm:$0xff] }
 0x296   :  { %2609 = vmatmul.msk.f32.gmra.mxu0 %vm3599_vm10, %v1260_v58  ;;  %v1198_v23 = vsel %vm785_vm6, %v1148_v53, %v1197_v36  ;;  %v1169_v42 = vadd.f32 %v1168_v14, %v1167_v20  ;;  %vm3607_vm10 = vmmov %vm3604_vm0  ;;  %1486 = vmatpush.msra.mxu3 %v1247_v37  ;;  %v3258_v34 = vld [vmem:[#allocation5 + $0x1c0] sm:$0xff]  ;;  %v3262_v22 = vld [vmem:[#allocation5 + $0x1a8] sm:$0xff] }
 0x297   :  { %v1199_v25 = vsel %vm787_vm7, %v1155_v62, %v1198_v23  ;;  %2628 = vmatpush.msk.msrb.mxu2 %vm3607_vm10, %v1252_v32  ;;  %vm3608_vm11 = vmmov %vm3605_vm1  ;;  %1913 = vmatpush.msrb.mxu1 %v1242_v7  ;;  %v3265_v20 = vld [vmem:[#allocation5 + $0x190] sm:$0xff]  ;;  %v3268_v58 = vld [vmem:[#allocation5 + $0x178] sm:$0xff] }
 0x298   :  { %v1200_v27 = vsel %vm789_vm8, %v1162_v39, %v1199_v25  ;;  %vm3609_vm12 = vmmov %vm3605_vm1  ;;  %1487 = vmatpush.msra.mxu3 %v1244_v56  ;;  %v1271_v51 = vld [vmem:[#allocation2 + $0x70] sm:$0xff]  ;;  %v1272_v60 = vld [vmem:[#allocation2 + $0x78] sm:$0xff] }
 0x299   :  { %v1201_v28 = vsel %vm3602_vm13, %v1169_v42, %v1200_v27  ;;  %vm3610_vm13 = vmmov %vm3598_vm9  ;;  %1509 = vmatpush.msra.mxu2 %v1248_v0  ;;  %1914 = vmatpush.msrb.mxu1 %v1239_v44 }
 0x29a   :  { %2605 = vmatmul.msk.f32.gmra.mxu3 %vm345_vm4, %v1201_v28  ;;  %vm3612_vm0 = vmmov %vm3598_vm9 }
 0x29b   :  { %1488 = vmatpush.msra.mxu3 %v1241_v1  ;;  %vm3616_vm10 = vmmov %vm3612_vm0  ;;  %1510 = vmatpush.msra.mxu2 %v1245_v6  ;;  %v907_v14 = vpop.f32.mrf.mxu2  ;;  %v3300_v6 = vld [vmem:[#allocation5 + $0x1e0] ss:$0 sm:$0xff] }
 0x29c   :  { %2624 = vmatmul.msk.f32.gmra.mxu2 %vm3605_vm1, %v2676_v47  ;;  %v1171_v54 = vadd.f32 %v907_v14, %v3139_v52 }
 0x29d   :  { %1489 = vmatpush.msra.mxu3 %v1238_v10  ;;  %1511 = vmatpush.msra.mxu2 %v1242_v7 }
 0x29e   :  { %2610 = vmatmul.msk.f32.gmra.mxu0 %vm3603_vm14, %v1261_v45  ;;  %vm3611_vm14 = vmmov %vm3605_vm1 }
 0x29f   :  { %vm3613_vm1 = vmmov %vm3612_vm0  ;;  %1512 = vmatpush.msra.mxu2 %v1239_v44 }
 0x2a2   :  { %2626 = vmatmul.msk.f32.vlgmr.msrb.gmra.mxu3 %vm3606_vm2, %v2675_v43  ;;  %vm3614_vm2 = vmmov %vm3612_vm0 }
 0x2a3   :  { %1532 = vmatpush.msrb.mxu3 %v3258_v34 }
 0x2a4   :  { %2629 = vmatmul.msk.f32.vlgmr.msrb.gmra.mxu2 %vm3608_vm11, %v2675_v43  ;;  %vm3617_vm11 = vmmov %vm3612_vm0 }
 0x2a5   :  { %1533 = vmatpush.msrb.mxu3 %v3262_v22 }
 0x2a6   :  { %2611 = vmatmul.msk.f32.gmra.mxu0 %vm3598_vm9, %v1262_v29  ;;  %vm3615_vm9 = vmmov %vm3612_vm0 }
 0x2a7   :  { %1534 = vmatpush.msrb.mxu3 %v3265_v20 }
 0x2a9   :  { %1535 = vmatpush.msrb.mxu3 %v3268_v58 }
 0x2aa   :  { %2627 = vmatmul.msk.f32.gmra.mxu3 %vm3609_vm12, %v2676_v47 }
 0x2ac   :  { %2630 = vmatmul.msk.f32.gmra.mxu2 %vm3611_vm14, %v2676_v47  ;;  %vm3619_vm14 = vmmov %vm3612_vm0 }
 0x2ae   :  { %2612 = vmatmul.msk.f32.gmra.mxu0 %vm3610_vm13, %v1263_v33  ;;  %vm3618_vm13 = vmmov %vm3612_vm0 }
 0x2b6   :  { %2613 = vmatmul.msk.f32.gmra.mxu0 %vm3612_vm0, %v1264_v63 }
 0x2be   :  { %2614 = vmatmul.msk.f32.gmra.mxu0 %vm3613_vm1, %v1265_v2 }
 0x2c6   :  { %2615 = vmatmul.msk.f32.gmra.mxu0 %vm3614_vm2, %v1266_v61 }
 0x2ce   :  { %2616 = vmatmul.msk.f32.gmra.mxu0 %vm3615_vm9, %v1267_v4 }
 0x2d6   :  { %2617 = vmatmul.msk.f32.gmra.mxu0 %vm3616_vm10, %v1268_v5 }
 0x2de   :  { %2618 = vmatmul.msk.f32.gmra.mxu0 %vm3617_vm11, %v1269_v40 }
 0x2e6   :  { %2619 = vmatmul.msk.f32.gmra.mxu0 %vm3618_vm13, %v1270_v11 }
 0x2ee   :  { %2620 = vmatmul.msk.f32.gmra.mxu0 %vm3619_vm14, %v1271_v51 }
 0x2f6   :  { %2621 = vmatmul.msk.f32.gmra.mxu0 %vm3612_vm0, %v1272_v60 }
 0x2fb   :  { %v1339_v59 = vpop.f32.mrf.mxu0 }
 0x2fc   :  { %v3303_v7 = vadd.f32 %v1339_v59, %v3300_v6 }
 0x2fe   :  { %v1223_v15 = vpop.f32.mrf.mxu3 }
 0x2ff   :  { %v1229_v35 = vadd.f32 %v1223_v15, %v1170_v21 }
 0x301   :  { %vm1231_vm12 = vcmp.gt.f32.partialorder %v1229_v35, 0.0  ;;  %v1233_v26 = vmul.f32 0.01, %v1229_v35 }
 0x303   :  { %v1235_v12 = vsel %vm1231_vm12, %v1229_v35, %v1233_v26  ;;  %v1342_v53 = vpop.f32.mrf.mxu0 }
 0x304   :  { %2631 = vmatmul.msk.f32.vlgmr.msra.gmra.mxu3 %vm345_vm4, %v1235_v12  ;;  %2633 = vmatmul.msk.f32.vlgmr.msra.gmra.mxu2 %vm345_vm4, %v1235_v12  ;;  %v2337_v23 = vrot.slane %v1235_v12, 1  ;;  %v2395_v27 = vrot.slane %v1235_v12, 2  ;;  %v3306_v44 = vadd.f32 %v1342_v53, %v3300_v6 }
 0x305   :  { %1888 = vmatpush.msra.mxu3 %v1247_v37 }
 0x307   :  { %1889 = vmatpush.msra.mxu3 %v1244_v56 }
 0x309   :  { %1890 = vmatpush.msra.mxu3 %v1241_v1 }
 0x30b   :  { %1891 = vmatpush.msra.mxu3 %v1238_v10  ;;  %v1345_v39 = vpop.f32.mrf.mxu0 }
 0x30c   :  { %v3309_v3 = vadd.f32 %v1345_v39, %v3300_v6 }
 0x313   :  { %v1348_v46 = vpop.f32.mrf.mxu0 }
 0x314   :  { %v3312_v21 = vadd.f32 %v1348_v46, %v3300_v6 }
 0x317   :  { %v3288_v63 = vpop.f32.mrf.mxu2 }
 0x31b   :  { %v1351_v47 = vpop.f32.mrf.mxu0 }
 0x31c   :  { %v3315_v26 = vadd.f32 %v1351_v47, %v3300_v6 }
 0x31d   :  { %v1226_v62 = vpop.f32.mrf.mxu3 }
 0x31e   :  { %v1230_v36 = vadd.f32 %v1226_v62, %v1171_v54  ;;  %3623 = vst [vmem:[#allocation15_spill] sm:$0xff] %v3315_v26 }
 0x31f   :  { %v3290_v0 = vpop.f32.mrf.mxu2 }
 0x320   :  { %vm1232_vm1 = vcmp.gt.f32.partialorder %v1230_v36, 0.0  ;;  %v1234_v55 = vmul.f32 0.01, %v1230_v36 }
 0x322   :  { %v1236_v42 = vsel %vm1232_vm1, %v1230_v36, %v1234_v55  ;;  %vm3627_vm1 = vcmask 1047559  }
 0x323   :  { %2632 = vmatmul.msk.f32.gmra.mxu3 %vm345_vm4, %v1236_v42  ;;  %2634 = vmatmul.msk.f32.gmra.mxu2 %vm345_vm4, %v1236_v42  ;;  %v2277_v25 = vrot.slane %v1236_v42, 7  ;;  %v3278_v43 = vsel %vm779_vm15, %v1236_v42, %v2337_v23  ;;  %v2396_v28 = vrot.slane %v1236_v42, 1  ;;  %v1354_v29 = vpop.f32.mrf.mxu0 }
 0x324   :  { %3620 = vst [vmem:[#allocation11_spill] sm:$0xff] %v3278_v43  ;;  %v3318_v11 = vadd.f32 %v1354_v29, %v3300_v6 }
 0x325   :  { %v3281_v45 = vsel %vm779_vm15, %v2277_v25, %v1235_v12  ;;  %v3284_v52 = vsel %vm779_vm15, %v2396_v28, %v2395_v27  ;;  %v3292_v2 = vpop.f32.mrf.mxu3 }
 0x326   :  { %3621 = vst [vmem:[#allocation12_spill] sm:$0xff] %v3284_v52 }
 0x327   :  { %3622 = vst [vmem:[#allocation14_spill] sm:$0xff] %v3292_v2  ;;  %v3294_v61 = vpop.f32.mrf.mxu2 }
 0x328   :  { %3624 = vst [vmem:[#allocation19_spill] sm:$0xff] %v3318_v11 }
 0x32b   :  { %2635 = vmatmul.msk.f32.vlgmr.msrb.gmra.mxu3 %vm345_vm4, %v1235_v12  ;;  %v1357_v32 = vpop.f32.mrf.mxu0 }
 0x32c   :  { %v3321_v12 = vadd.f32 %v1357_v32, %v3300_v6 }
 0x32d   :  { %v3296_v5 = vpop.f32.mrf.mxu3 }
 0x32e   :  { %3625 = vst [vmem:[#allocation20_spill] sm:$0xff] %v3321_v12 }
 0x32f   :  { %v3298_v40 = vpop.f32.mrf.mxu2 }
 0x333   :  { %2636 = vmatmul.msk.f32.gmra.mxu3 %vm345_vm4, %v1236_v42  ;;  %v1360_v33 = vpop.f32.mrf.mxu0 }
 0x334   :  { %v3325_v59 = vadd.f32 %v1360_v33, %v3300_v6 }
 0x336   :  { %3626 = vst [vmem:[#allocation21_spill] sm:$0xff] %v3325_v59 }
 0x33b   :  { %v1363_v37 = vpop.f32.mrf.mxu0 }
 0x33c   :  { %v3328_v60 = vadd.f32 %v1363_v37, %v3300_v6 }
 0x343   :  { %v1366_v56 = vpop.f32.mrf.mxu0 }
 0x344   :  { %v3331_v53 = vadd.f32 %v1366_v56, %v3300_v6 }
 0x34b   :  { %v1369_v1 = vpop.f32.mrf.mxu0 }
 0x353   :  { %v1372_v4 = vpop.f32.mrf.mxu0 }
 0x35b   :  { %v1375_v10 = vpop.f32.mrf.mxu0 }
 0x363   :  { %v1378_v56 = vpop.f32.mrf.mxu0 }
 0x387   :  { %v1491_v15 = vpop.f32.mrf.mxu3  ;;  %v1514_v35 = vpop.f32.mrf.mxu2 }
 0x388   :  { %v1543_v51 = vadd.f32 %v1491_v15, %v3288_v63  ;;  %v1545_v14 = vadd.f32 %v1514_v35, %v3292_v2 }
 0x38a   :  { %v1549_v54 = vrot.slane %v1543_v51, 1  ;;  %v1550_v62 = vrot.slane %v1543_v51, 2  ;;  %v1551_v36 = vrot.slane %v1543_v51, 3  ;;  %v1552_v55 = vrot.slane %v1543_v51, 4 }
 0x38b   :  { %v1563_v39 = vperm.slane %v1543_v51, 0  ;;  %v1553_v23 = vrot.slane %v1543_v51, 5  ;;  %v1554_v42 = vrot.slane %v1543_v51, 6  ;;  %v1555_v25 = vrot.slane %v1543_v51, 7 }
 0x38c   :  { %v1564_v27 = vperm.slane %v1549_v54, 0  ;;  %v1565_v28 = vperm.slane %v1550_v62, 0  ;;  %v1566_v46 = vperm.slane %v1551_v36, 0  ;;  %v1567_v47 = vperm.slane %v1552_v55, 0 }
 0x38d   :  { %v1595_v29 = vadd.f32 %v1563_v39, %v3303_v7  ;;  %v1568_v32 = vperm.slane %v1553_v23, 0  ;;  %v1569_v33 = vperm.slane %v1554_v42, 0  ;;  %v1570_v37 = vperm.slane %v1555_v25, 0 }
 0x38e   :  { %v1596_v15 = vadd.f32 %v1564_v27, %v3306_v44  ;;  %v1597_v35 = vadd.f32 %v1565_v28, %v3309_v3  ;;  %v1598_v52 = vadd.f32 %v1566_v46, %v3312_v21  ;;  %v1599_v43 = vadd.f32 %v1567_v47, %v3315_v26 }
 0x38f   :  { %v1611_v2 = vadd.f32 %v1595_v29, %v1545_v14  ;;  %v1600_v51 = vadd.f32 %v1568_v32, %v3318_v11  ;;  %v1601_v54 = vadd.f32 %v1569_v33, %v3321_v12  ;;  %v1602_v62 = vadd.f32 %v1570_v37, %v3325_v59  ;;  %v3359_v12 = vpop.f32.mrf.mxu0 }
 0x390   :  { %v1612_v36 = vadd.f32 %v1596_v15, %v1545_v14  ;;  %v1613_v55 = vadd.f32 %v1597_v35, %v1545_v14  ;;  %v1614_v39 = vadd.f32 %v1598_v52, %v1545_v14  ;;  %v1615_v23 = vadd.f32 %v1599_v43, %v1545_v14  ;;  %v1256_v43 = vld [vmem:[#allocation5 + $0x258] sm:$0xff] }
 0x391   :  { %v3343_v42 = vadd.f32 %v1369_v1, %v3300_v6  ;;  %v1616_v25 = vadd.f32 %v1600_v51, %v1545_v14  ;;  %v1617_v27 = vadd.f32 %v1601_v54, %v1545_v14  ;;  %v1618_v28 = vadd.f32 %v1602_v62, %v1545_v14  ;;  %1851 = vmatpush.msrb.mxu2 %v1256_v43  ;;  %v1255_v51 = vld [vmem:[#allocation5 + $0x240] sm:$0xff] }
 0x392   :  { %v3346_v46 = vadd.f32 %v1372_v4, %v3300_v6  ;;  %vm1627_vm2 = vcmp.gt.f32.partialorder %v1611_v2, 0.0  ;;  %vm1628_vm9 = vcmp.gt.f32.partialorder %v1612_v36, 0.0  ;;  %vm1629_vm10 = vcmp.gt.f32.partialorder %v1613_v55, 0.0  ;;  %2253 = vmatpush.msrb.mxu3 %v1256_v43 }
 0x393   :  { %vm1630_vm11 = vcmp.gt.f32.partialorder %v1614_v39, 0.0  ;;  %vm1631_vm12 = vcmp.gt.f32.partialorder %v1615_v23, 0.0  ;;  %vm1632_vm13 = vcmp.gt.f32.partialorder %v1616_v25, 0.0  ;;  %vm1633_vm14 = vcmp.gt.f32.partialorder %v1617_v27, 0.0  ;;  %1852 = vmatpush.msrb.mxu2 %v1255_v51 }
 0x394   :  { %v3349_v47 = vadd.f32 %v1375_v10, %v3300_v6  ;;  %vm1634_vm0 = vcmp.gt.f32.partialorder %v1618_v28, 0.0  ;;  %v1643_v52 = vmul.f32 0.01, %v1611_v2  ;;  %v1644_v1 = vmul.f32 0.01, %v1612_v36  ;;  %v1254_v10 = vld [vmem:[#allocation5 + $0x228] sm:$0xff]  ;;  %2254 = vmatpush.msrb.mxu3 %v1255_v51 }
 0x395   :  { %v3352_v29 = vadd.f32 %v1378_v56, %v3300_v6  ;;  %v1645_v4 = vmul.f32 0.01, %v1613_v55  ;;  %v1646_v14 = vmul.f32 0.01, %v1614_v39  ;;  %v1647_v32 = vmul.f32 0.01, %v1615_v23  ;;  %1853 = vmatpush.msrb.mxu2 %v1254_v10 }
 0x396   :  { %v1648_v33 = vmul.f32 0.01, %v1616_v25  ;;  %v1649_v37 = vmul.f32 0.01, %v1617_v27  ;;  %v1650_v15 = vmul.f32 0.01, %v1618_v28  ;;  %v1659_v35 = vsel %vm1627_vm2, %v1611_v2, %v1643_v52  ;;  %2255 = vmatpush.msrb.mxu3 %v1254_v10 }
 0x397   :  { %v1660_v54 = vsel %vm1628_vm9, %v1612_v36, %v1644_v1  ;;  %v1661_v62 = vsel %vm1629_vm10, %v1613_v55, %v1645_v4  ;;  %v1662_v59 = vsel %vm1630_vm11, %v1614_v39, %v1646_v14  ;;  %v1663_v56 = vsel %vm1631_vm12, %v1615_v23, %v1647_v32  ;;  %v1253_v52 = vld [vmem:[#allocation5 + $0x210] sm:$0xff] }
 0x398   :  { %v1664_v43 = vsel %vm1632_vm13, %v1616_v25, %v1648_v33  ;;  %v1665_v11 = vsel %vm1633_vm14, %v1617_v27, %v1649_v37  ;;  %v1666_v26 = vsel %vm1634_vm0, %v1618_v28, %v1650_v15  ;;  %v1675_v2 = vmul.f32 %v1659_v35, %v2947_v9  ;;  %1854 = vmatpush.msrb.mxu2 %v1253_v52 }
 0x399   :  { %v1676_v36 = vmul.f32 %v1660_v54, %v2953_v13  ;;  %v1677_v55 = vmul.f32 %v1661_v62, %v2963_v24  ;;  %v1678_v39 = vmul.f32 %v1662_v59, %v3016_v18  ;;  %v1679_v23 = vmul.f32 %v1663_v56, %v3019_v31  ;;  %2256 = vmatpush.msrb.mxu3 %v1253_v52  ;;  %v1384_v52 = vpop.f32.mrf.mxu0 }
 0x39a   :  { %v1680_v1 = vmul.f32 %v1664_v43, %v3588_v8  ;;  %v1681_v25 = vmul.f32 %v1665_v11, %v3589_v48  ;;  %v1682_v27 = vmul.f32 %v1666_v26, %v3590_v16  ;;  %v1691_v28 = vsel %vm345_vm4, %v1675_v2, 0.0  ;;  %1934 = vmatpush.msra.mxu2 %v3258_v34 }
 0x39b   :  { %v1692_v4 = vrot.slane %v1691_v28, 4  ;;  %v1698_v14 = vsel %vm345_vm4, %v1676_v36, 0.0  ;;  %v1705_v32 = vsel %vm345_vm4, %v1677_v55, 0.0  ;;  %v1712_v33 = vsel %vm345_vm4, %v1678_v39, 0.0 }
 0x39c   :  { %v1699_v59 = vrot.slane %v1698_v14, 4  ;;  %v1706_v37 = vrot.slane %v1705_v32, 4  ;;  %v1713_v15 = vrot.slane %v1712_v33, 4  ;;  %v1719_v35 = vsel %vm345_vm4, %v1679_v23, 0.0  ;;  %1935 = vmatpush.msra.mxu2 %v3262_v22 }
 0x39d   :  { %v1693_v51 = vadd.f32 %v1692_v4, %v1691_v28  ;;  %v1720_v11 = vrot.slane %v1719_v35, 4  ;;  %v1726_v26 = vsel %vm345_vm4, %v1680_v1, 0.0  ;;  %v1733_v54 = vsel %vm345_vm4, %v1681_v25, 0.0 }
 0x39e   :  { %v1700_v62 = vadd.f32 %v1699_v59, %v1698_v14  ;;  %v1707_v56 = vadd.f32 %v1706_v37, %v1705_v32  ;;  %v1714_v43 = vadd.f32 %v1713_v15, %v1712_v33  ;;  %v1727_v2 = vrot.slane %v1726_v26, 4  ;;  %1936 = vmatpush.msra.mxu2 %v3265_v20 }
 0x39f   :  { %v1694_v10 = vrot.slane %v1693_v51, 2  ;;  %v1721_v36 = vadd.f32 %v1720_v11, %v1719_v35  ;;  %v1734_v55 = vrot.slane %v1733_v54, 4  ;;  %v1740_v39 = vsel %vm345_vm4, %v1682_v27, 0.0 }
 0x3a0   :  { %v1701_v23 = vrot.slane %v1700_v62, 2  ;;  %v1708_v28 = vrot.slane %v1707_v56, 2  ;;  %v1715_v4 = vrot.slane %v1714_v43, 2  ;;  %v1728_v1 = vadd.f32 %v1727_v2, %v1726_v26  ;;  %1937 = vmatpush.msra.mxu2 %v3268_v58 }
 0x3a1   :  { %v1695_v16 = vadd.f32 %v1694_v10, %v1693_v51  ;;  %v1722_v25 = vrot.slane %v1721_v36, 2  ;;  %v1735_v48 = vadd.f32 %v1734_v55, %v1733_v54  ;;  %v1741_v34 = vrot.slane %v1740_v39, 4 }
 0x3a2   :  { %v1702_v14 = vadd.f32 %v1701_v23, %v1700_v62  ;;  %v1709_v32 = vadd.f32 %v1708_v28, %v1707_v56  ;;  %v1716_v33 = vadd.f32 %v1715_v4, %v1714_v43  ;;  %v1729_v59 = vrot.slane %v1728_v1, 2 }
 0x3a3   :  { %v1696_v37 = vrot.slane %v1695_v16, 1  ;;  %v1723_v15 = vadd.f32 %v1722_v25, %v1721_v36  ;;  %v1736_v27 = vrot.slane %v1735_v48, 2  ;;  %v1742_v35 = vadd.f32 %v1741_v34, %v1740_v39 }
 0x3a4   :  { %v1703_v22 = vrot.slane %v1702_v14, 1  ;;  %v1710_v11 = vrot.slane %v1709_v32, 1  ;;  %v1717_v26 = vrot.slane %v1716_v33, 1  ;;  %v1730_v51 = vadd.f32 %v1729_v59, %v1728_v1 }
 0x3a5   :  { %v3385_v54 = vadd.f32 %v1384_v52, %v3300_v6  ;;  %v1724_v2 = vrot.slane %v1723_v15, 1  ;;  %v1737_v20 = vadd.f32 %v1736_v27, %v1735_v48  ;;  %v1743_v10 = vrot.slane %v1742_v35, 2 }
 0x3a6   :  { %v1494_v62 = vpop.f32.mrf.mxu3  ;;  %v1517_v56 = vpop.f32.mrf.mxu2  ;;  %v1697_v43 = vadd.f32 %v1696_v37, %v1695_v16  ;;  %v1704_v55 = vadd.f32 %v1703_v22, %v1702_v14  ;;  %v1711_v23 = vadd.f32 %v1710_v11, %v1709_v32  ;;  %v1731_v36 = vrot.slane %v1730_v51, 1 }
 0x3a7   :  { %v1544_v39 = vadd.f32 %v1494_v62, %v3290_v0  ;;  %v1546_v58 = vadd.f32 %v1517_v56, %v3296_v5  ;;  %v1718_v28 = vadd.f32 %v1717_v26, %v1716_v33  ;;  %v1738_v4 = vrot.slane %v1737_v20, 1 }
 0x3a8   :  { %v1725_v25 = vadd.f32 %v1724_v2, %v1723_v15  ;;  %v1732_v1 = vadd.f32 %v1731_v36, %v1730_v51  ;;  %v1744_v34 = vadd.f32 %v1743_v10, %v1742_v35  ;;  %v1821_v52 = vsel %vm779_vm15, %v1704_v55, %v1697_v43 }
 0x3a9   :  { %v1556_v59 = vrot.slane %v1544_v39, 1  ;;  %v1557_v48 = vrot.slane %v1544_v39, 2  ;;  %v1571_v27 = vperm.slane %v1544_v39, 0  ;;  %v1562_v8 = vrot.slane %v1544_v39, 7 }
 0x3aa   :  { %v1739_v31 = vadd.f32 %v1738_v4, %v1737_v20  ;;  %v1745_v16 = vrot.slane %v1744_v34, 1  ;;  %v1822_v14 = vsel %vm781_vm3, %v1711_v23, %v1821_v52  ;;  %v1558_v32 = vrot.slane %v1544_v39, 3 }
 0x3ab   :  { %v1572_v37 = vperm.slane %v1556_v59, 0  ;;  %v1573_v22 = vperm.slane %v1557_v48, 0  ;;  %v1578_v11 = vperm.slane %v1562_v8, 0  ;;  %v1823_v33 = vsel %vm783_vm5, %v1718_v28, %v1822_v14 }
 0x3ac   :  { %v1746_v26 = vadd.f32 %v1745_v16, %v1744_v34  ;;  %v1824_v15 = vsel %vm785_vm6, %v1725_v25, %v1823_v33  ;;  %v1559_v35 = vrot.slane %v1544_v39, 4  ;;  %v1560_v51 = vrot.slane %v1544_v39, 5 }
 0x3ad   :  { %v1610_v2 = vadd.f32 %v1578_v11, %v3385_v54  ;;  %v1825_v10 = vsel %vm787_vm7, %v1732_v1, %v1824_v15  ;;  %v1561_v62 = vrot.slane %v1544_v39, 6  ;;  %v1574_v20 = vperm.slane %v1558_v32, 0 }
 0x3ae   :  { %v1826_v56 = vsel %vm789_vm8, %v1739_v31, %v1825_v10  ;;  %v1575_v43 = vperm.slane %v1559_v35, 0  ;;  %v1576_v55 = vperm.slane %v1560_v51, 0  ;;  %v1603_v23 = vadd.f32 %v1571_v27, %v3328_v60 }
 0x3af   :  { %v3399_v8 = vadd.f32 %v3359_v12, %v3300_v6  ;;  %v1626_v36 = vadd.f32 %v1610_v2, %v1546_v58  ;;  %v1827_v28 = vsel %vm3627_vm1, %v1746_v26, %v1826_v56  ;;  %v1577_v4 = vperm.slane %v1561_v62, 0 }
 0x3b0   :  { %2637 = vmatmul.msk.f32.vlgmr.msrb.gmra.mxu2 %vm345_vm4, %v1827_v28  ;;  %v1604_v25 = vadd.f32 %v1572_v37, %v3331_v53  ;;  %v1605_v39 = vadd.f32 %v1573_v22, %v3343_v42  ;;  %v1606_v31 = vadd.f32 %v1574_v20, %v3346_v46  ;;  %v1607_v1 = vadd.f32 %v1575_v43, %v3349_v47 }
 0x3b1   :  { %vm1642_vm2 = vcmp.gt.f32.partialorder %v1626_v36, 0.0  ;;  %v1658_v34 = vmul.f32 0.01, %v1626_v36  ;;  %v1608_v52 = vadd.f32 %v1576_v55, %v3352_v29  ;;  %v1609_v6 = vadd.f32 %v1577_v4, %v3399_v8 }
 0x3b2   :  { %v1619_v12 = vadd.f32 %v1603_v23, %v1546_v58  ;;  %v1620_v59 = vadd.f32 %v1604_v25, %v1546_v58  ;;  %v1621_v48 = vadd.f32 %v1605_v39, %v1546_v58  ;;  %v1622_v27 = vadd.f32 %v1606_v31, %v1546_v58 }
 0x3b3   :  { %v1623_v16 = vadd.f32 %v1607_v1, %v1546_v58  ;;  %v1624_v14 = vadd.f32 %v1608_v52, %v1546_v58  ;;  %v1625_v32 = vadd.f32 %v1609_v6, %v1546_v58  ;;  %v1674_v37 = vsel %vm1642_vm2, %v1626_v36, %v1658_v34 }
 0x3b4   :  { %vm1635_vm9 = vcmp.gt.f32.partialorder %v1619_v12, 0.0  ;;  %vm1636_vm10 = vcmp.gt.f32.partialorder %v1620_v59, 0.0  ;;  %vm1637_vm11 = vcmp.gt.f32.partialorder %v1621_v48, 0.0  ;;  %vm1638_vm12 = vcmp.gt.f32.partialorder %v1622_v27, 0.0 }
 0x3b5   :  { %vm1639_vm13 = vcmp.gt.f32.partialorder %v1623_v16, 0.0  ;;  %vm1640_vm14 = vcmp.gt.f32.partialorder %v1624_v14, 0.0  ;;  %vm1641_vm0 = vcmp.gt.f32.partialorder %v1625_v32, 0.0  ;;  %v1651_v22 = vmul.f32 0.01, %v1619_v12 }
 0x3b6   :  { %v1652_v11 = vmul.f32 0.01, %v1620_v59  ;;  %v1653_v33 = vmul.f32 0.01, %v1621_v48  ;;  %v1690_v26 = vmul.f32 %v1674_v37, %v3596_v17  ;;  %v1654_v15 = vmul.f32 0.01, %v1622_v27 }
 0x3b7   :  { %v1655_v35 = vmul.f32 0.01, %v1623_v16  ;;  %v1656_v51 = vmul.f32 0.01, %v1624_v14  ;;  %v1657_v2 = vmul.f32 0.01, %v1625_v32  ;;  %v1667_v10 = vsel %vm1635_vm9, %v1619_v12, %v1651_v22 }
 0x3b8   :  { %v1668_v62 = vsel %vm1636_vm10, %v1620_v59, %v1652_v11  ;;  %v1669_v58 = vsel %vm1637_vm11, %v1621_v48, %v1653_v33  ;;  %v1670_v20 = vsel %vm1638_vm12, %v1622_v27, %v1654_v15  ;;  %v1683_v55 = vmul.f32 %v1667_v10, %v3069_v57 }
 0x3b9   :  { %v1671_v56 = vsel %vm1639_vm13, %v1623_v16, %v1655_v35  ;;  %v1672_v43 = vsel %vm1640_vm14, %v1624_v14, %v1656_v51  ;;  %v1673_v23 = vsel %vm1641_vm0, %v1625_v32, %v1657_v2  ;;  %v1684_v36 = vmul.f32 %v1668_v62, %v2985_v41 }
 0x3ba   :  { %v1685_v28 = vmul.f32 %v1669_v58, %v3082_v30  ;;  %v1686_v4 = vmul.f32 %v1670_v20, %v3084_v50  ;;  %v1687_v25 = vmul.f32 %v1671_v56, %v3021_v38  ;;  %v1688_v39 = vmul.f32 %v1672_v43, %v3106_v49 }
 0x3bb   :  { %v1689_v31 = vmul.f32 %v1673_v23, %v3108_v19  ;;  %v1747_v1 = vsel %vm345_vm4, %v1683_v55, 0.0  ;;  %v1754_v52 = vsel %vm345_vm4, %v1684_v36, 0.0  ;;  %v1796_v62 = vsel %vm345_vm4, %v1690_v26, 0.0 }
 0x3bc   :  { %v1748_v34 = vrot.slane %v1747_v1, 4  ;;  %v1761_v6 = vsel %vm345_vm4, %v1685_v28, 0.0  ;;  %v1768_v12 = vsel %vm345_vm4, %v1686_v4, 0.0  ;;  %v1755_v59 = vrot.slane %v1754_v52, 4 }
 0x3bd   :  { %v1762_v48 = vrot.slane %v1761_v6, 4  ;;  %v1769_v27 = vrot.slane %v1768_v12, 4  ;;  %v1775_v16 = vsel %vm345_vm4, %v1687_v25, 0.0  ;;  %v1782_v37 = vsel %vm345_vm4, %v1688_v39, 0.0 }
 0x3be   :  { %v1749_v14 = vadd.f32 %v1748_v34, %v1747_v1  ;;  %v1776_v32 = vrot.slane %v1775_v16, 4  ;;  %v1789_v22 = vsel %vm345_vm4, %v1689_v31, 0.0  ;;  %v1756_v11 = vadd.f32 %v1755_v59, %v1754_v52 }
 0x3bf   :  { %v1763_v33 = vadd.f32 %v1762_v48, %v1761_v6  ;;  %v1770_v15 = vadd.f32 %v1769_v27, %v1768_v12  ;;  %v1783_v35 = vrot.slane %v1782_v37, 4  ;;  %v1790_v10 = vrot.slane %v1789_v22, 4 }
 0x3c0   :  { %v1750_v51 = vrot.slane %v1749_v14, 2  ;;  %v1777_v2 = vadd.f32 %v1776_v32, %v1775_v16  ;;  %v1757_v58 = vrot.slane %v1756_v11, 2  ;;  %v1797_v28 = vrot.slane %v1796_v62, 4 }
 0x3c1   :  { %v1764_v20 = vrot.slane %v1763_v33, 2  ;;  %v1771_v56 = vrot.slane %v1770_v15, 2  ;;  %v1784_v43 = vadd.f32 %v1783_v35, %v1782_v37  ;;  %v1791_v36 = vadd.f32 %v1790_v10, %v1789_v22 }
 0x3c2   :  { %v1751_v55 = vadd.f32 %v1750_v51, %v1749_v14  ;;  %v1778_v23 = vrot.slane %v1777_v2, 2  ;;  %v1758_v4 = vadd.f32 %v1757_v58, %v1756_v11  ;;  %v1798_v6 = vadd.f32 %v1797_v28, %v1796_v62 }
 0x3c3   :  { %v1765_v25 = vadd.f32 %v1764_v20, %v1763_v33  ;;  %v1772_v39 = vadd.f32 %v1771_v56, %v1770_v15  ;;  %v1785_v31 = vrot.slane %v1784_v43, 2  ;;  %v1792_v52 = vrot.slane %v1791_v36, 2 }
 0x3c4   :  { %v1752_v1 = vrot.slane %v1751_v55, 1  ;;  %v1779_v34 = vadd.f32 %v1778_v23, %v1777_v2  ;;  %v1759_v12 = vrot.slane %v1758_v4, 1  ;;  %v1799_v32 = vrot.slane %v1798_v6, 2 }
 0x3c5   :  { %v1766_v59 = vrot.slane %v1765_v25, 1  ;;  %v1773_v48 = vrot.slane %v1772_v39, 1  ;;  %v1786_v26 = vadd.f32 %v1785_v31, %v1784_v43  ;;  %v1793_v16 = vadd.f32 %v1792_v52, %v1791_v36 }
 0x3c6   :  { %v1780_v27 = vrot.slane %v1779_v34, 1  ;;  %v1753_v37 = vadd.f32 %v1752_v1, %v1751_v55  ;;  %v1760_v14 = vadd.f32 %v1759_v12, %v1758_v4  ;;  %v1800_v11 = vadd.f32 %v1799_v32, %v1798_v6  ;;  %v1465_v4 = vld [vmem:[#allocation5 + $0x1f8] ss:$0 sm:$0xff] }
 0x3c7   :  { %v1767_v35 = vadd.f32 %v1766_v59, %v1765_v25  ;;  %v1787_v22 = vrot.slane %v1786_v26, 1  ;;  %v1794_v51 = vrot.slane %v1793_v16, 1  ;;  %v1774_v33 = vadd.f32 %v1773_v48, %v1772_v39  ;;  %v1537_v25 = vpop.f32.mrf.mxu3  ;;  %v2276_v12 = vld [vmem:[#allocation5 + $0x2b8] sm:$0xff]  ;;  %v2275_v59 = vld [vmem:[#allocation5 + $0x2a0] sm:$0xff]  ;;  %v2274_v48 = vld [vmem:[#allocation5 + $0x288] sm:$0xff] }
 0x3c8   :  { %v1828_v15 = vsel %vm779_vm15, %v1760_v14, %v1753_v37  ;;  %v1781_v10 = vadd.f32 %v1780_v27, %v1779_v34  ;;  %v1801_v2 = vrot.slane %v1800_v11, 1  ;;  %v3435_v39 = vadd.f32 %v1465_v4, %v3294_v61  ;;  %2293 = vmatpush.msra.mxu1 %v2276_v12  ;;  %v2273_v61 = vld [vmem:[#allocation5 + $0x270] sm:$0xff]  ;;  %v3630_v12 = vld [vmem:[#allocation19_spill] sm:$0xff] }
 0x3c9   :  { %v1829_v62 = vsel %vm781_vm3, %v1767_v35, %v1828_v15  ;;  %v1788_v58 = vadd.f32 %v1787_v22, %v1786_v26  ;;  %v1795_v56 = vadd.f32 %v1794_v51, %v1793_v16  ;;  %v3442_v27 = vadd.f32 %v1465_v4, %v3298_v40 }
 0x3ca   :  { %v1830_v20 = vsel %vm783_vm5, %v1774_v33, %v1829_v62  ;;  %v1802_v23 = vadd.f32 %v1801_v2, %v1800_v11  ;;  %v1803_v31 = vadd.f32 %v1537_v25, %v3435_v39  ;;  %2294 = vmatpush.msra.mxu1 %v2275_v59  ;;  %v3628_v11 = vld [vmem:[#allocation14_spill] sm:$0xff] }
 0x3cb   :  { %v1831_v43 = vsel %vm785_vm6, %v1781_v10, %v1830_v20 }
 0x3cc   :  { %v1832_v55 = vsel %vm787_vm7, %v1788_v58, %v1831_v43  ;;  %2295 = vmatpush.msra.mxu1 %v2274_v48  ;;  %v3631_v48 = vld [vmem:[#allocation20_spill] sm:$0xff] }
 0x3cd   :  { %v1833_v36 = vsel %vm789_vm8, %v1795_v56, %v1832_v55 }
 0x3ce   :  { %v1834_v28 = vsel %vm3627_vm1, %v1802_v23, %v1833_v36  ;;  %2296 = vmatpush.msra.mxu1 %v2273_v61 }
 0x3cf   :  { %2638 = vmatmul.msk.f32.gmra.mxu2 %vm345_vm4, %v1834_v28  ;;  %v1540_v26 = vpop.f32.mrf.mxu3 }
 0x3d0   :  { %v1804_v16 = vadd.f32 %v1540_v26, %v3442_v27  ;;  %v3632_v26 = vld [vmem:[#allocation21_spill] sm:$0xff] }
 0x433   :  { %v1856_v1 = vpop.f32.mrf.mxu2 }
 0x434   :  { %v1862_v34 = vadd.f32 %v1856_v1, %v1803_v31 }
 0x436   :  { %vm1864_vm2 = vcmp.gt.f32.partialorder %v1862_v34, 0.0  ;;  %v1866_v52 = vmul.f32 0.01, %v1862_v34 }
 0x438   :  { %v1868_v6 = vsel %vm1864_vm2, %v1862_v34, %v1866_v52  ;;  %v3629_v52 = vld [vmem:[#allocation15_spill] sm:$0xff] }
 0x439   :  { %2639 = vmatmul.msk.f32.vlgmr.msra.gmra.mxu3 %vm345_vm4, %v1868_v6  ;;  %2641 = vmatmul.msk.f32.vlgmr.msrb.gmra.mxu1 %vm345_vm4, %v1868_v6 }
 0x43a   :  { %2643 = vmatmul.msk.f32.vlgmr.msra.gmra.mxu2 %vm345_vm4, %v1868_v6 }
 0x452   :  { %v1859_v32 = vpop.f32.mrf.mxu2 }
 0x453   :  { %v1863_v37 = vadd.f32 %v1859_v32, %v1804_v16 }
 0x455   :  { %v1867_v14 = vmul.f32 0.01, %v1863_v37  ;;  %vm1865_vm9 = vcmp.gt.f32.partialorder %v1863_v37, 0.0 }
 0x457   :  { %v1869_v35 = vsel %vm1865_vm9, %v1863_v37, %v1867_v14  ;;  %vm3637_vm9 = vcmask 1047559  }
 0x458   :  { %2640 = vmatmul.msk.f32.gmra.mxu3 %vm345_vm4, %v1869_v35  ;;  %2642 = vmatmul.msk.f32.gmra.mxu1 %vm345_vm4, %v1869_v35 }
 0x459   :  { %2644 = vmatmul.msk.f32.gmra.mxu2 %vm345_vm4, %v1869_v35 }
 0x460   :  { %2647 = vmatmul.msk.f32.vlgmr.msra.gmra.mxu1 %vm345_vm4, %v3281_v45 }
 0x4b6   :  { %v1916_v22 = vpop.f32.mrf.mxu1 }
 0x4b7   :  { %v1947_v33 = vadd.f32 %v1916_v22, %v3628_v11 }
 0x4bc   :  { %v1893_v51 = vpop.f32.mrf.mxu3 }
 0x4bd   :  { %v1945_v40 = vadd.f32 %v1893_v51, %v3288_v63 }
 0x4bf   :  { %v1951_v15 = vrot.slane %v1945_v40, 1  ;;  %v1952_v10 = vrot.slane %v1945_v40, 2  ;;  %v1953_v2 = vrot.slane %v1945_v40, 3  ;;  %v1954_v62 = vrot.slane %v1945_v40, 4 }
 0x4c0   :  { %v1965_v58 = vperm.slane %v1945_v40, 0  ;;  %v1955_v20 = vrot.slane %v1945_v40, 5  ;;  %v1956_v56 = vrot.slane %v1945_v40, 6  ;;  %v1957_v43 = vrot.slane %v1945_v40, 7 }
 0x4c1   :  { %v1966_v23 = vperm.slane %v1951_v15, 0  ;;  %v1967_v55 = vperm.slane %v1952_v10, 0  ;;  %v1968_v36 = vperm.slane %v1953_v2, 0  ;;  %v1969_v28 = vperm.slane %v1954_v62, 0 }
 0x4c2   :  { %v1997_v45 = vadd.f32 %v1965_v58, %v3303_v7  ;;  %v1970_v4 = vperm.slane %v1955_v20, 0  ;;  %v1971_v25 = vperm.slane %v1956_v56, 0  ;;  %v1972_v31 = vperm.slane %v1957_v43, 0 }
 0x4c3   :  { %v1998_v63 = vadd.f32 %v1966_v23, %v3306_v44  ;;  %v1999_v1 = vadd.f32 %v1967_v55, %v3309_v3  ;;  %v2000_v34 = vadd.f32 %v1968_v36, %v3312_v21  ;;  %v2001_v6 = vadd.f32 %v1969_v28, %v3629_v52  ;;  %v3635_v52 = vld [vmem:[#allocation13_spill] sm:$0xff] }
 0x4c4   :  { %v2002_v59 = vadd.f32 %v1970_v4, %v3630_v12  ;;  %v2003_v61 = vadd.f32 %v1971_v25, %v3631_v48  ;;  %v2004_v16 = vadd.f32 %v1972_v31, %v3632_v26  ;;  %v2013_v32 = vadd.f32 %v1997_v45, %v1947_v33  ;;  %v3633_v31 = vld [vmem:[#allocation16_spill] sm:$0xff]  ;;  %v3636_v12 = vld [vmem:[#allocation17_spill] sm:$0xff] }
 0x4c5   :  { %v2014_v37 = vadd.f32 %v1998_v63, %v1947_v33  ;;  %v2015_v7 = vadd.f32 %v1999_v1, %v1947_v33  ;;  %v2016_v14 = vadd.f32 %v2000_v34, %v1947_v33  ;;  %v2017_v35 = vadd.f32 %v2001_v6, %v1947_v33  ;;  %v3634_v1 = vld [vmem:[#allocation18_spill] sm:$0xff] }
 0x4c6   :  { %v2018_v22 = vadd.f32 %v2002_v59, %v1947_v33  ;;  %v2019_v51 = vadd.f32 %v2003_v61, %v1947_v33  ;;  %v2020_v44 = vadd.f32 %v2004_v16, %v1947_v33  ;;  %vm2029_vm10 = vcmp.gt.f32.partialorder %v2013_v32, 0.0 }
 0x4c7   :  { %vm2030_vm11 = vcmp.gt.f32.partialorder %v2014_v37, 0.0  ;;  %vm2031_vm12 = vcmp.gt.f32.partialorder %v2015_v7, 0.0  ;;  %vm2032_vm13 = vcmp.gt.f32.partialorder %v2016_v14, 0.0  ;;  %vm2033_vm14 = vcmp.gt.f32.partialorder %v2017_v35, 0.0 }
 0x4c8   :  { %vm2034_vm0 = vcmp.gt.f32.partialorder %v2018_v22, 0.0  ;;  %vm2035_vm1 = vcmp.gt.f32.partialorder %v2019_v51, 0.0  ;;  %vm2036_vm2 = vcmp.gt.f32.partialorder %v2020_v44, 0.0  ;;  %v2045_v3 = vmul.f32 0.01, %v2013_v32 }
 0x4c9   :  { %v2046_v21 = vmul.f32 0.01, %v2014_v37  ;;  %v2047_v40 = vmul.f32 0.01, %v2015_v7  ;;  %v2048_v11 = vmul.f32 0.01, %v2016_v14 }
 0x4ca   :  { %v2049_v15 = vmul.f32 0.01, %v2017_v35  ;;  %v2050_v10 = vmul.f32 0.01, %v2018_v22  ;;  %v2051_v2 = vmul.f32 0.01, %v2019_v51  ;;  %v2061_v62 = vsel %vm2029_vm10, %v2013_v32, %v2045_v3 }
 0x4cb   :  { %v2052_v58 = vmul.f32 0.01, %v2020_v44  ;;  %v2062_v20 = vsel %vm2030_vm11, %v2014_v37, %v2046_v21  ;;  %v2063_v33 = vsel %vm2031_vm12, %v2015_v7, %v2047_v40  ;;  %v2064_v56 = vsel %vm2032_vm13, %v2016_v14, %v2048_v11 }
 0x4cc   :  { %v2065_v43 = vsel %vm2033_vm14, %v2017_v35, %v2049_v15  ;;  %v2066_v23 = vsel %vm2034_vm0, %v2018_v22, %v2050_v10  ;;  %v2067_v55 = vsel %vm2035_vm1, %v2019_v51, %v2051_v2  ;;  %v2077_v36 = vmul.f32 %v2061_v62, %v2947_v9 }
 0x4cd   :  { %v2068_v28 = vsel %vm2036_vm2, %v2020_v44, %v2052_v58  ;;  %v2078_v45 = vmul.f32 %v2062_v20, %v2953_v13  ;;  %v2079_v4 = vmul.f32 %v2063_v33, %v2963_v24  ;;  %v2080_v25 = vmul.f32 %v2064_v56, %v3016_v18 }
 0x4ce   :  { %v2081_v63 = vmul.f32 %v2065_v43, %v3633_v31  ;;  %v2082_v34 = vmul.f32 %v2066_v23, %v3634_v1  ;;  %v2083_v6 = vmul.f32 %v2067_v55, %v3635_v52  ;;  %v2084_v59 = vmul.f32 %v2068_v28, %v3636_v12 }
 0x4cf   :  { %v2093_v48 = vsel %vm345_vm4, %v2077_v36, 0.0  ;;  %v2100_v9 = vsel %vm345_vm4, %v2078_v45, 0.0  ;;  %v2107_v61 = vsel %vm345_vm4, %v2079_v4, 0.0  ;;  %v2114_v13 = vsel %vm345_vm4, %v2080_v25, 0.0 }
 0x4d0   :  { %v2094_v26 = vrot.slane %v2093_v48, 4  ;;  %v2101_v24 = vrot.slane %v2100_v9, 4  ;;  %v2108_v16 = vrot.slane %v2107_v61, 4  ;;  %v2115_v18 = vrot.slane %v2114_v13, 4 }
 0x4d1   :  { %v2121_v32 = vsel %vm345_vm4, %v2081_v63, 0.0  ;;  %v2128_v37 = vsel %vm345_vm4, %v2082_v34, 0.0  ;;  %v2135_v7 = vsel %vm345_vm4, %v2083_v6, 0.0  ;;  %v2142_v14 = vsel %vm345_vm4, %v2084_v59, 0.0 }
 0x4d2   :  { %v2095_v35 = vadd.f32 %v2094_v26, %v2093_v48  ;;  %v2102_v22 = vadd.f32 %v2101_v24, %v2100_v9  ;;  %v2109_v51 = vadd.f32 %v2108_v16, %v2107_v61  ;;  %v2116_v44 = vadd.f32 %v2115_v18, %v2114_v13 }
 0x4d3   :  { %v2122_v3 = vrot.slane %v2121_v32, 4  ;;  %v2129_v21 = vrot.slane %v2128_v37, 4  ;;  %v2136_v40 = vrot.slane %v2135_v7, 4  ;;  %v2143_v11 = vrot.slane %v2142_v14, 4 }
 0x4d4   :  { %v2096_v15 = vrot.slane %v2095_v35, 2  ;;  %v2103_v10 = vrot.slane %v2102_v22, 2  ;;  %v2110_v2 = vrot.slane %v2109_v51, 2  ;;  %v2117_v62 = vrot.slane %v2116_v44, 2 }
 0x4d5   :  { %v2123_v58 = vadd.f32 %v2122_v3, %v2121_v32  ;;  %v2130_v20 = vadd.f32 %v2129_v21, %v2128_v37  ;;  %v2137_v33 = vadd.f32 %v2136_v40, %v2135_v7  ;;  %v2144_v56 = vadd.f32 %v2143_v11, %v2142_v14  ;;  %v1919_v59 = vpop.f32.mrf.mxu1 }
 0x4d6   :  { %v2097_v43 = vadd.f32 %v2096_v15, %v2095_v35  ;;  %v2104_v23 = vadd.f32 %v2103_v10, %v2102_v22  ;;  %v2111_v55 = vadd.f32 %v2110_v2, %v2109_v51  ;;  %v2118_v36 = vadd.f32 %v2117_v62, %v2116_v44 }
 0x4d7   :  { %v2124_v28 = vrot.slane %v2123_v58, 2  ;;  %v2131_v45 = vrot.slane %v2130_v20, 2  ;;  %v2138_v4 = vrot.slane %v2137_v33, 2  ;;  %v2145_v12 = vrot.slane %v2144_v56, 2 }
 0x4d8   :  { %v2098_v25 = vrot.slane %v2097_v43, 1  ;;  %v2105_v31 = vrot.slane %v2104_v23, 1  ;;  %v2112_v63 = vrot.slane %v2111_v55, 1  ;;  %v2119_v1 = vrot.slane %v2118_v36, 1 }
 0x4d9   :  { %v2125_v34 = vadd.f32 %v2124_v28, %v2123_v58  ;;  %v2132_v52 = vadd.f32 %v2131_v45, %v2130_v20  ;;  %v2139_v6 = vadd.f32 %v2138_v4, %v2137_v33  ;;  %v2146_v16 = vadd.f32 %v2145_v12, %v2144_v56  ;;  %v2336_v12 = vld [vmem:[#allocation5 + $0x378] sm:$0xff] }
 0x4da   :  { %v2099_v48 = vadd.f32 %v2098_v25, %v2097_v43  ;;  %v2106_v9 = vadd.f32 %v2105_v31, %v2104_v23  ;;  %v2113_v61 = vadd.f32 %v2112_v63, %v2111_v55  ;;  %v1948_v37 = vadd.f32 %v1919_v59, %v3296_v5  ;;  %v2335_v59 = vld [vmem:[#allocation5 + $0x360] sm:$0xff]  ;;  %2353 = vmatpush.msra.mxu3 %v2336_v12 }
 0x4db   :  { %v2126_v13 = vrot.slane %v2125_v34, 1  ;;  %v2133_v26 = vrot.slane %v2132_v52, 1  ;;  %v2140_v24 = vrot.slane %v2139_v6, 1  ;;  %v1896_v18 = vpop.f32.mrf.mxu3  ;;  %v2120_v14 = vadd.f32 %v2119_v1, %v2118_v36 }
 0x4dc   :  { %v2223_v32 = vsel %vm779_vm15, %v2106_v9, %v2099_v48  ;;  %v1946_v7 = vadd.f32 %v1896_v18, %v3290_v0  ;;  %v2147_v51 = vrot.slane %v2146_v16, 1  ;;  %2354 = vmatpush.msra.mxu3 %v2335_v59 }
 0x4dd   :  { %v2127_v35 = vadd.f32 %v2126_v13, %v2125_v34  ;;  %v2134_v22 = vadd.f32 %v2133_v26, %v2132_v52  ;;  %v2224_v44 = vsel %vm781_vm3, %v2113_v61, %v2223_v32  ;;  %v2141_v11 = vadd.f32 %v2140_v24, %v2139_v6 }
 0x4de   :  { %v1958_v3 = vrot.slane %v1946_v7, 1  ;;  %v1959_v21 = vrot.slane %v1946_v7, 2  ;;  %v1973_v40 = vperm.slane %v1946_v7, 0  ;;  %v2148_v15 = vadd.f32 %v2147_v51, %v2146_v16 }
 0x4df   :  { %v2225_v10 = vsel %vm783_vm5, %v2120_v14, %v2224_v44  ;;  %v1960_v2 = vrot.slane %v1946_v7, 3  ;;  %v1961_v62 = vrot.slane %v1946_v7, 4  ;;  %v1962_v0 = vrot.slane %v1946_v7, 5 }
 0x4e0   :  { %v1974_v58 = vperm.slane %v1958_v3, 0  ;;  %v1975_v20 = vperm.slane %v1959_v21, 0  ;;  %v2226_v5 = vsel %vm785_vm6, %v2127_v35, %v2225_v10  ;;  %v1963_v56 = vrot.slane %v1946_v7, 6 }
 0x4e1   :  { %v2227_v33 = vsel %vm787_vm7, %v2134_v22, %v2226_v5  ;;  %v1964_v43 = vrot.slane %v1946_v7, 7  ;;  %v1976_v23 = vperm.slane %v1960_v2, 0  ;;  %v1977_v36 = vperm.slane %v1961_v62, 0 }
 0x4e2   :  { %v2228_v55 = vsel %vm789_vm8, %v2141_v11, %v2227_v33  ;;  %v1978_v28 = vperm.slane %v1962_v0, 0  ;;  %v2005_v45 = vadd.f32 %v1973_v40, %v3328_v60  ;;  %v1979_v25 = vperm.slane %v1963_v56, 0 }
 0x4e3   :  { %v2229_v4 = vsel %vm3637_vm9, %v2148_v15, %v2228_v55  ;;  %v1980_v31 = vperm.slane %v1964_v43, 0  ;;  %v2006_v63 = vadd.f32 %v1974_v58, %v3331_v53  ;;  %v2007_v1 = vadd.f32 %v1975_v20, %v3343_v42  ;;  %v2334_v42 = vld [vmem:[#allocation5 + $0x348] sm:$0xff] }
 0x4e4   :  { %2645 = vmatmul.msk.f32.vlgmr.msrb.gmra.mxu3 %vm345_vm4, %v2229_v4  ;;  %v2008_v34 = vadd.f32 %v1976_v23, %v3346_v46  ;;  %v2009_v52 = vadd.f32 %v1977_v36, %v3349_v47  ;;  %v2010_v6 = vadd.f32 %v1978_v28, %v3352_v29  ;;  %v2011_v60 = vadd.f32 %v1979_v25, %v3399_v8  ;;  %v2333_v47 = vld [vmem:[#allocation5 + $0x330] sm:$0xff] }
 0x4e5   :  { %v2012_v48 = vadd.f32 %v1980_v31, %v3385_v54  ;;  %v2021_v9 = vadd.f32 %v2005_v45, %v1948_v37  ;;  %v2022_v61 = vadd.f32 %v2006_v63, %v1948_v37  ;;  %v2023_v53 = vadd.f32 %v2007_v1, %v1948_v37  ;;  %2355 = vmatpush.msra.mxu3 %v2334_v42 }
 0x4e6   :  { %v2024_v13 = vadd.f32 %v2008_v34, %v1948_v37  ;;  %v2025_v26 = vadd.f32 %v2009_v52, %v1948_v37  ;;  %v2026_v24 = vadd.f32 %v2010_v6, %v1948_v37  ;;  %v2027_v16 = vadd.f32 %v2011_v60, %v1948_v37 }
 0x4e7   :  { %v2028_v46 = vadd.f32 %v2012_v48, %v1948_v37  ;;  %vm2037_vm10 = vcmp.gt.f32.partialorder %v2021_v9, 0.0  ;;  %vm2038_vm11 = vcmp.gt.f32.partialorder %v2022_v61, 0.0  ;;  %vm2039_vm12 = vcmp.gt.f32.partialorder %v2023_v53, 0.0  ;;  %2356 = vmatpush.msra.mxu3 %v2333_v47 }
 0x4e8   :  { %vm2040_vm13 = vcmp.gt.f32.partialorder %v2024_v13, 0.0  ;;  %vm2041_vm14 = vcmp.gt.f32.partialorder %v2025_v26, 0.0  ;;  %vm2042_vm0 = vcmp.gt.f32.partialorder %v2026_v24, 0.0  ;;  %vm2043_vm1 = vcmp.gt.f32.partialorder %v2027_v16, 0.0 }
 0x4e9   :  { %vm2044_vm2 = vcmp.gt.f32.partialorder %v2028_v46, 0.0  ;;  %v2053_v29 = vmul.f32 0.01, %v2021_v9  ;;  %v2054_v54 = vmul.f32 0.01, %v2022_v61 }
 0x4ea   :  { %v2055_v8 = vmul.f32 0.01, %v2023_v53  ;;  %v2056_v18 = vmul.f32 0.01, %v2024_v13  ;;  %v2057_v32 = vmul.f32 0.01, %v2025_v26 }
 0x4eb   :  { %v2058_v7 = vmul.f32 0.01, %v2026_v24  ;;  %v2059_v14 = vmul.f32 0.01, %v2027_v16  ;;  %v2060_v35 = vmul.f32 0.01, %v2028_v46  ;;  %v2069_v37 = vsel %vm2037_vm10, %v2021_v9, %v2053_v29 }
 0x4ec   :  { %v2070_v22 = vsel %vm2038_vm11, %v2022_v61, %v2054_v54  ;;  %v2071_v51 = vsel %vm2039_vm12, %v2023_v53, %v2055_v8  ;;  %v2072_v44 = vsel %vm2040_vm13, %v2024_v13, %v2056_v18  ;;  %v2073_v3 = vsel %vm2041_vm14, %v2025_v26, %v2057_v32 }
 0x4ed   :  { %v2074_v21 = vsel %vm2042_vm0, %v2026_v24, %v2058_v7  ;;  %v2075_v40 = vsel %vm2043_vm1, %v2027_v16, %v2059_v14  ;;  %v2076_v11 = vsel %vm2044_vm2, %v2028_v46, %v2060_v35  ;;  %v2085_v15 = vmul.f32 %v2069_v37, %v3069_v57 }
 0x4ee   :  { %v2086_v10 = vmul.f32 %v2070_v22, %v2985_v41  ;;  %v2087_v2 = vmul.f32 %v2071_v51, %v3082_v30  ;;  %v2088_v62 = vmul.f32 %v2072_v44, %v3084_v50  ;;  %v2089_v58 = vmul.f32 %v2073_v3, %v3021_v38 }
 0x4ef   :  { %v2090_v20 = vmul.f32 %v2074_v21, %v3106_v49  ;;  %v2091_v5 = vmul.f32 %v2075_v40, %v3108_v19  ;;  %v2092_v0 = vmul.f32 %v2076_v11, %v3596_v17  ;;  %v2149_v33 = vsel %vm345_vm4, %v2085_v15, 0.0 }
 0x4f0   :  { %v2150_v56 = vrot.slane %v2149_v33, 4  ;;  %v2156_v43 = vsel %vm345_vm4, %v2086_v10, 0.0  ;;  %v2163_v57 = vsel %vm345_vm4, %v2087_v2, 0.0  ;;  %v2170_v41 = vsel %vm345_vm4, %v2088_v62, 0.0 }
 0x4f1   :  { %v2157_v30 = vrot.slane %v2156_v43, 4  ;;  %v2164_v23 = vrot.slane %v2163_v57, 4  ;;  %v2171_v50 = vrot.slane %v2170_v41, 4  ;;  %v2177_v38 = vsel %vm345_vm4, %v2089_v58, 0.0 }
 0x4f2   :  { %v2151_v55 = vadd.f32 %v2150_v56, %v2149_v33  ;;  %v2178_v49 = vrot.slane %v2177_v38, 4  ;;  %v2184_v19 = vsel %vm345_vm4, %v2090_v20, 0.0  ;;  %v2191_v17 = vsel %vm345_vm4, %v2091_v5, 0.0  ;;  %v3638_v56 = vld [vmem:[#allocation11_spill] sm:$0xff] }
 0x4f3   :  { %v2158_v36 = vadd.f32 %v2157_v30, %v2156_v43  ;;  %v2165_v28 = vadd.f32 %v2164_v23, %v2163_v57  ;;  %v2172_v45 = vadd.f32 %v2171_v50, %v2170_v41  ;;  %v2185_v4 = vrot.slane %v2184_v19, 4  ;;  %v2305_v43 = vld [vmem:[#allocation5 + $0x318] sm:$0xff]  ;;  %v2304_v57 = vld [vmem:[#allocation5 + $0x300] sm:$0xff]  ;;  %v2303_v30 = vld [vmem:[#allocation5 + $0x2e8] sm:$0xff] }
 0x4f4   :  { %v2152_v25 = vrot.slane %v2151_v55, 2  ;;  %v2179_v31 = vadd.f32 %v2178_v49, %v2177_v38  ;;  %v2192_v63 = vrot.slane %v2191_v17, 4  ;;  %v2198_v1 = vsel %vm345_vm4, %v2092_v0, 0.0  ;;  %2324 = vmatpush.msrb.mxu2 %v2305_v43  ;;  %v2365_v41 = vld [vmem:[#allocation5 + $0x3d8] sm:$0xff]  ;;  %v2364_v23 = vld [vmem:[#allocation5 + $0x3c0] sm:$0xff]  ;;  %v2363_v38 = vld [vmem:[#allocation5 + $0x3a8] sm:$0xff] }
 0x4f5   :  { %v2159_v34 = vrot.slane %v2158_v36, 2  ;;  %v2166_v52 = vrot.slane %v2165_v28, 2  ;;  %v2173_v6 = vrot.slane %v2172_v45, 2  ;;  %v2186_v12 = vadd.f32 %v2185_v4, %v2184_v19  ;;  %2382 = vmatpush.msrb.mxu1 %v2365_v41  ;;  %v2424_v50 = vld [vmem:[#allocation5 + $0x498] sm:$0xff]  ;;  %v2302_v49 = vld [vmem:[#allocation5 + $0x2d0] sm:$0xff]  ;;  %v2392_v4 = vld [vmem:[#allocation5 + $0x408] sm:$0xff] }
 0x4f6   :  { %v2153_v59 = vadd.f32 %v2152_v25, %v2151_v55  ;;  %v2180_v60 = vrot.slane %v2179_v31, 2  ;;  %v2193_v48 = vadd.f32 %v2192_v63, %v2191_v17  ;;  %v2199_v9 = vrot.slane %v2198_v1, 4  ;;  %2325 = vmatpush.msrb.mxu2 %v2304_v57  ;;  %v2423_v55 = vld [vmem:[#allocation5 + $0x480] sm:$0xff]  ;;  %2442 = vmatpush.msrb.mxu3 %v2424_v50  ;;  %v2362_v19 = vld [vmem:[#allocation5 + $0x390] sm:$0xff]  ;;  %v2422_v17 = vld [vmem:[#allocation5 + $0x468] sm:$0xff] }
 0x4f7   :  { %v2160_v61 = vadd.f32 %v2159_v34, %v2158_v36  ;;  %v2167_v53 = vadd.f32 %v2166_v52, %v2165_v28  ;;  %v2174_v13 = vadd.f32 %v2173_v6, %v2172_v45  ;;  %v2187_v26 = vrot.slane %v2186_v12, 2  ;;  %2383 = vmatpush.msrb.mxu1 %v2364_v23  ;;  %v2394_v36 = vld [vmem:[#allocation5 + $0x438] sm:$0xff]  ;;  %v2393_v28 = vld [vmem:[#allocation5 + $0x420] sm:$0xff]  ;;  %v2421_v45 = vld [vmem:[#allocation5 + $0x450] sm:$0xff] }
 0x4f8   :  { %v2154_v24 = vrot.slane %v2153_v59, 1  ;;  %v2181_v42 = vadd.f32 %v2180_v60, %v2179_v31  ;;  %v2194_v16 = vrot.slane %v2193_v48, 2  ;;  %v2200_v46 = vadd.f32 %v2199_v9, %v2198_v1  ;;  %2326 = vmatpush.msrb.mxu2 %v2303_v30  ;;  %2443 = vmatpush.msrb.mxu3 %v2423_v55  ;;  %v2391_v25 = vld [vmem:[#allocation5 + $0x3f0] sm:$0xff]  ;;  %v2466_v63 = vld [vmem:[#allocation5 + $0x618] sm:$0xff]  ;;  %v1939_v1 = vpop.f32.mrf.mxu2  ;;  %v2494_v50 = vld [vmem:[#allocation5 + $0x6c0] sm:$0xff] }
 0x4f9   :  { %v2161_v47 = vrot.slane %v2160_v61, 1  ;;  %v2168_v29 = vrot.slane %v2167_v53, 1  ;;  %v2175_v54 = vrot.slane %v2174_v13, 1  ;;  %v2188_v8 = vadd.f32 %v2187_v26, %v2186_v12  ;;  %2384 = vmatpush.msrb.mxu1 %v2363_v38  ;;  %v2467_v31 = vld [vmem:[#allocation5 + $0x630] sm:$0xff]  ;;  %v2493_v38 = vld [vmem:[#allocation5 + $0x6a8] sm:$0xff] }
 0x4fa   :  { %v2182_v18 = vrot.slane %v2181_v42, 1  ;;  %v2195_v32 = vadd.f32 %v2194_v16, %v2193_v48  ;;  %v2201_v7 = vrot.slane %v2200_v46, 2  ;;  %v2155_v14 = vadd.f32 %v2154_v24, %v2153_v59  ;;  %2327 = vmatpush.msrb.mxu2 %v2302_v49  ;;  %2444 = vmatpush.msrb.mxu3 %v2422_v17  ;;  %v2492_v55 = vld [vmem:[#allocation5 + $0x690] sm:$0xff]  ;;  %v2491_v49 = vld [vmem:[#allocation5 + $0x678] sm:$0xff]  ;;  %v2468_v17 = vld [vmem:[#allocation5 + $0x648] ss:$0 sm:$0xff] }
 0x4fb   :  { %v2162_v35 = vadd.f32 %v2161_v47, %v2160_v61  ;;  %v2169_v37 = vadd.f32 %v2168_v29, %v2167_v53  ;;  %v2189_v22 = vrot.slane %v2188_v8, 1  ;;  %v2176_v3 = vadd.f32 %v2175_v54, %v2174_v13  ;;  %2385 = vmatpush.msrb.mxu1 %v2362_v19  ;;  %v2465_v29 = vld [vmem:[#allocation5 + $0x600] sm:$0xff]  ;;  %v2464_v54 = vld [vmem:[#allocation5 + $0x5e8] sm:$0xff] }
 0x4fc   :  { %v2196_v51 = vrot.slane %v2195_v32, 1  ;;  %v2202_v44 = vadd.f32 %v2201_v7, %v2200_v46  ;;  %v2183_v40 = vadd.f32 %v2182_v18, %v2181_v42  ;;  %2412 = vmatpush.msra.mxu2 %v2394_v36  ;;  %2445 = vmatpush.msrb.mxu3 %v2421_v45  ;;  %v2205_v52 = vadd.f32 %v1939_v1, %v3435_v39  ;;  %v2462_v18 = vld [vmem:[#allocation5 + $0x5b8] sm:$0xff]  ;;  %v2460_v7 = vld [vmem:[#allocation5 + $0x588] sm:$0xff]  ;;  %v2490_v19 = vld [vmem:[#allocation5 + $0x660] sm:$0xff] }
 0x4fd   :  { %v2230_v21 = vsel %vm779_vm15, %v2162_v35, %v2155_v14  ;;  %v2190_v10 = vadd.f32 %v2189_v22, %v2188_v8  ;;  %2469 = vmatpush.msra.mxu1 %v2467_v31  ;;  %v2463_v8 = vld [vmem:[#allocation5 + $0x5d0] sm:$0xff]  ;;  %v2458_v35 = vld [vmem:[#allocation5 + $0x558] sm:$0xff]  ;;  %v2456_v22 = vld [vmem:[#allocation5 + $0x528] sm:$0xff] }
 0x4fe   :  { %v2203_v11 = vrot.slane %v2202_v44, 1  ;;  %v2231_v15 = vsel %vm781_vm3, %v2169_v37, %v2230_v21  ;;  %v2197_v62 = vadd.f32 %v2196_v51, %v2195_v32  ;;  %2413 = vmatpush.msra.mxu2 %v2393_v28  ;;  %v2461_v32 = vld [vmem:[#allocation5 + $0x5a0] sm:$0xff]  ;;  %v2459_v14 = vld [vmem:[#allocation5 + $0x570] sm:$0xff]  ;;  %v2497_v21 = vld [vmem:[#allocation5 + $0x708] sm:$0xff] }
 0x4ff   :  { %v2232_v2 = vsel %vm783_vm5, %v2176_v3, %v2231_v15  ;;  %2470 = vmatpush.msra.mxu1 %v2466_v63  ;;  %v2457_v37 = vld [vmem:[#allocation5 + $0x540] sm:$0xff]  ;;  %v2455_v51 = vld [vmem:[#allocation5 + $0x510] sm:$0xff]  ;;  %v2495_v15 = vld [vmem:[#allocation5 + $0x6d8] sm:$0xff] }
 0x500   :  { %v2233_v58 = vsel %vm785_vm6, %v2183_v40, %v2232_v2  ;;  %v2204_v20 = vadd.f32 %v2203_v11, %v2202_v44  ;;  %2414 = vmatpush.msra.mxu2 %v2392_v4  ;;  %v1942_v12 = vpop.f32.mrf.mxu2  ;;  %v2454_v44 = vld [vmem:[#allocation5 + $0x4f8] sm:$0xff]  ;;  %v2453_v3 = vld [vmem:[#allocation5 + $0x4e0] sm:$0xff]  ;;  %v2496_v40 = vld [vmem:[#allocation5 + $0x6f0] sm:$0xff]  ;;  %v2298_v2 = vpop.f32.mrf.mxu1 }
 0x501   :  { %v2234_v5 = vsel %vm787_vm7, %v2190_v10, %v2233_v58  ;;  %v2206_v60 = vadd.f32 %v1942_v12, %v3442_v27  ;;  %v3639_v27 = vld [vmem:[#allocation12_spill] sm:$0xff]  ;;  %2471 = vmatpush.msra.mxu1 %v2465_v29  ;;  %v2272_v10 = vld [vmem:[#allocation5 + $0x4b0] ss:$0 sm:$0xff]  ;;  %v2498_v4 = vld [vmem:[#allocation5 + $0x720] ss:$0 sm:$0xff] }
 0x502   :  { %v2235_v0 = vsel %vm789_vm8, %v2197_v62, %v2234_v5  ;;  %2415 = vmatpush.msra.mxu2 %v2391_v25  ;;  %v2452_v11 = vld [vmem:[#allocation5 + $0x4c8] sm:$0xff]  ;;  %v2301_v62 = vadd.f32 %v2298_v2, %v2272_v10  ;;  %vm2542_vm8 = vcmask 33792  }
 0x503   :  { %v2236_v33 = vsel %vm3637_vm9, %v2204_v20, %v2235_v0  ;;  %2472 = vmatpush.msra.mxu1 %v2464_v54 }
 0x504   :  { %2646 = vmatmul.msk.f32.gmra.mxu3 %vm345_vm4, %v2236_v33 }
 0x505   :  { %2473 = vmatpush.msra.mxu1 %v2463_v8 }
 0x507   :  { %2474 = vmatpush.msra.mxu1 %v2462_v18 }
 0x509   :  { %2475 = vmatpush.msra.mxu1 %v2461_v32 }
 0x50b   :  { %2476 = vmatpush.msra.mxu1 %v2460_v7 }
 0x50c   :  { %2649 = vmatmul.msk.f32.vlgmr.msra.gmra.mxu3 %vm345_vm4, %v3638_v56 }
 0x50d   :  { %2477 = vmatpush.msra.mxu1 %v2459_v14 }
 0x50f   :  { %2478 = vmatpush.msra.mxu1 %v2458_v35 }
 0x511   :  { %2479 = vmatpush.msra.mxu1 %v2457_v37 }
 0x513   :  { %2480 = vmatpush.msra.mxu1 %v2456_v22 }
 0x515   :  { %2481 = vmatpush.msra.mxu1 %v2455_v51 }
 0x517   :  { %2482 = vmatpush.msra.mxu1 %v2454_v44 }
 0x519   :  { %2483 = vmatpush.msra.mxu1 %v2453_v3 }
 0x51b   :  { %2484 = vmatpush.msra.mxu1 %v2452_v11 }
 0x567   :  { %v2258_v34 = vpop.f32.mrf.mxu3 }
 0x568   :  { %v2264_v6 = vadd.f32 %v2258_v34, %v2205_v52 }
 0x56a   :  { %v2268_v59 = vmul.f32 0.01, %v2264_v6  ;;  %vm2266_vm3 = vcmp.gt.f32.partialorder %v2264_v6, 0.0 }
 0x56c   :  { %v2270_v9 = vsel %vm2266_vm3, %v2264_v6, %v2268_v59 }
 0x56d   :  { %v2366_v13 = vrot.slane %v2270_v9, 1  ;;  %v2425_v24 = vrot.slane %v2270_v9, 2 }
 0x587   :  { %v2261_v48 = vpop.f32.mrf.mxu3 }
 0x588   :  { %v2265_v61 = vadd.f32 %v2261_v48, %v2206_v60 }
 0x58a   :  { %vm2267_vm5 = vcmp.gt.f32.partialorder %v2265_v61, 0.0  ;;  %v2269_v53 = vmul.f32 0.01, %v2265_v61 }
 0x58c   :  { %v2271_v26 = vsel %vm2267_vm5, %v2265_v61, %v2269_v53 }
 0x58d   :  { %v2308_v42 = vrot.slane %v2271_v26, 7  ;;  %v2426_v16 = vrot.slane %v2271_v26, 1  ;;  %v2367_v46 = vsel %vm779_vm15, %v2271_v26, %v2366_v13 }
 0x58e   :  { %2650 = vmatmul.msk.f32.vlgmr.msrb.gmra.mxu1 %vm345_vm4, %v2367_v46 }
 0x58f   :  { %v2309_v39 = vsel %vm779_vm15, %v2308_v42, %v2270_v9  ;;  %v2427_v47 = vsel %vm779_vm15, %v2426_v16, %v2425_v24  ;;  %v2358_v5 = vpop.f32.mrf.mxu3 }
 0x590   :  { %2648 = vmatmul.msk.f32.vlgmr.msrb.gmra.mxu2 %vm345_vm4, %v2309_v39  ;;  %2652 = vmatmul.msk.f32.vlgmr.msrb.gmra.mxu3 %vm345_vm4, %v2427_v47 }
 0x591   :  { %2511 = vmatpush.msrb.mxu2 %v2497_v21 }
 0x593   :  { %2512 = vmatpush.msrb.mxu2 %v2496_v40 }
 0x595   :  { %2513 = vmatpush.msrb.mxu2 %v2495_v15 }
 0x597   :  { %2514 = vmatpush.msrb.mxu2 %v2494_v50 }
 0x598   :  { %2651 = vmatmul.msk.f32.vlgmr.msra.gmra.mxu2 %vm345_vm4, %v3639_v27  ;;  %vm2499_vm4 = vcmask 523264  }
 0x599   :  { %2515 = vmatpush.msrb.mxu2 %v2493_v38 }
 0x59b   :  { %2516 = vmatpush.msrb.mxu2 %v2492_v55 }
 0x59d   :  { %2517 = vmatpush.msrb.mxu2 %v2491_v49 }
 0x59f   :  { %2518 = vmatpush.msrb.mxu2 %v2490_v19 }
 0x60b   :  { %v2387_v33 = vpop.f32.mrf.mxu1 }
 0x613   :  { %v2329_v58 = vpop.f32.mrf.mxu2  ;;  %v2447_v41 = vpop.f32.mrf.mxu3 }
 0x614   :  { %v2332_v20 = vadd.f32 %v2329_v58, %v2301_v62 }
 0x616   :  { %v2361_v0 = vadd.f32 %v2358_v5, %v2332_v20 }
 0x618   :  { %v2390_v56 = vadd.f32 %v2387_v33, %v2361_v0 }
 0x61b   :  { %v2417_v43 = vpop.f32.mrf.mxu2 }
 0x61c   :  { %v2420_v57 = vadd.f32 %v2417_v43, %v2390_v56 }
 0x61e   :  { %v2450_v30 = vadd.f32 %v2447_v41, %v2420_v57 }
 0x620   :  { %2667 = vtanh.f32 %v2450_v30 }
 0x626   :  { %v2668_v23 = vpop.eup %2667 }
 0x627   :  { %2485 = vmatmul.f32.vlgmr.msra.gmra.mxu1 %v2668_v23 }
 0x6a4   :  { %v2486_v36 = vpop.f32.mrf.mxu1 }
 0x6a5   :  { %v2487_v28 = vadd.f32 %v2486_v36, %v2468_v17 }
 0x6a7   :  { %2669 = vtanh.f32 %v2487_v28 }
 0x6ad   :  { %v2670_v45 = vpop.eup %2669 }
 0x6ae   :  { %2653 = vmatmul.msk.f32.vlgmr.msrb.gmra.mxu2 %vm2499_vm4, %v2670_v45 }
 0x731   :  { %v2520_v25 = vpop.f32.mrf.mxu2 }
 0x732   :  { %v2521_v31 = vadd.f32 %v2520_v25, %v2498_v4 }
 0x734   :  { %v2654_v63 = vmul.f32 -1.442695, %v2521_v31 }
 0x736   :  { %2671 = vpow2.f32 %v2654_v63 }
 0x73c   :  { %v2672_v1 = vpop.eup %2671 }
 0x73d   :  { %v2526_v34 = vadd.f32 1.0, %v2672_v1 }
 0x73f   :  { %2673 = vrcp.f32 %v2526_v34  ;;  %v2538_v59 = vand.u32 2147483648, %v2526_v34  ;;  %v2536_v48 = vand.u32 2147483647, %v2526_v34  ;;  %vm2532_vm6 = vweird.f32 %v2526_v34 }
 0x741   :  { %v2539_v61 = vor.u32 1.1754944e-38, %v2538_v59  ;;  %vm2537_vm10 = vcmp.eq.f32.partialorder %v2536_v48, 8.507059e+37 }
 0x745   :  { %v2674_v52 = vpop.eup %2673 }
 0x746   :  { %v2528_v6 = vmul.f32 %v2674_v52, %v2526_v34  ;;  %vm2533_vm15 = vweird.f32 %v2674_v52 }
 0x747   :  { %vm2534_vm7 = vmor %vm2532_vm6, %vm2533_vm15 }
 0x748   :  { %v2529_v12 = vsub.f32 1.0, %v2528_v6 }
 0x74a   :  { %v2530_v60 = vmul.f32 %v2674_v52, %v2529_v12 }
 0x74c   :  { %v2531_v9 = vadd.f32 %v2674_v52, %v2530_v60 }
 0x74e   :  { %v2535_v53 = vsel %vm2534_vm7, %v2674_v52, %v2531_v9 }
 0x74f   :  { %v2540_v13 = vsel %vm2537_vm10, %v2539_v61, %v2535_v53 }
 0x750   :  { %2543 = vst.msk [vmem:[#allocation7] sm:$0x3] %vm2542_vm8, %v2540_v13 }
 0x751   :  { %2554 = dma.vmem_to_hbm [thread:$0]  %s2550_s21, 32, %s2552_s24, [#allocation4]  }
 0x752   :  { %2753 = dma.done.wait [#allocation4], 32  }
 0x753   :  { %2754 = vsyncadd [#allocation4], 4294967264 }
 0x754   :  { %2559 = vsyncpa [#allocation3], 1 }
 0x755   :  { %2560 = vsyncpa [#allocation6], 1 }
 0x756   :  { %2561 = vsyncpa [#allocation4], 1 }

</bundles_post_ra>
